<compile_context>
chip_gen: v6e
topology: v6e:2x2x1
jax: 0.10.0
libtpu: 0.0.40
codegen_flags: <defaults>
</compile_context>

<pallas_src>
import functools

import jax
import jax.numpy as jnp
from jax.experimental import pallas as pl
from jax.experimental.pallas import tpu as pltpu


# ---------------------------------------------------------------------------
# BlockSpec helper: whole-array blocks, trivial grid.
# ---------------------------------------------------------------------------
def _spec(shape):
    nd = len(shape)
    return pl.BlockSpec(shape, lambda i, nd=nd: (0,) * nd)


_CPARAMS = pltpu.CompilerParams(dimension_semantics=("arbitrary",))

_N_LAYER_REFS = 8   # w_abde, b_abde, w_c, b_c, gamma, beta, wd, bd
_N_MLP_REFS = 6     # w1, b1, w2, b2, w3, b3


# ---------------------------------------------------------------------------
# Single fused kernel: prologue + all GatedGCN layers + DenseLayers + MLP.
# ---------------------------------------------------------------------------
def _fused_forward_kernel(*refs, seq_len, n_nodes, n_edges, hidden,
                          n_layers, residual):
    N, E, H, T = n_nodes, n_edges, hidden, seq_len
    f32 = jnp.float32
    it = iter(refs)

    hfeat = next(it)[...]; wh = next(it)[...]; bh = next(it)[...]
    efeat = next(it)[...]; we = next(it)[...]; be = next(it)[...]
    x = next(it)[...]; mask = next(it)[...]
    wih = next(it)[...]; bih = next(it)[...]
    whh_f = next(it)[...]; whh_b = next(it)[...]
    src_idx = next(it)[...]; dst_idx = next(it)[...]
    snn = next(it)[...]; sne = next(it)[...]
    layer_refs = [tuple(next(it) for _ in range(_N_LAYER_REFS))
                  for _ in range(n_layers)]
    mlp_refs = tuple(next(it) for _ in range(_N_MLP_REFS))
    out_ref = next(it)

    # ---- prologue: node / edge input embeddings ---------------------------
    h_emb = jnp.dot(hfeat, wh, preferred_element_type=f32) + bh
    e_emb = jnp.dot(efeat, we, preferred_element_type=f32) + be

    # ---- bidirectional LSTM over the padded text sequence -----------------
    # Both directions' input projections hoisted out of the recurrence and
    # fused into one lane-dense (T*N, H) x (H, 8H) matmul.
    gx = jnp.dot(x, wih, preferred_element_type=f32) + bih          # (T*N, 8H)
    gx_f = gx[:, 0:4 * H]
    gx_b = gx[:, 4 * H:8 * H]
    inv_mask = 1.0 - mask

    def run_dir(gx_d, whh, order):
        h = jnp.zeros((N, H), f32)
        c = jnp.zeros((N, H), f32)
        for t in order:                      # static unroll (T small & fixed)
            gates = gx_d[t * N:(t + 1) * N, :] + jnp.dot(
                h, whh, preferred_element_type=f32)                 # (N, 4H)
            m = mask[t * N:(t + 1) * N, :]
            im = inv_mask[t * N:(t + 1) * N, :]
            # Gate layout in the fused weights is [i, f, o, g]:
            # one contiguous 96-lane sigmoid + one 32-lane tanh per step.
            sig = jax.nn.sigmoid(gates[:, 0:3 * H])
            i_g = sig[:, 0:H]
            f_g = sig[:, H:2 * H]
            o_g = sig[:, 2 * H:3 * H]
            g_g = jnp.tanh(gates[:, 3 * H:4 * H])
            c_new = f_g * c + i_g * g_g
            h_new = o_g * jnp.tanh(c_new)
            h = m * h_new + im * h           # packed-sequence masking
            c = m * c_new + im * c
        return h

    h_f = run_dir(gx_f, whh_f, range(T))
    h_b = run_dir(gx_b, whh_b, range(T - 1, -1, -1))

    text_vec = (h_f + h_b) * 0.5             # h_last.mean(0)
    nrm = jnp.sqrt(jnp.sum(text_vec * text_vec, axis=1, keepdims=True))
    text_vec = text_vec / jnp.maximum(nrm, 1e-12)   # F.normalize(p=2, dim=1)

    h = h_emb + text_vec
    e = e_emb

    # ---- incidence one-hots built in VMEM (never materialized in HBM) -----
    col = jax.lax.broadcasted_iota(jnp.int32, (E, N), 1)
    src_oh = (src_idx == col).astype(f32)    # (E, N)
    dst_oh = (dst_idx == col).astype(f32)    # (E, N)

    # ---- GatedGCN layers + DenseLayers ------------------------------------
    pieces = [h]                             # all_h, kept concat-free in VMEM
    for li in range(n_layers):
        (wabde_ref, babde_ref, wc_ref, bc_ref,
         gamma_ref, beta_ref, wd_ref, bd_ref) = layer_refs[li]

        # Fused A/B/D/E linear, column order [B, D, E, A]: one lane-dense
        # (H, 4H) = (32, 128) matmul; the src-gathered pair (B, D) is one
        # contiguous 64-lane slice starting at lane 0.
        abde = jnp.dot(h, wabde_ref[...],
                       preferred_element_type=f32) + babde_ref[...]
        Ce = jnp.dot(e, wc_ref[...], preferred_element_type=f32) + bc_ref[...]

        bd_e = jnp.dot(src_oh, abde[:, 0:2 * H], preferred_element_type=f32)
        Bh_e = bd_e[:, 0:H]
        Dh_e = bd_e[:, H:2 * H]
        Eh_e = jnp.dot(dst_oh, abde[:, 2 * H:3 * H], preferred_element_type=f32)
        Ah = abde[:, 3 * H:4 * H]

        e_new = Ce + Dh_e + Eh_e             # raw e_ij (pre norm/relu/residual)
        sigma = jax.nn.sigmoid(e_new)

        # Edge -> node reduction: contract dim 0 of dst_oh directly (no
        # materialized dst_oh^T).  Exact division matches the reference.
        dn = (((0,), (0,)), ((), ()))
        num = jax.lax.dot_general(dst_oh, sigma * Bh_e, dn,
                                  preferred_element_type=f32)
        den = jax.lax.dot_general(dst_oh, sigma, dn,
                                  preferred_element_type=f32) + 1e-6
        h1 = Ah + num / den

        h1 = h1 * snn                        # graph_norm
        h1 = jnp.maximum(h1, 0.0)            # ReLU
        if residual:
            h1 = h + h1

        if li < n_layers - 1:                # edge stream only feeds next layer
            e_out = e_new * sne
            e_out = jnp.maximum(e_out, 0.0)
            if residual:
                e_out = e + e_out
            e = e_out

        pieces.append(h1)

        # DenseLayer: LayerNorm(concat(all_h)) -> ReLU -> Linear, evaluated
        # piece-wise (no lane concat / relayout).
        d_tot = float(len(pieces) * H)
        mu = sum(jnp.sum(p, axis=1, keepdims=True) for p in pieces) / d_tot
        var = sum(jnp.sum((p - mu) ** 2, axis=1, keepdims=True)
                  for p in pieces) / d_tot
        inv = jax.lax.rsqrt(var + 1e-5)
        gamma = gamma_ref[...]
        beta = beta_ref[...]
        wd = wd_ref[...]
        h_next = bd_ref[...]
        for j, p in enumerate(pieces):
            xj = jnp.maximum((p - mu) * inv * gamma[:, j * H:(j + 1) * H]
                             + beta[:, j * H:(j + 1) * H], 0.0)
            h_next = h_next + jnp.dot(xj, wd[j * H:(j + 1) * H, :],
                                      preferred_element_type=f32)
        h = h_next

    # ---- MLP readout (stays in VMEM/vregs) ---------------------------------
    w1, b1, w2, b2, w3, b3 = (r[...] for r in mlp_refs)
    y = jnp.maximum(jnp.dot(h, w1, preferred_element_type=f32) + b1, 0.0)
    y = jnp.maximum(jnp.dot(y, w2, preferred_element_type=f32) + b2, 0.0)
    out_ref[...] = jnp.dot(y, w3, preferred_element_type=f32) + b3


# ---------------------------------------------------------------------------
# Wrapper: builds the flat argument list and launches the single kernel.
# ---------------------------------------------------------------------------
def gated_gcn_forward(params, h_feat, e_feat, text, text_length,
                      snorm_n, snorm_e, src_idx, dst_idx, *, residual=True):
    n_nodes, seq_len = text.shape
    hidden = params['emb_h']['w'].shape[1]
    n_edges = e_feat.shape[0]
    n_layers = len(params['gcn'])
    n_classes = params['mlp'][-1]['w'].shape[1]

    # TODO(synk): the embedding lookup is a data-dependent gather with no clean
    # Pallas TPU equivalent at this scale; it stays in XLA outside the kernel.
    text_emb = params['emb_text'][text]                                # (N, T, H)
    x_flat = jnp.transpose(text_emb, (1, 0, 2)).reshape(seq_len * n_nodes, hidden)
    mask = (jnp.arange(seq_len)[:, None] < text_length[None, :]).astype(jnp.float32)
    mask_flat = mask.reshape(seq_len * n_nodes, 1)                     # (T*N, 1)

    lstm = params['lstm']
    args = [h_feat, params['emb_h']['w'], params['emb_h']['b'],
            e_feat, params['emb_e']['w'], params['emb_e']['b'],
            x_flat, mask_flat,
            lstm['wih'], lstm['b'], lstm['whh_f'], lstm['whh_b'],
            src_idx.reshape(n_edges, 1).astype(jnp.int32),
            dst_idx.reshape(n_edges, 1).astype(jnp.int32),
            snorm_n, snorm_e]
    for gp, dp in zip(params['gcn'], params['dense']):
        args += [gp['w_abde'], gp['b_abde'], gp['w_c'], gp['b_c'],
                 dp['gamma'], dp['beta'], dp['w'], dp['b']]
    for lp in params['mlp']:
        args += [lp['w'], lp['b']]

    return pl.pallas_call(
        functools.partial(_fused_forward_kernel, seq_len=seq_len,
                          n_nodes=n_nodes, n_edges=n_edges, hidden=hidden,
                          n_layers=n_layers, residual=residual),
        out_shape=jax.ShapeDtypeStruct((n_nodes, n_classes), jnp.float32),
        grid=(1,),
        in_specs=[_spec(a.shape) for a in args],
        out_specs=_spec((n_nodes, n_classes)),
        compiler_params=_CPARAMS,
    )(*args)


# ---------------------------------------------------------------------------
# Parameter construction (deterministic, synthetic).
# Weights stored pre-transposed as (in_dim, out_dim); biases as (1, out_dim).
# Per-gate / per-branch weights are generated separately (PyTorch layout) and
# then re-packed into the kernel's fused layouts.
# ---------------------------------------------------------------------------
def init_params(key, vocab, in_node, in_edge, hidden, n_classes, n_layers):
    keys = iter(jax.random.split(key, 512))
    H = hidden

    def nrm(shape, scale=0.1):
        return (scale * jax.random.normal(next(keys), shape)).astype(jnp.float32)

    def lin(i, o):
        return {'w': nrm((i, o)), 'b': nrm((1, o))}

    def lstm_dir():
        # Per-gate weights in PyTorch order [i, f, g, o] ...
        wi, wf, wg, wo = (nrm((H, H)) for _ in range(4))
        ui, uf, ug, uo = (nrm((H, H)) for _ in range(4))
        bi, bf, bg, bo = (nrm((1, H)) for _ in range(4))
        # ... re-packed to the kernel's fused gate order [i, f, o, g] so the
        # three sigmoid gates form one contiguous 96-lane slice.
        wih = jnp.concatenate([wi, wf, wo, wg], axis=1)   # (H, 4H)
        whh = jnp.concatenate([ui, uf, uo, ug], axis=1)   # (H, 4H)
        b = jnp.concatenate([bi, bf, bo, bg], axis=1)     # (1, 4H)
        return wih, whh, b

    wih_f, whh_f, b_f = lstm_dir()
    wih_b, whh_b, b_b = lstm_dir()

    p = {
        'emb_text': nrm((vocab, H)),
        'emb_h': lin(in_node, H),
        'emb_e': lin(in_edge, H),
        'lstm': {
            # fwd|bwd input projections fused into one (H, 8H) matmul operand.
            'wih': jnp.concatenate([wih_f, wih_b], axis=1),   # (H, 8H)
            'b': jnp.concatenate([b_f, b_b], axis=1),         # (1, 8H)
            'whh_f': whh_f,
            'whh_b': whh_b,
        },
        'gcn': [],
        'dense': [],
        'mlp': [lin(H, H // 2), lin(H // 2, H // 4), lin(H // 4, n_classes)],
    }
    for _ in range(n_layers):
        A, B, C, D, E = (lin(H, H) for _ in range(5))
        # Fused A/B/D/E column order [B, D, E, A]: the src-gathered pair (B, D)
        # is contiguous and starts at lane 0.
        p['gcn'].append({
            'w_abde': jnp.concatenate([B['w'], D['w'], E['w'], A['w']], axis=1),
            'b_abde': jnp.concatenate([B['b'], D['b'], E['b'], A['b']], axis=1),
            'w_c': C['w'], 'b_c': C['b'],
        })
    for i in range(1, n_layers + 1):
        in_dim = hidden + i * hidden
        p['dense'].append({
            'gamma': jnp.ones((1, in_dim), jnp.float32),
            'beta': jnp.zeros((1, in_dim), jnp.float32),
            'w': nrm((in_dim, hidden)),
            'b': nrm((1, hidden)),
        })
    return p


# ---------------------------------------------------------------------------
# Main.
# ---------------------------------------------------------------------------
if __name__ == "__main__":
    # net_params (synthetic): graph_norm=True, batch_norm=False, residual=True.
    # TODO(synk): GraphNorm (batch_norm=True path) is not defined in the
    # reference source, so batch_norm is disabled.
    VOCAB = 50
    IN_DIM_NODE = 8
    IN_DIM_EDGE = 8
    HIDDEN = 32
    N_CLASSES = 5
    N_LAYERS = 2
    N_NODES = 8
    N_EDGES = N_NODES * N_NODES      # dense fully-connected graph w/ self-loops
    SEQ_LEN = 6

    key = jax.random.PRNGKey(0)
    k_params, k_h, k_e, k_text, k_len, k_sn, k_se = jax.random.split(key, 7)

    params = init_params(k_params, VOCAB, IN_DIM_NODE, IN_DIM_EDGE,
                         HIDDEN, N_CLASSES, N_LAYERS)

    h_feat = jax.random.normal(k_h, (N_NODES, IN_DIM_NODE), jnp.float32)
    e_feat = jax.random.normal(k_e, (N_EDGES, IN_DIM_EDGE), jnp.float32)
    text = jax.random.randint(k_text, (N_NODES, SEQ_LEN), 0, VOCAB, jnp.int32)
    text_length = jax.random.randint(k_len, (N_NODES,), 1, SEQ_LEN + 1, jnp.int32)
    snorm_n = jax.random.uniform(k_sn, (N_NODES, 1), jnp.float32, 0.1, 1.0)
    snorm_e = jax.random.uniform(k_se, (N_EDGES, 1), jnp.float32, 0.1, 1.0)

    # Synthetic dense directed graph with self loops: edge r = dst*N + src.
    src_idx = jnp.arange(N_EDGES, dtype=jnp.int32) % N_NODES
    dst_idx = jnp.arange(N_EDGES, dtype=jnp.int32) // N_NODES

    fwd = jax.jit(gated_gcn_forward)
    out = fwd(params, h_feat, e_feat, text, text_length, snorm_n, snorm_e,
              src_idx, dst_idx)
    out = jax.block_until_ready(out)
    assert out.shape == (N_NODES, N_CLASSES)
    assert bool(jnp.all(jnp.isfinite(out)))
    print("KERNEL_OK")
</pallas_src>

<mosaic_0001>
module attributes {stable_mosaic.version = 11 : i64} {
  func.func @_fused_forward_kernel(%arg0: i32, %arg1: memref<8x8xf32, #tpu.memory_space<vmem>>, %arg2: memref<8x32xf32, #tpu.memory_space<vmem>>, %arg3: memref<1x32xf32, #tpu.memory_space<vmem>>, %arg4: memref<64x8xf32, #tpu.memory_space<vmem>>, %arg5: memref<8x32xf32, #tpu.memory_space<vmem>>, %arg6: memref<1x32xf32, #tpu.memory_space<vmem>>, %arg7: memref<48x32xf32, #tpu.memory_space<vmem>>, %arg8: memref<48x1xf32, #tpu.memory_space<vmem>>, %arg9: memref<32x256xf32, #tpu.memory_space<vmem>>, %arg10: memref<1x256xf32, #tpu.memory_space<vmem>>, %arg11: memref<32x128xf32, #tpu.memory_space<vmem>>, %arg12: memref<32x128xf32, #tpu.memory_space<vmem>>, %arg13: memref<64x1xi32, #tpu.memory_space<vmem>>, %arg14: memref<64x1xi32, #tpu.memory_space<vmem>>, %arg15: memref<8x1xf32, #tpu.memory_space<vmem>>, %arg16: memref<64x1xf32, #tpu.memory_space<vmem>>, %arg17: memref<32x128xf32, #tpu.memory_space<vmem>>, %arg18: memref<1x128xf32, #tpu.memory_space<vmem>>, %arg19: memref<32x32xf32, #tpu.memory_space<vmem>>, %arg20: memref<1x32xf32, #tpu.memory_space<vmem>>, %arg21: memref<1x64xf32, #tpu.memory_space<vmem>>, %arg22: memref<1x64xf32, #tpu.memory_space<vmem>>, %arg23: memref<64x32xf32, #tpu.memory_space<vmem>>, %arg24: memref<1x32xf32, #tpu.memory_space<vmem>>, %arg25: memref<32x128xf32, #tpu.memory_space<vmem>>, %arg26: memref<1x128xf32, #tpu.memory_space<vmem>>, %arg27: memref<32x32xf32, #tpu.memory_space<vmem>>, %arg28: memref<1x32xf32, #tpu.memory_space<vmem>>, %arg29: memref<1x96xf32, #tpu.memory_space<vmem>>, %arg30: memref<1x96xf32, #tpu.memory_space<vmem>>, %arg31: memref<96x32xf32, #tpu.memory_space<vmem>>, %arg32: memref<1x32xf32, #tpu.memory_space<vmem>>, %arg33: memref<32x16xf32, #tpu.memory_space<vmem>>, %arg34: memref<1x16xf32, #tpu.memory_space<vmem>>, %arg35: memref<16x8xf32, #tpu.memory_space<vmem>>, %arg36: memref<1x8xf32, #tpu.memory_space<vmem>>, %arg37: memref<8x5xf32, #tpu.memory_space<vmem>>, %arg38: memref<1x5xf32, #tpu.memory_space<vmem>>, %arg39: memref<8x5xf32, #tpu.memory_space<vmem>>) attributes {dimension_semantics = [#tpu.dimension_semantics<arbitrary>], iteration_bounds = array<i64: 1>, scalar_prefetch = 0 : i64, scratch_operands = 0 : i64, tpu.core_type = #tpu.core_type<tc>, window_params = [{pipeline_mode = #tpu.pipeline_mode<synchronous>, transform_indices = @transform_0, window_bounds = array<i64: 8, 8>}, {pipeline_mode = #tpu.pipeline_mode<synchronous>, transform_indices = @transform_1, window_bounds = array<i64: 8, 32>}, {pipeline_mode = #tpu.pipeline_mode<synchronous>, transform_indices = @transform_2, window_bounds = array<i64: 1, 32>}, {pipeline_mode = #tpu.pipeline_mode<synchronous>, transform_indices = @transform_3, window_bounds = array<i64: 64, 8>}, {pipeline_mode = #tpu.pipeline_mode<synchronous>, transform_indices = @transform_4, window_bounds = array<i64: 8, 32>}, {pipeline_mode = #tpu.pipeline_mode<synchronous>, transform_indices = @transform_5, window_bounds = array<i64: 1, 32>}, {pipeline_mode = #tpu.pipeline_mode<synchronous>, transform_indices = @transform_6, window_bounds = array<i64: 48, 32>}, {pipeline_mode = #tpu.pipeline_mode<synchronous>, transform_indices = @transform_7, window_bounds = array<i64: 48, 1>}, {pipeline_mode = #tpu.pipeline_mode<synchronous>, transform_indices = @transform_8, window_bounds = array<i64: 32, 256>}, {pipeline_mode = #tpu.pipeline_mode<synchronous>, transform_indices = @transform_9, window_bounds = array<i64: 1, 256>}, {pipeline_mode = #tpu.pipeline_mode<synchronous>, transform_indices = @transform_10, window_bounds = array<i64: 32, 128>}, {pipeline_mode = #tpu.pipeline_mode<synchronous>, transform_indices = @transform_11, window_bounds = array<i64: 32, 128>}, {pipeline_mode = #tpu.pipeline_mode<synchronous>, transform_indices = @transform_12, window_bounds = array<i64: 64, 1>}, {pipeline_mode = #tpu.pipeline_mode<synchronous>, transform_indices = @transform_13, window_bounds = array<i64: 64, 1>}, {pipeline_mode = #tpu.pipeline_mode<synchronous>, transform_indices = @transform_14, window_bounds = array<i64: 8, 1>}, {pipeline_mode = #tpu.pipeline_mode<synchronous>, transform_indices = @transform_15, window_bounds = array<i64: 64, 1>}, {pipeline_mode = #tpu.pipeline_mode<synchronous>, transform_indices = @transform_16, window_bounds = array<i64: 32, 128>}, {pipeline_mode = #tpu.pipeline_mode<synchronous>, transform_indices = @transform_17, window_bounds = array<i64: 1, 128>}, {pipeline_mode = #tpu.pipeline_mode<synchronous>, transform_indices = @transform_18, window_bounds = array<i64: 32, 32>}, {pipeline_mode = #tpu.pipeline_mode<synchronous>, transform_indices = @transform_19, window_bounds = array<i64: 1, 32>}, {pipeline_mode = #tpu.pipeline_mode<synchronous>, transform_indices = @transform_20, window_bounds = array<i64: 1, 64>}, {pipeline_mode = #tpu.pipeline_mode<synchronous>, transform_indices = @transform_21, window_bounds = array<i64: 1, 64>}, {pipeline_mode = #tpu.pipeline_mode<synchronous>, transform_indices = @transform_22, window_bounds = array<i64: 64, 32>}, {pipeline_mode = #tpu.pipeline_mode<synchronous>, transform_indices = @transform_23, window_bounds = array<i64: 1, 32>}, {pipeline_mode = #tpu.pipeline_mode<synchronous>, transform_indices = @transform_24, window_bounds = array<i64: 32, 128>}, {pipeline_mode = #tpu.pipeline_mode<synchronous>, transform_indices = @transform_25, window_bounds = array<i64: 1, 128>}, {pipeline_mode = #tpu.pipeline_mode<synchronous>, transform_indices = @transform_26, window_bounds = array<i64: 32, 32>}, {pipeline_mode = #tpu.pipeline_mode<synchronous>, transform_indices = @transform_27, window_bounds = array<i64: 1, 32>}, {pipeline_mode = #tpu.pipeline_mode<synchronous>, transform_indices = @transform_28, window_bounds = array<i64: 1, 96>}, {pipeline_mode = #tpu.pipeline_mode<synchronous>, transform_indices = @transform_29, window_bounds = array<i64: 1, 96>}, {pipeline_mode = #tpu.pipeline_mode<synchronous>, transform_indices = @transform_30, window_bounds = array<i64: 96, 32>}, {pipeline_mode = #tpu.pipeline_mode<synchronous>, transform_indices = @transform_31, window_bounds = array<i64: 1, 32>}, {pipeline_mode = #tpu.pipeline_mode<synchronous>, transform_indices = @transform_32, window_bounds = array<i64: 32, 16>}, {pipeline_mode = #tpu.pipeline_mode<synchronous>, transform_indices = @transform_33, window_bounds = array<i64: 1, 16>}, {pipeline_mode = #tpu.pipeline_mode<synchronous>, transform_indices = @transform_34, window_bounds = array<i64: 16, 8>}, {pipeline_mode = #tpu.pipeline_mode<synchronous>, transform_indices = @transform_35, window_bounds = array<i64: 1, 8>}, {pipeline_mode = #tpu.pipeline_mode<synchronous>, transform_indices = @transform_36, window_bounds = array<i64: 8, 5>}, {pipeline_mode = #tpu.pipeline_mode<synchronous>, transform_indices = @transform_37, window_bounds = array<i64: 1, 5>}, {pipeline_mode = #tpu.pipeline_mode<synchronous>, transform_indices = @transform_38, window_bounds = array<i64: 8, 5>}]} {
    %c0 = arith.constant 0 : index
    %c0_0 = arith.constant 0 : index
    %0 = vector.load %arg1[%c0, %c0_0] : memref<8x8xf32, #tpu.memory_space<vmem>>, vector<8x8xf32>
    %c0_1 = arith.constant 0 : index
    %c0_2 = arith.constant 0 : index
    %1 = vector.load %arg2[%c0_1, %c0_2] : memref<8x32xf32, #tpu.memory_space<vmem>>, vector<8x32xf32>
    %c0_3 = arith.constant 0 : index
    %c0_4 = arith.constant 0 : index
    %2 = vector.load %arg3[%c0_3, %c0_4] : memref<1x32xf32, #tpu.memory_space<vmem>>, vector<1x32xf32>
    %c0_5 = arith.constant 0 : index
    %c0_6 = arith.constant 0 : index
    %3 = vector.load %arg4[%c0_5, %c0_6] : memref<64x8xf32, #tpu.memory_space<vmem>>, vector<64x8xf32>
    %c0_7 = arith.constant 0 : index
    %c0_8 = arith.constant 0 : index
    %4 = vector.load %arg5[%c0_7, %c0_8] : memref<8x32xf32, #tpu.memory_space<vmem>>, vector<8x32xf32>
    %c0_9 = arith.constant 0 : index
    %c0_10 = arith.constant 0 : index
    %5 = vector.load %arg6[%c0_9, %c0_10] : memref<1x32xf32, #tpu.memory_space<vmem>>, vector<1x32xf32>
    %c0_11 = arith.constant 0 : index
    %c0_12 = arith.constant 0 : index
    %6 = vector.load %arg7[%c0_11, %c0_12] : memref<48x32xf32, #tpu.memory_space<vmem>>, vector<48x32xf32>
    %c0_13 = arith.constant 0 : index
    %c0_14 = arith.constant 0 : index
    %7 = vector.load %arg8[%c0_13, %c0_14] : memref<48x1xf32, #tpu.memory_space<vmem>>, vector<48x1xf32>
    %c0_15 = arith.constant 0 : index
    %c0_16 = arith.constant 0 : index
    %8 = vector.load %arg9[%c0_15, %c0_16] : memref<32x256xf32, #tpu.memory_space<vmem>>, vector<32x256xf32>
    %c0_17 = arith.constant 0 : index
    %c0_18 = arith.constant 0 : index
    %9 = vector.load %arg10[%c0_17, %c0_18] : memref<1x256xf32, #tpu.memory_space<vmem>>, vector<1x256xf32>
    %c0_19 = arith.constant 0 : index
    %c0_20 = arith.constant 0 : index
    %10 = vector.load %arg11[%c0_19, %c0_20] : memref<32x128xf32, #tpu.memory_space<vmem>>, vector<32x128xf32>
    %c0_21 = arith.constant 0 : index
    %c0_22 = arith.constant 0 : index
    %11 = vector.load %arg12[%c0_21, %c0_22] : memref<32x128xf32, #tpu.memory_space<vmem>>, vector<32x128xf32>
    %c0_23 = arith.constant 0 : index
    %c0_24 = arith.constant 0 : index
    %12 = vector.load %arg13[%c0_23, %c0_24] : memref<64x1xi32, #tpu.memory_space<vmem>>, vector<64x1xi32>
    %c0_25 = arith.constant 0 : index
    %c0_26 = arith.constant 0 : index
    %13 = vector.load %arg14[%c0_25, %c0_26] : memref<64x1xi32, #tpu.memory_space<vmem>>, vector<64x1xi32>
    %c0_27 = arith.constant 0 : index
    %c0_28 = arith.constant 0 : index
    %14 = vector.load %arg15[%c0_27, %c0_28] : memref<8x1xf32, #tpu.memory_space<vmem>>, vector<8x1xf32>
    %c0_29 = arith.constant 0 : index
    %c0_30 = arith.constant 0 : index
    %15 = vector.load %arg16[%c0_29, %c0_30] : memref<64x1xf32, #tpu.memory_space<vmem>>, vector<64x1xf32>
    %cst = arith.constant dense<0.000000e+00> : vector<8x32xf32>
    %16 = tpu.matmul %0, %1, %cst {dimension_numbers = #tpu.dot_dimension_numbers<[1], [0], [0], [1], [0, 0, 1, 1], [], []>} : vector<8x8xf32>, vector<8x32xf32>, vector<8x32xf32> -> vector<8x32xf32>
    %17 = vector.broadcast %2 : vector<1x32xf32> to vector<8x32xf32>
    %18 = arith.addf %16, %17 : vector<8x32xf32>
    %cst_31 = arith.constant dense<0.000000e+00> : vector<64x32xf32>
    %19 = tpu.matmul %3, %4, %cst_31 {dimension_numbers = #tpu.dot_dimension_numbers<[1], [0], [0], [1], [0, 0, 1, 1], [], []>} : vector<64x8xf32>, vector<8x32xf32>, vector<64x32xf32> -> vector<64x32xf32>
    %20 = vector.broadcast %5 : vector<1x32xf32> to vector<64x32xf32>
    %21 = arith.addf %19, %20 : vector<64x32xf32>
    %cst_32 = arith.constant dense<0.000000e+00> : vector<48x256xf32>
    %22 = tpu.matmul %6, %8, %cst_32 {dimension_numbers = #tpu.dot_dimension_numbers<[1], [0], [0], [1], [0, 0, 1, 1], [], []>} : vector<48x32xf32>, vector<32x256xf32>, vector<48x256xf32> -> vector<48x256xf32>
    %23 = vector.broadcast %9 : vector<1x256xf32> to vector<48x256xf32>
    %24 = arith.addf %22, %23 : vector<48x256xf32>
    %25 = vector.extract_strided_slice %24 {offsets = [0, 0], sizes = [48, 128], strides = [1, 1]} : vector<48x256xf32> to vector<48x128xf32>
    %26 = vector.extract_strided_slice %24 {offsets = [0, 128], sizes = [48, 128], strides = [1, 1]} : vector<48x256xf32> to vector<48x128xf32>
    %cst_33 = arith.constant 1.000000e+00 : f32
    %27 = vector.broadcast %cst_33 : f32 to vector<48x1xf32>
    %28 = arith.subf %27, %7 : vector<48x1xf32>
    %cst_34 = arith.constant 0.000000e+00 : f32
    %29 = vector.broadcast %cst_34 : f32 to vector<8x32xf32>
    %cst_35 = arith.constant 0.000000e+00 : f32
    %30 = vector.broadcast %cst_35 : f32 to vector<8x32xf32>
    %31 = vector.extract_strided_slice %25 {offsets = [0, 0], sizes = [8, 128], strides = [1, 1]} : vector<48x128xf32> to vector<8x128xf32>
    %cst_36 = arith.constant dense<0.000000e+00> : vector<8x128xf32>
    %32 = tpu.matmul %29, %10, %cst_36 {dimension_numbers = #tpu.dot_dimension_numbers<[1], [0], [0], [1], [0, 0, 1, 1], [], []>} : vector<8x32xf32>, vector<32x128xf32>, vector<8x128xf32> -> vector<8x128xf32>
    %33 = arith.addf %31, %32 : vector<8x128xf32>
    %34 = vector.extract_strided_slice %7 {offsets = [0, 0], sizes = [8, 1], strides = [1, 1]} : vector<48x1xf32> to vector<8x1xf32>
    %35 = vector.extract_strided_slice %28 {offsets = [0, 0], sizes = [8, 1], strides = [1, 1]} : vector<48x1xf32> to vector<8x1xf32>
    %36 = vector.extract_strided_slice %33 {offsets = [0, 0], sizes = [8, 96], strides = [1, 1]} : vector<8x128xf32> to vector<8x96xf32>
    %37 = arith.negf %36 : vector<8x96xf32>
    %38 = math.exp %37 : vector<8x96xf32>
    %cst_37 = arith.constant 1.000000e+00 : f32
    %39 = vector.broadcast %cst_37 : f32 to vector<8x96xf32>
    %40 = arith.addf %39, %38 : vector<8x96xf32>
    %41 = arith.divf %39, %40 : vector<8x96xf32>
    %42 = vector.extract_strided_slice %41 {offsets = [0, 0], sizes = [8, 32], strides = [1, 1]} : vector<8x96xf32> to vector<8x32xf32>
    %43 = vector.extract_strided_slice %41 {offsets = [0, 32], sizes = [8, 32], strides = [1, 1]} : vector<8x96xf32> to vector<8x32xf32>
    %44 = vector.extract_strided_slice %41 {offsets = [0, 64], sizes = [8, 32], strides = [1, 1]} : vector<8x96xf32> to vector<8x32xf32>
    %45 = vector.extract_strided_slice %33 {offsets = [0, 96], sizes = [8, 32], strides = [1, 1]} : vector<8x128xf32> to vector<8x32xf32>
    %46 = math.tanh %45 : vector<8x32xf32>
    %47 = arith.mulf %43, %30 : vector<8x32xf32>
    %48 = arith.mulf %42, %46 : vector<8x32xf32>
    %49 = arith.addf %47, %48 : vector<8x32xf32>
    %50 = math.tanh %49 : vector<8x32xf32>
    %51 = arith.mulf %44, %50 : vector<8x32xf32>
    %52 = vector.broadcast %34 : vector<8x1xf32> to vector<8x32xf32>
    %53 = arith.mulf %52, %51 : vector<8x32xf32>
    %54 = vector.broadcast %35 : vector<8x1xf32> to vector<8x32xf32>
    %55 = arith.mulf %54, %29 : vector<8x32xf32>
    %56 = arith.addf %53, %55 : vector<8x32xf32>
    %57 = vector.broadcast %34 : vector<8x1xf32> to vector<8x32xf32>
    %58 = arith.mulf %57, %49 : vector<8x32xf32>
    %59 = vector.broadcast %35 : vector<8x1xf32> to vector<8x32xf32>
    %60 = arith.mulf %59, %30 : vector<8x32xf32>
    %61 = arith.addf %58, %60 : vector<8x32xf32>
    %62 = vector.extract_strided_slice %25 {offsets = [8, 0], sizes = [8, 128], strides = [1, 1]} : vector<48x128xf32> to vector<8x128xf32>
    %cst_38 = arith.constant dense<0.000000e+00> : vector<8x128xf32>
    %63 = tpu.matmul %56, %10, %cst_38 {dimension_numbers = #tpu.dot_dimension_numbers<[1], [0], [0], [1], [0, 0, 1, 1], [], []>} : vector<8x32xf32>, vector<32x128xf32>, vector<8x128xf32> -> vector<8x128xf32>
    %64 = arith.addf %62, %63 : vector<8x128xf32>
    %65 = vector.extract_strided_slice %7 {offsets = [8, 0], sizes = [8, 1], strides = [1, 1]} : vector<48x1xf32> to vector<8x1xf32>
    %66 = vector.extract_strided_slice %28 {offsets = [8, 0], sizes = [8, 1], strides = [1, 1]} : vector<48x1xf32> to vector<8x1xf32>
    %67 = vector.extract_strided_slice %64 {offsets = [0, 0], sizes = [8, 96], strides = [1, 1]} : vector<8x128xf32> to vector<8x96xf32>
    %68 = arith.negf %67 : vector<8x96xf32>
    %69 = math.exp %68 : vector<8x96xf32>
    %cst_39 = arith.constant 1.000000e+00 : f32
    %70 = vector.broadcast %cst_39 : f32 to vector<8x96xf32>
    %71 = arith.addf %70, %69 : vector<8x96xf32>
    %72 = arith.divf %70, %71 : vector<8x96xf32>
    %73 = vector.extract_strided_slice %72 {offsets = [0, 0], sizes = [8, 32], strides = [1, 1]} : vector<8x96xf32> to vector<8x32xf32>
    %74 = vector.extract_strided_slice %72 {offsets = [0, 32], sizes = [8, 32], strides = [1, 1]} : vector<8x96xf32> to vector<8x32xf32>
    %75 = vector.extract_strided_slice %72 {offsets = [0, 64], sizes = [8, 32], strides = [1, 1]} : vector<8x96xf32> to vector<8x32xf32>
    %76 = vector.extract_strided_slice %64 {offsets = [0, 96], sizes = [8, 32], strides = [1, 1]} : vector<8x128xf32> to vector<8x32xf32>
    %77 = math.tanh %76 : vector<8x32xf32>
    %78 = arith.mulf %74, %61 : vector<8x32xf32>
    %79 = arith.mulf %73, %77 : vector<8x32xf32>
    %80 = arith.addf %78, %79 : vector<8x32xf32>
    %81 = math.tanh %80 : vector<8x32xf32>
    %82 = arith.mulf %75, %81 : vector<8x32xf32>
    %83 = vector.broadcast %65 : vector<8x1xf32> to vector<8x32xf32>
    %84 = arith.mulf %83, %82 : vector<8x32xf32>
    %85 = vector.broadcast %66 : vector<8x1xf32> to vector<8x32xf32>
    %86 = arith.mulf %85, %56 : vector<8x32xf32>
    %87 = arith.addf %84, %86 : vector<8x32xf32>
    %88 = vector.broadcast %65 : vector<8x1xf32> to vector<8x32xf32>
    %89 = arith.mulf %88, %80 : vector<8x32xf32>
    %90 = vector.broadcast %66 : vector<8x1xf32> to vector<8x32xf32>
    %91 = arith.mulf %90, %61 : vector<8x32xf32>
    %92 = arith.addf %89, %91 : vector<8x32xf32>
    %93 = vector.extract_strided_slice %25 {offsets = [16, 0], sizes = [8, 128], strides = [1, 1]} : vector<48x128xf32> to vector<8x128xf32>
    %cst_40 = arith.constant dense<0.000000e+00> : vector<8x128xf32>
    %94 = tpu.matmul %87, %10, %cst_40 {dimension_numbers = #tpu.dot_dimension_numbers<[1], [0], [0], [1], [0, 0, 1, 1], [], []>} : vector<8x32xf32>, vector<32x128xf32>, vector<8x128xf32> -> vector<8x128xf32>
    %95 = arith.addf %93, %94 : vector<8x128xf32>
    %96 = vector.extract_strided_slice %7 {offsets = [16, 0], sizes = [8, 1], strides = [1, 1]} : vector<48x1xf32> to vector<8x1xf32>
    %97 = vector.extract_strided_slice %28 {offsets = [16, 0], sizes = [8, 1], strides = [1, 1]} : vector<48x1xf32> to vector<8x1xf32>
    %98 = vector.extract_strided_slice %95 {offsets = [0, 0], sizes = [8, 96], strides = [1, 1]} : vector<8x128xf32> to vector<8x96xf32>
    %99 = arith.negf %98 : vector<8x96xf32>
    %100 = math.exp %99 : vector<8x96xf32>
    %cst_41 = arith.constant 1.000000e+00 : f32
    %101 = vector.broadcast %cst_41 : f32 to vector<8x96xf32>
    %102 = arith.addf %101, %100 : vector<8x96xf32>
    %103 = arith.divf %101, %102 : vector<8x96xf32>
    %104 = vector.extract_strided_slice %103 {offsets = [0, 0], sizes = [8, 32], strides = [1, 1]} : vector<8x96xf32> to vector<8x32xf32>
    %105 = vector.extract_strided_slice %103 {offsets = [0, 32], sizes = [8, 32], strides = [1, 1]} : vector<8x96xf32> to vector<8x32xf32>
    %106 = vector.extract_strided_slice %103 {offsets = [0, 64], sizes = [8, 32], strides = [1, 1]} : vector<8x96xf32> to vector<8x32xf32>
    %107 = vector.extract_strided_slice %95 {offsets = [0, 96], sizes = [8, 32], strides = [1, 1]} : vector<8x128xf32> to vector<8x32xf32>
    %108 = math.tanh %107 : vector<8x32xf32>
    %109 = arith.mulf %105, %92 : vector<8x32xf32>
    %110 = arith.mulf %104, %108 : vector<8x32xf32>
    %111 = arith.addf %109, %110 : vector<8x32xf32>
    %112 = math.tanh %111 : vector<8x32xf32>
    %113 = arith.mulf %106, %112 : vector<8x32xf32>
    %114 = vector.broadcast %96 : vector<8x1xf32> to vector<8x32xf32>
    %115 = arith.mulf %114, %113 : vector<8x32xf32>
    %116 = vector.broadcast %97 : vector<8x1xf32> to vector<8x32xf32>
    %117 = arith.mulf %116, %87 : vector<8x32xf32>
    %118 = arith.addf %115, %117 : vector<8x32xf32>
    %119 = vector.broadcast %96 : vector<8x1xf32> to vector<8x32xf32>
    %120 = arith.mulf %119, %111 : vector<8x32xf32>
    %121 = vector.broadcast %97 : vector<8x1xf32> to vector<8x32xf32>
    %122 = arith.mulf %121, %92 : vector<8x32xf32>
    %123 = arith.addf %120, %122 : vector<8x32xf32>
    %124 = vector.extract_strided_slice %25 {offsets = [24, 0], sizes = [8, 128], strides = [1, 1]} : vector<48x128xf32> to vector<8x128xf32>
    %cst_42 = arith.constant dense<0.000000e+00> : vector<8x128xf32>
    %125 = tpu.matmul %118, %10, %cst_42 {dimension_numbers = #tpu.dot_dimension_numbers<[1], [0], [0], [1], [0, 0, 1, 1], [], []>} : vector<8x32xf32>, vector<32x128xf32>, vector<8x128xf32> -> vector<8x128xf32>
    %126 = arith.addf %124, %125 : vector<8x128xf32>
    %127 = vector.extract_strided_slice %7 {offsets = [24, 0], sizes = [8, 1], strides = [1, 1]} : vector<48x1xf32> to vector<8x1xf32>
    %128 = vector.extract_strided_slice %28 {offsets = [24, 0], sizes = [8, 1], strides = [1, 1]} : vector<48x1xf32> to vector<8x1xf32>
    %129 = vector.extract_strided_slice %126 {offsets = [0, 0], sizes = [8, 96], strides = [1, 1]} : vector<8x128xf32> to vector<8x96xf32>
    %130 = arith.negf %129 : vector<8x96xf32>
    %131 = math.exp %130 : vector<8x96xf32>
    %cst_43 = arith.constant 1.000000e+00 : f32
    %132 = vector.broadcast %cst_43 : f32 to vector<8x96xf32>
    %133 = arith.addf %132, %131 : vector<8x96xf32>
    %134 = arith.divf %132, %133 : vector<8x96xf32>
    %135 = vector.extract_strided_slice %134 {offsets = [0, 0], sizes = [8, 32], strides = [1, 1]} : vector<8x96xf32> to vector<8x32xf32>
    %136 = vector.extract_strided_slice %134 {offsets = [0, 32], sizes = [8, 32], strides = [1, 1]} : vector<8x96xf32> to vector<8x32xf32>
    %137 = vector.extract_strided_slice %134 {offsets = [0, 64], sizes = [8, 32], strides = [1, 1]} : vector<8x96xf32> to vector<8x32xf32>
    %138 = vector.extract_strided_slice %126 {offsets = [0, 96], sizes = [8, 32], strides = [1, 1]} : vector<8x128xf32> to vector<8x32xf32>
    %139 = math.tanh %138 : vector<8x32xf32>
    %140 = arith.mulf %136, %123 : vector<8x32xf32>
    %141 = arith.mulf %135, %139 : vector<8x32xf32>
    %142 = arith.addf %140, %141 : vector<8x32xf32>
    %143 = math.tanh %142 : vector<8x32xf32>
    %144 = arith.mulf %137, %143 : vector<8x32xf32>
    %145 = vector.broadcast %127 : vector<8x1xf32> to vector<8x32xf32>
    %146 = arith.mulf %145, %144 : vector<8x32xf32>
    %147 = vector.broadcast %128 : vector<8x1xf32> to vector<8x32xf32>
    %148 = arith.mulf %147, %118 : vector<8x32xf32>
    %149 = arith.addf %146, %148 : vector<8x32xf32>
    %150 = vector.broadcast %127 : vector<8x1xf32> to vector<8x32xf32>
    %151 = arith.mulf %150, %142 : vector<8x32xf32>
    %152 = vector.broadcast %128 : vector<8x1xf32> to vector<8x32xf32>
    %153 = arith.mulf %152, %123 : vector<8x32xf32>
    %154 = arith.addf %151, %153 : vector<8x32xf32>
    %155 = vector.extract_strided_slice %25 {offsets = [32, 0], sizes = [8, 128], strides = [1, 1]} : vector<48x128xf32> to vector<8x128xf32>
    %cst_44 = arith.constant dense<0.000000e+00> : vector<8x128xf32>
    %156 = tpu.matmul %149, %10, %cst_44 {dimension_numbers = #tpu.dot_dimension_numbers<[1], [0], [0], [1], [0, 0, 1, 1], [], []>} : vector<8x32xf32>, vector<32x128xf32>, vector<8x128xf32> -> vector<8x128xf32>
    %157 = arith.addf %155, %156 : vector<8x128xf32>
    %158 = vector.extract_strided_slice %7 {offsets = [32, 0], sizes = [8, 1], strides = [1, 1]} : vector<48x1xf32> to vector<8x1xf32>
    %159 = vector.extract_strided_slice %28 {offsets = [32, 0], sizes = [8, 1], strides = [1, 1]} : vector<48x1xf32> to vector<8x1xf32>
    %160 = vector.extract_strided_slice %157 {offsets = [0, 0], sizes = [8, 96], strides = [1, 1]} : vector<8x128xf32> to vector<8x96xf32>
    %161 = arith.negf %160 : vector<8x96xf32>
    %162 = math.exp %161 : vector<8x96xf32>
    %cst_45 = arith.constant 1.000000e+00 : f32
    %163 = vector.broadcast %cst_45 : f32 to vector<8x96xf32>
    %164 = arith.addf %163, %162 : vector<8x96xf32>
    %165 = arith.divf %163, %164 : vector<8x96xf32>
    %166 = vector.extract_strided_slice %165 {offsets = [0, 0], sizes = [8, 32], strides = [1, 1]} : vector<8x96xf32> to vector<8x32xf32>
    %167 = vector.extract_strided_slice %165 {offsets = [0, 32], sizes = [8, 32], strides = [1, 1]} : vector<8x96xf32> to vector<8x32xf32>
    %168 = vector.extract_strided_slice %165 {offsets = [0, 64], sizes = [8, 32], strides = [1, 1]} : vector<8x96xf32> to vector<8x32xf32>
    %169 = vector.extract_strided_slice %157 {offsets = [0, 96], sizes = [8, 32], strides = [1, 1]} : vector<8x128xf32> to vector<8x32xf32>
    %170 = math.tanh %169 : vector<8x32xf32>
    %171 = arith.mulf %167, %154 : vector<8x32xf32>
    %172 = arith.mulf %166, %170 : vector<8x32xf32>
    %173 = arith.addf %171, %172 : vector<8x32xf32>
    %174 = math.tanh %173 : vector<8x32xf32>
    %175 = arith.mulf %168, %174 : vector<8x32xf32>
    %176 = vector.broadcast %158 : vector<8x1xf32> to vector<8x32xf32>
    %177 = arith.mulf %176, %175 : vector<8x32xf32>
    %178 = vector.broadcast %159 : vector<8x1xf32> to vector<8x32xf32>
    %179 = arith.mulf %178, %149 : vector<8x32xf32>
    %180 = arith.addf %177, %179 : vector<8x32xf32>
    %181 = vector.broadcast %158 : vector<8x1xf32> to vector<8x32xf32>
    %182 = arith.mulf %181, %173 : vector<8x32xf32>
    %183 = vector.broadcast %159 : vector<8x1xf32> to vector<8x32xf32>
    %184 = arith.mulf %183, %154 : vector<8x32xf32>
    %185 = arith.addf %182, %184 : vector<8x32xf32>
    %186 = vector.extract_strided_slice %25 {offsets = [40, 0], sizes = [8, 128], strides = [1, 1]} : vector<48x128xf32> to vector<8x128xf32>
    %cst_46 = arith.constant dense<0.000000e+00> : vector<8x128xf32>
    %187 = tpu.matmul %180, %10, %cst_46 {dimension_numbers = #tpu.dot_dimension_numbers<[1], [0], [0], [1], [0, 0, 1, 1], [], []>} : vector<8x32xf32>, vector<32x128xf32>, vector<8x128xf32> -> vector<8x128xf32>
    %188 = arith.addf %186, %187 : vector<8x128xf32>
    %189 = vector.extract_strided_slice %7 {offsets = [40, 0], sizes = [8, 1], strides = [1, 1]} : vector<48x1xf32> to vector<8x1xf32>
    %190 = vector.extract_strided_slice %28 {offsets = [40, 0], sizes = [8, 1], strides = [1, 1]} : vector<48x1xf32> to vector<8x1xf32>
    %191 = vector.extract_strided_slice %188 {offsets = [0, 0], sizes = [8, 96], strides = [1, 1]} : vector<8x128xf32> to vector<8x96xf32>
    %192 = arith.negf %191 : vector<8x96xf32>
    %193 = math.exp %192 : vector<8x96xf32>
    %cst_47 = arith.constant 1.000000e+00 : f32
    %194 = vector.broadcast %cst_47 : f32 to vector<8x96xf32>
    %195 = arith.addf %194, %193 : vector<8x96xf32>
    %196 = arith.divf %194, %195 : vector<8x96xf32>
    %197 = vector.extract_strided_slice %196 {offsets = [0, 0], sizes = [8, 32], strides = [1, 1]} : vector<8x96xf32> to vector<8x32xf32>
    %198 = vector.extract_strided_slice %196 {offsets = [0, 32], sizes = [8, 32], strides = [1, 1]} : vector<8x96xf32> to vector<8x32xf32>
    %199 = vector.extract_strided_slice %196 {offsets = [0, 64], sizes = [8, 32], strides = [1, 1]} : vector<8x96xf32> to vector<8x32xf32>
    %200 = vector.extract_strided_slice %188 {offsets = [0, 96], sizes = [8, 32], strides = [1, 1]} : vector<8x128xf32> to vector<8x32xf32>
    %201 = math.tanh %200 : vector<8x32xf32>
    %202 = arith.mulf %198, %185 : vector<8x32xf32>
    %203 = arith.mulf %197, %201 : vector<8x32xf32>
    %204 = arith.addf %202, %203 : vector<8x32xf32>
    %205 = math.tanh %204 : vector<8x32xf32>
    %206 = arith.mulf %199, %205 : vector<8x32xf32>
    %207 = vector.broadcast %189 : vector<8x1xf32> to vector<8x32xf32>
    %208 = arith.mulf %207, %206 : vector<8x32xf32>
    %209 = vector.broadcast %190 : vector<8x1xf32> to vector<8x32xf32>
    %210 = arith.mulf %209, %180 : vector<8x32xf32>
    %211 = arith.addf %208, %210 : vector<8x32xf32>
    %cst_48 = arith.constant 0.000000e+00 : f32
    %212 = vector.broadcast %cst_48 : f32 to vector<8x32xf32>
    %cst_49 = arith.constant 0.000000e+00 : f32
    %213 = vector.broadcast %cst_49 : f32 to vector<8x32xf32>
    %214 = vector.extract_strided_slice %26 {offsets = [40, 0], sizes = [8, 128], strides = [1, 1]} : vector<48x128xf32> to vector<8x128xf32>
    %cst_50 = arith.constant dense<0.000000e+00> : vector<8x128xf32>
    %215 = tpu.matmul %212, %11, %cst_50 {dimension_numbers = #tpu.dot_dimension_numbers<[1], [0], [0], [1], [0, 0, 1, 1], [], []>} : vector<8x32xf32>, vector<32x128xf32>, vector<8x128xf32> -> vector<8x128xf32>
    %216 = arith.addf %214, %215 : vector<8x128xf32>
    %217 = vector.extract_strided_slice %7 {offsets = [40, 0], sizes = [8, 1], strides = [1, 1]} : vector<48x1xf32> to vector<8x1xf32>
    %218 = vector.extract_strided_slice %28 {offsets = [40, 0], sizes = [8, 1], strides = [1, 1]} : vector<48x1xf32> to vector<8x1xf32>
    %219 = vector.extract_strided_slice %216 {offsets = [0, 0], sizes = [8, 96], strides = [1, 1]} : vector<8x128xf32> to vector<8x96xf32>
    %220 = arith.negf %219 : vector<8x96xf32>
    %221 = math.exp %220 : vector<8x96xf32>
    %cst_51 = arith.constant 1.000000e+00 : f32
    %222 = vector.broadcast %cst_51 : f32 to vector<8x96xf32>
    %223 = arith.addf %222, %221 : vector<8x96xf32>
    %224 = arith.divf %222, %223 : vector<8x96xf32>
    %225 = vector.extract_strided_slice %224 {offsets = [0, 0], sizes = [8, 32], strides = [1, 1]} : vector<8x96xf32> to vector<8x32xf32>
    %226 = vector.extract_strided_slice %224 {offsets = [0, 32], sizes = [8, 32], strides = [1, 1]} : vector<8x96xf32> to vector<8x32xf32>
    %227 = vector.extract_strided_slice %224 {offsets = [0, 64], sizes = [8, 32], strides = [1, 1]} : vector<8x96xf32> to vector<8x32xf32>
    %228 = vector.extract_strided_slice %216 {offsets = [0, 96], sizes = [8, 32], strides = [1, 1]} : vector<8x128xf32> to vector<8x32xf32>
    %229 = math.tanh %228 : vector<8x32xf32>
    %230 = arith.mulf %226, %213 : vector<8x32xf32>
    %231 = arith.mulf %225, %229 : vector<8x32xf32>
    %232 = arith.addf %230, %231 : vector<8x32xf32>
    %233 = math.tanh %232 : vector<8x32xf32>
    %234 = arith.mulf %227, %233 : vector<8x32xf32>
    %235 = vector.broadcast %217 : vector<8x1xf32> to vector<8x32xf32>
    %236 = arith.mulf %235, %234 : vector<8x32xf32>
    %237 = vector.broadcast %218 : vector<8x1xf32> to vector<8x32xf32>
    %238 = arith.mulf %237, %212 : vector<8x32xf32>
    %239 = arith.addf %236, %238 : vector<8x32xf32>
    %240 = vector.broadcast %217 : vector<8x1xf32> to vector<8x32xf32>
    %241 = arith.mulf %240, %232 : vector<8x32xf32>
    %242 = vector.broadcast %218 : vector<8x1xf32> to vector<8x32xf32>
    %243 = arith.mulf %242, %213 : vector<8x32xf32>
    %244 = arith.addf %241, %243 : vector<8x32xf32>
    %245 = vector.extract_strided_slice %26 {offsets = [32, 0], sizes = [8, 128], strides = [1, 1]} : vector<48x128xf32> to vector<8x128xf32>
    %cst_52 = arith.constant dense<0.000000e+00> : vector<8x128xf32>
    %246 = tpu.matmul %239, %11, %cst_52 {dimension_numbers = #tpu.dot_dimension_numbers<[1], [0], [0], [1], [0, 0, 1, 1], [], []>} : vector<8x32xf32>, vector<32x128xf32>, vector<8x128xf32> -> vector<8x128xf32>
    %247 = arith.addf %245, %246 : vector<8x128xf32>
    %248 = vector.extract_strided_slice %7 {offsets = [32, 0], sizes = [8, 1], strides = [1, 1]} : vector<48x1xf32> to vector<8x1xf32>
    %249 = vector.extract_strided_slice %28 {offsets = [32, 0], sizes = [8, 1], strides = [1, 1]} : vector<48x1xf32> to vector<8x1xf32>
    %250 = vector.extract_strided_slice %247 {offsets = [0, 0], sizes = [8, 96], strides = [1, 1]} : vector<8x128xf32> to vector<8x96xf32>
    %251 = arith.negf %250 : vector<8x96xf32>
    %252 = math.exp %251 : vector<8x96xf32>
    %cst_53 = arith.constant 1.000000e+00 : f32
    %253 = vector.broadcast %cst_53 : f32 to vector<8x96xf32>
    %254 = arith.addf %253, %252 : vector<8x96xf32>
    %255 = arith.divf %253, %254 : vector<8x96xf32>
    %256 = vector.extract_strided_slice %255 {offsets = [0, 0], sizes = [8, 32], strides = [1, 1]} : vector<8x96xf32> to vector<8x32xf32>
    %257 = vector.extract_strided_slice %255 {offsets = [0, 32], sizes = [8, 32], strides = [1, 1]} : vector<8x96xf32> to vector<8x32xf32>
    %258 = vector.extract_strided_slice %255 {offsets = [0, 64], sizes = [8, 32], strides = [1, 1]} : vector<8x96xf32> to vector<8x32xf32>
    %259 = vector.extract_strided_slice %247 {offsets = [0, 96], sizes = [8, 32], strides = [1, 1]} : vector<8x128xf32> to vector<8x32xf32>
    %260 = math.tanh %259 : vector<8x32xf32>
    %261 = arith.mulf %257, %244 : vector<8x32xf32>
    %262 = arith.mulf %256, %260 : vector<8x32xf32>
    %263 = arith.addf %261, %262 : vector<8x32xf32>
    %264 = math.tanh %263 : vector<8x32xf32>
    %265 = arith.mulf %258, %264 : vector<8x32xf32>
    %266 = vector.broadcast %248 : vector<8x1xf32> to vector<8x32xf32>
    %267 = arith.mulf %266, %265 : vector<8x32xf32>
    %268 = vector.broadcast %249 : vector<8x1xf32> to vector<8x32xf32>
    %269 = arith.mulf %268, %239 : vector<8x32xf32>
    %270 = arith.addf %267, %269 : vector<8x32xf32>
    %271 = vector.broadcast %248 : vector<8x1xf32> to vector<8x32xf32>
    %272 = arith.mulf %271, %263 : vector<8x32xf32>
    %273 = vector.broadcast %249 : vector<8x1xf32> to vector<8x32xf32>
    %274 = arith.mulf %273, %244 : vector<8x32xf32>
    %275 = arith.addf %272, %274 : vector<8x32xf32>
    %276 = vector.extract_strided_slice %26 {offsets = [24, 0], sizes = [8, 128], strides = [1, 1]} : vector<48x128xf32> to vector<8x128xf32>
    %cst_54 = arith.constant dense<0.000000e+00> : vector<8x128xf32>
    %277 = tpu.matmul %270, %11, %cst_54 {dimension_numbers = #tpu.dot_dimension_numbers<[1], [0], [0], [1], [0, 0, 1, 1], [], []>} : vector<8x32xf32>, vector<32x128xf32>, vector<8x128xf32> -> vector<8x128xf32>
    %278 = arith.addf %276, %277 : vector<8x128xf32>
    %279 = vector.extract_strided_slice %7 {offsets = [24, 0], sizes = [8, 1], strides = [1, 1]} : vector<48x1xf32> to vector<8x1xf32>
    %280 = vector.extract_strided_slice %28 {offsets = [24, 0], sizes = [8, 1], strides = [1, 1]} : vector<48x1xf32> to vector<8x1xf32>
    %281 = vector.extract_strided_slice %278 {offsets = [0, 0], sizes = [8, 96], strides = [1, 1]} : vector<8x128xf32> to vector<8x96xf32>
    %282 = arith.negf %281 : vector<8x96xf32>
    %283 = math.exp %282 : vector<8x96xf32>
    %cst_55 = arith.constant 1.000000e+00 : f32
    %284 = vector.broadcast %cst_55 : f32 to vector<8x96xf32>
    %285 = arith.addf %284, %283 : vector<8x96xf32>
    %286 = arith.divf %284, %285 : vector<8x96xf32>
    %287 = vector.extract_strided_slice %286 {offsets = [0, 0], sizes = [8, 32], strides = [1, 1]} : vector<8x96xf32> to vector<8x32xf32>
    %288 = vector.extract_strided_slice %286 {offsets = [0, 32], sizes = [8, 32], strides = [1, 1]} : vector<8x96xf32> to vector<8x32xf32>
    %289 = vector.extract_strided_slice %286 {offsets = [0, 64], sizes = [8, 32], strides = [1, 1]} : vector<8x96xf32> to vector<8x32xf32>
    %290 = vector.extract_strided_slice %278 {offsets = [0, 96], sizes = [8, 32], strides = [1, 1]} : vector<8x128xf32> to vector<8x32xf32>
    %291 = math.tanh %290 : vector<8x32xf32>
    %292 = arith.mulf %288, %275 : vector<8x32xf32>
    %293 = arith.mulf %287, %291 : vector<8x32xf32>
    %294 = arith.addf %292, %293 : vector<8x32xf32>
    %295 = math.tanh %294 : vector<8x32xf32>
    %296 = arith.mulf %289, %295 : vector<8x32xf32>
    %297 = vector.broadcast %279 : vector<8x1xf32> to vector<8x32xf32>
    %298 = arith.mulf %297, %296 : vector<8x32xf32>
    %299 = vector.broadcast %280 : vector<8x1xf32> to vector<8x32xf32>
    %300 = arith.mulf %299, %270 : vector<8x32xf32>
    %301 = arith.addf %298, %300 : vector<8x32xf32>
    %302 = vector.broadcast %279 : vector<8x1xf32> to vector<8x32xf32>
    %303 = arith.mulf %302, %294 : vector<8x32xf32>
    %304 = vector.broadcast %280 : vector<8x1xf32> to vector<8x32xf32>
    %305 = arith.mulf %304, %275 : vector<8x32xf32>
    %306 = arith.addf %303, %305 : vector<8x32xf32>
    %307 = vector.extract_strided_slice %26 {offsets = [16, 0], sizes = [8, 128], strides = [1, 1]} : vector<48x128xf32> to vector<8x128xf32>
    %cst_56 = arith.constant dense<0.000000e+00> : vector<8x128xf32>
    %308 = tpu.matmul %301, %11, %cst_56 {dimension_numbers = #tpu.dot_dimension_numbers<[1], [0], [0], [1], [0, 0, 1, 1], [], []>} : vector<8x32xf32>, vector<32x128xf32>, vector<8x128xf32> -> vector<8x128xf32>
    %309 = arith.addf %307, %308 : vector<8x128xf32>
    %310 = vector.extract_strided_slice %7 {offsets = [16, 0], sizes = [8, 1], strides = [1, 1]} : vector<48x1xf32> to vector<8x1xf32>
    %311 = vector.extract_strided_slice %28 {offsets = [16, 0], sizes = [8, 1], strides = [1, 1]} : vector<48x1xf32> to vector<8x1xf32>
    %312 = vector.extract_strided_slice %309 {offsets = [0, 0], sizes = [8, 96], strides = [1, 1]} : vector<8x128xf32> to vector<8x96xf32>
    %313 = arith.negf %312 : vector<8x96xf32>
    %314 = math.exp %313 : vector<8x96xf32>
    %cst_57 = arith.constant 1.000000e+00 : f32
    %315 = vector.broadcast %cst_57 : f32 to vector<8x96xf32>
    %316 = arith.addf %315, %314 : vector<8x96xf32>
    %317 = arith.divf %315, %316 : vector<8x96xf32>
    %318 = vector.extract_strided_slice %317 {offsets = [0, 0], sizes = [8, 32], strides = [1, 1]} : vector<8x96xf32> to vector<8x32xf32>
    %319 = vector.extract_strided_slice %317 {offsets = [0, 32], sizes = [8, 32], strides = [1, 1]} : vector<8x96xf32> to vector<8x32xf32>
    %320 = vector.extract_strided_slice %317 {offsets = [0, 64], sizes = [8, 32], strides = [1, 1]} : vector<8x96xf32> to vector<8x32xf32>
    %321 = vector.extract_strided_slice %309 {offsets = [0, 96], sizes = [8, 32], strides = [1, 1]} : vector<8x128xf32> to vector<8x32xf32>
    %322 = math.tanh %321 : vector<8x32xf32>
    %323 = arith.mulf %319, %306 : vector<8x32xf32>
    %324 = arith.mulf %318, %322 : vector<8x32xf32>
    %325 = arith.addf %323, %324 : vector<8x32xf32>
    %326 = math.tanh %325 : vector<8x32xf32>
    %327 = arith.mulf %320, %326 : vector<8x32xf32>
    %328 = vector.broadcast %310 : vector<8x1xf32> to vector<8x32xf32>
    %329 = arith.mulf %328, %327 : vector<8x32xf32>
    %330 = vector.broadcast %311 : vector<8x1xf32> to vector<8x32xf32>
    %331 = arith.mulf %330, %301 : vector<8x32xf32>
    %332 = arith.addf %329, %331 : vector<8x32xf32>
    %333 = vector.broadcast %310 : vector<8x1xf32> to vector<8x32xf32>
    %334 = arith.mulf %333, %325 : vector<8x32xf32>
    %335 = vector.broadcast %311 : vector<8x1xf32> to vector<8x32xf32>
    %336 = arith.mulf %335, %306 : vector<8x32xf32>
    %337 = arith.addf %334, %336 : vector<8x32xf32>
    %338 = vector.extract_strided_slice %26 {offsets = [8, 0], sizes = [8, 128], strides = [1, 1]} : vector<48x128xf32> to vector<8x128xf32>
    %cst_58 = arith.constant dense<0.000000e+00> : vector<8x128xf32>
    %339 = tpu.matmul %332, %11, %cst_58 {dimension_numbers = #tpu.dot_dimension_numbers<[1], [0], [0], [1], [0, 0, 1, 1], [], []>} : vector<8x32xf32>, vector<32x128xf32>, vector<8x128xf32> -> vector<8x128xf32>
    %340 = arith.addf %338, %339 : vector<8x128xf32>
    %341 = vector.extract_strided_slice %7 {offsets = [8, 0], sizes = [8, 1], strides = [1, 1]} : vector<48x1xf32> to vector<8x1xf32>
    %342 = vector.extract_strided_slice %28 {offsets = [8, 0], sizes = [8, 1], strides = [1, 1]} : vector<48x1xf32> to vector<8x1xf32>
    %343 = vector.extract_strided_slice %340 {offsets = [0, 0], sizes = [8, 96], strides = [1, 1]} : vector<8x128xf32> to vector<8x96xf32>
    %344 = arith.negf %343 : vector<8x96xf32>
    %345 = math.exp %344 : vector<8x96xf32>
    %cst_59 = arith.constant 1.000000e+00 : f32
    %346 = vector.broadcast %cst_59 : f32 to vector<8x96xf32>
    %347 = arith.addf %346, %345 : vector<8x96xf32>
    %348 = arith.divf %346, %347 : vector<8x96xf32>
    %349 = vector.extract_strided_slice %348 {offsets = [0, 0], sizes = [8, 32], strides = [1, 1]} : vector<8x96xf32> to vector<8x32xf32>
    %350 = vector.extract_strided_slice %348 {offsets = [0, 32], sizes = [8, 32], strides = [1, 1]} : vector<8x96xf32> to vector<8x32xf32>
    %351 = vector.extract_strided_slice %348 {offsets = [0, 64], sizes = [8, 32], strides = [1, 1]} : vector<8x96xf32> to vector<8x32xf32>
    %352 = vector.extract_strided_slice %340 {offsets = [0, 96], sizes = [8, 32], strides = [1, 1]} : vector<8x128xf32> to vector<8x32xf32>
    %353 = math.tanh %352 : vector<8x32xf32>
    %354 = arith.mulf %350, %337 : vector<8x32xf32>
    %355 = arith.mulf %349, %353 : vector<8x32xf32>
    %356 = arith.addf %354, %355 : vector<8x32xf32>
    %357 = math.tanh %356 : vector<8x32xf32>
    %358 = arith.mulf %351, %357 : vector<8x32xf32>
    %359 = vector.broadcast %341 : vector<8x1xf32> to vector<8x32xf32>
    %360 = arith.mulf %359, %358 : vector<8x32xf32>
    %361 = vector.broadcast %342 : vector<8x1xf32> to vector<8x32xf32>
    %362 = arith.mulf %361, %332 : vector<8x32xf32>
    %363 = arith.addf %360, %362 : vector<8x32xf32>
    %364 = vector.broadcast %341 : vector<8x1xf32> to vector<8x32xf32>
    %365 = arith.mulf %364, %356 : vector<8x32xf32>
    %366 = vector.broadcast %342 : vector<8x1xf32> to vector<8x32xf32>
    %367 = arith.mulf %366, %337 : vector<8x32xf32>
    %368 = arith.addf %365, %367 : vector<8x32xf32>
    %369 = vector.extract_strided_slice %26 {offsets = [0, 0], sizes = [8, 128], strides = [1, 1]} : vector<48x128xf32> to vector<8x128xf32>
    %cst_60 = arith.constant dense<0.000000e+00> : vector<8x128xf32>
    %370 = tpu.matmul %363, %11, %cst_60 {dimension_numbers = #tpu.dot_dimension_numbers<[1], [0], [0], [1], [0, 0, 1, 1], [], []>} : vector<8x32xf32>, vector<32x128xf32>, vector<8x128xf32> -> vector<8x128xf32>
    %371 = arith.addf %369, %370 : vector<8x128xf32>
    %372 = vector.extract_strided_slice %7 {offsets = [0, 0], sizes = [8, 1], strides = [1, 1]} : vector<48x1xf32> to vector<8x1xf32>
    %373 = vector.extract_strided_slice %28 {offsets = [0, 0], sizes = [8, 1], strides = [1, 1]} : vector<48x1xf32> to vector<8x1xf32>
    %374 = vector.extract_strided_slice %371 {offsets = [0, 0], sizes = [8, 96], strides = [1, 1]} : vector<8x128xf32> to vector<8x96xf32>
    %375 = arith.negf %374 : vector<8x96xf32>
    %376 = math.exp %375 : vector<8x96xf32>
    %cst_61 = arith.constant 1.000000e+00 : f32
    %377 = vector.broadcast %cst_61 : f32 to vector<8x96xf32>
    %378 = arith.addf %377, %376 : vector<8x96xf32>
    %379 = arith.divf %377, %378 : vector<8x96xf32>
    %380 = vector.extract_strided_slice %379 {offsets = [0, 0], sizes = [8, 32], strides = [1, 1]} : vector<8x96xf32> to vector<8x32xf32>
    %381 = vector.extract_strided_slice %379 {offsets = [0, 32], sizes = [8, 32], strides = [1, 1]} : vector<8x96xf32> to vector<8x32xf32>
    %382 = vector.extract_strided_slice %379 {offsets = [0, 64], sizes = [8, 32], strides = [1, 1]} : vector<8x96xf32> to vector<8x32xf32>
    %383 = vector.extract_strided_slice %371 {offsets = [0, 96], sizes = [8, 32], strides = [1, 1]} : vector<8x128xf32> to vector<8x32xf32>
    %384 = math.tanh %383 : vector<8x32xf32>
    %385 = arith.mulf %381, %368 : vector<8x32xf32>
    %386 = arith.mulf %380, %384 : vector<8x32xf32>
    %387 = arith.addf %385, %386 : vector<8x32xf32>
    %388 = math.tanh %387 : vector<8x32xf32>
    %389 = arith.mulf %382, %388 : vector<8x32xf32>
    %390 = vector.broadcast %372 : vector<8x1xf32> to vector<8x32xf32>
    %391 = arith.mulf %390, %389 : vector<8x32xf32>
    %392 = vector.broadcast %373 : vector<8x1xf32> to vector<8x32xf32>
    %393 = arith.mulf %392, %363 : vector<8x32xf32>
    %394 = arith.addf %391, %393 : vector<8x32xf32>
    %395 = arith.addf %211, %394 : vector<8x32xf32>
    %cst_62 = arith.constant 5.000000e-01 : f32
    %396 = vector.broadcast %cst_62 : f32 to vector<8x32xf32>
    %397 = arith.mulf %395, %396 : vector<8x32xf32>
    %398 = arith.mulf %397, %397 : vector<8x32xf32>
    %cst_63 = arith.constant dense<0.000000e+00> : vector<8xf32>
    %399 = vector.multi_reduction <add>, %398, %cst_63 [1] : vector<8x32xf32> to vector<8xf32>
    %400 = vector.shape_cast %399 : vector<8xf32> to vector<8x1xf32>
    %401 = math.sqrt %400 : vector<8x1xf32>
    %cst_64 = arith.constant 9.99999996E-13 : f32
    %402 = vector.broadcast %cst_64 : f32 to vector<8x1xf32>
    %403 = arith.maximumf %401, %402 : vector<8x1xf32>
    %404 = vector.broadcast %403 : vector<8x1xf32> to vector<8x32xf32>
    %405 = arith.divf %397, %404 : vector<8x32xf32>
    %406 = arith.addf %18, %405 : vector<8x32xf32>
    %407 = tpu.iota {dimensions = array<i32: 1>} : vector<64x8xi32>
    %408 = vector.broadcast %12 : vector<64x1xi32> to vector<64x8xi32>
    %409 = arith.cmpi eq, %408, %407 : vector<64x8xi32>
    %410 = arith.extui %409 : vector<64x8xi1> to vector<64x8xi32>
    %411 = arith.sitofp %410 : vector<64x8xi32> to vector<64x8xf32>
    %412 = vector.broadcast %13 : vector<64x1xi32> to vector<64x8xi32>
    %413 = arith.cmpi eq, %412, %407 : vector<64x8xi32>
    %414 = arith.extui %413 : vector<64x8xi1> to vector<64x8xi32>
    %415 = arith.sitofp %414 : vector<64x8xi32> to vector<64x8xf32>
    %c0_65 = arith.constant 0 : index
    %c0_66 = arith.constant 0 : index
    %416 = vector.load %arg17[%c0_65, %c0_66] : memref<32x128xf32, #tpu.memory_space<vmem>>, vector<32x128xf32>
    %cst_67 = arith.constant dense<0.000000e+00> : vector<8x128xf32>
    %417 = tpu.matmul %406, %416, %cst_67 {dimension_numbers = #tpu.dot_dimension_numbers<[1], [0], [0], [1], [0, 0, 1, 1], [], []>} : vector<8x32xf32>, vector<32x128xf32>, vector<8x128xf32> -> vector<8x128xf32>
    %c0_68 = arith.constant 0 : index
    %c0_69 = arith.constant 0 : index
    %418 = vector.load %arg18[%c0_68, %c0_69] : memref<1x128xf32, #tpu.memory_space<vmem>>, vector<1x128xf32>
    %419 = vector.broadcast %418 : vector<1x128xf32> to vector<8x128xf32>
    %420 = arith.addf %417, %419 : vector<8x128xf32>
    %c0_70 = arith.constant 0 : index
    %c0_71 = arith.constant 0 : index
    %421 = vector.load %arg19[%c0_70, %c0_71] : memref<32x32xf32, #tpu.memory_space<vmem>>, vector<32x32xf32>
    %cst_72 = arith.constant dense<0.000000e+00> : vector<64x32xf32>
    %422 = tpu.matmul %21, %421, %cst_72 {dimension_numbers = #tpu.dot_dimension_numbers<[1], [0], [0], [1], [0, 0, 1, 1], [], []>} : vector<64x32xf32>, vector<32x32xf32>, vector<64x32xf32> -> vector<64x32xf32>
    %c0_73 = arith.constant 0 : index
    %c0_74 = arith.constant 0 : index
    %423 = vector.load %arg20[%c0_73, %c0_74] : memref<1x32xf32, #tpu.memory_space<vmem>>, vector<1x32xf32>
    %424 = vector.broadcast %423 : vector<1x32xf32> to vector<64x32xf32>
    %425 = arith.addf %422, %424 : vector<64x32xf32>
    %426 = vector.extract_strided_slice %420 {offsets = [0, 0], sizes = [8, 64], strides = [1, 1]} : vector<8x128xf32> to vector<8x64xf32>
    %cst_75 = arith.constant dense<0.000000e+00> : vector<64x64xf32>
    %427 = tpu.matmul %411, %426, %cst_75 {dimension_numbers = #tpu.dot_dimension_numbers<[1], [0], [0], [1], [0, 0, 1, 1], [], []>} : vector<64x8xf32>, vector<8x64xf32>, vector<64x64xf32> -> vector<64x64xf32>
    %428 = vector.extract_strided_slice %427 {offsets = [0, 0], sizes = [64, 32], strides = [1, 1]} : vector<64x64xf32> to vector<64x32xf32>
    %429 = vector.extract_strided_slice %427 {offsets = [0, 32], sizes = [64, 32], strides = [1, 1]} : vector<64x64xf32> to vector<64x32xf32>
    %430 = vector.extract_strided_slice %420 {offsets = [0, 64], sizes = [8, 32], strides = [1, 1]} : vector<8x128xf32> to vector<8x32xf32>
    %cst_76 = arith.constant dense<0.000000e+00> : vector<64x32xf32>
    %431 = tpu.matmul %415, %430, %cst_76 {dimension_numbers = #tpu.dot_dimension_numbers<[1], [0], [0], [1], [0, 0, 1, 1], [], []>} : vector<64x8xf32>, vector<8x32xf32>, vector<64x32xf32> -> vector<64x32xf32>
    %432 = vector.extract_strided_slice %420 {offsets = [0, 96], sizes = [8, 32], strides = [1, 1]} : vector<8x128xf32> to vector<8x32xf32>
    %433 = arith.addf %425, %429 : vector<64x32xf32>
    %434 = arith.addf %433, %431 : vector<64x32xf32>
    %435 = arith.negf %434 : vector<64x32xf32>
    %436 = math.exp %435 : vector<64x32xf32>
    %cst_77 = arith.constant 1.000000e+00 : f32
    %437 = vector.broadcast %cst_77 : f32 to vector<64x32xf32>
    %438 = arith.addf %437, %436 : vector<64x32xf32>
    %439 = arith.divf %437, %438 : vector<64x32xf32>
    %440 = arith.mulf %439, %428 : vector<64x32xf32>
    %cst_78 = arith.constant dense<0.000000e+00> : vector<8x32xf32>
    %441 = tpu.matmul %415, %440, %cst_78 {dimension_numbers = #tpu.dot_dimension_numbers<[0], [0], [1], [1], [0, 1, 1, 1], [], []>} : vector<64x8xf32>, vector<64x32xf32>, vector<8x32xf32> -> vector<8x32xf32>
    %cst_79 = arith.constant dense<0.000000e+00> : vector<8x32xf32>
    %442 = tpu.matmul %415, %439, %cst_79 {dimension_numbers = #tpu.dot_dimension_numbers<[0], [0], [1], [1], [0, 1, 1, 1], [], []>} : vector<64x8xf32>, vector<64x32xf32>, vector<8x32xf32> -> vector<8x32xf32>
    %cst_80 = arith.constant 9.99999997E-7 : f32
    %443 = vector.broadcast %cst_80 : f32 to vector<8x32xf32>
    %444 = arith.addf %442, %443 : vector<8x32xf32>
    %445 = arith.divf %441, %444 : vector<8x32xf32>
    %446 = arith.addf %432, %445 : vector<8x32xf32>
    %447 = vector.broadcast %14 : vector<8x1xf32> to vector<8x32xf32>
    %448 = arith.mulf %446, %447 : vector<8x32xf32>
    %cst_81 = arith.constant 0.000000e+00 : f32
    %449 = vector.broadcast %cst_81 : f32 to vector<8x32xf32>
    %450 = arith.maximumf %448, %449 : vector<8x32xf32>
    %451 = arith.addf %406, %450 : vector<8x32xf32>
    %452 = vector.broadcast %15 : vector<64x1xf32> to vector<64x32xf32>
    %453 = arith.mulf %434, %452 : vector<64x32xf32>
    %cst_82 = arith.constant 0.000000e+00 : f32
    %454 = vector.broadcast %cst_82 : f32 to vector<64x32xf32>
    %455 = arith.maximumf %453, %454 : vector<64x32xf32>
    %456 = arith.addf %21, %455 : vector<64x32xf32>
    %cst_83 = arith.constant dense<0.000000e+00> : vector<8xf32>
    %457 = vector.multi_reduction <add>, %406, %cst_83 [1] : vector<8x32xf32> to vector<8xf32>
    %458 = vector.shape_cast %457 : vector<8xf32> to vector<8x1xf32>
    %cst_84 = arith.constant 0.000000e+00 : f32
    %459 = vector.broadcast %cst_84 : f32 to vector<8x1xf32>
    %460 = arith.addf %459, %458 : vector<8x1xf32>
    %cst_85 = arith.constant dense<0.000000e+00> : vector<8xf32>
    %461 = vector.multi_reduction <add>, %451, %cst_85 [1] : vector<8x32xf32> to vector<8xf32>
    %462 = vector.shape_cast %461 : vector<8xf32> to vector<8x1xf32>
    %463 = arith.addf %460, %462 : vector<8x1xf32>
    %cst_86 = arith.constant 6.400000e+01 : f32
    %464 = vector.broadcast %cst_86 : f32 to vector<8x1xf32>
    %465 = arith.divf %463, %464 : vector<8x1xf32>
    %466 = vector.broadcast %465 : vector<8x1xf32> to vector<8x32xf32>
    %467 = arith.subf %406, %466 : vector<8x32xf32>
    %468 = arith.mulf %467, %467 : vector<8x32xf32>
    %cst_87 = arith.constant dense<0.000000e+00> : vector<8xf32>
    %469 = vector.multi_reduction <add>, %468, %cst_87 [1] : vector<8x32xf32> to vector<8xf32>
    %470 = vector.shape_cast %469 : vector<8xf32> to vector<8x1xf32>
    %cst_88 = arith.constant 0.000000e+00 : f32
    %471 = vector.broadcast %cst_88 : f32 to vector<8x1xf32>
    %472 = arith.addf %471, %470 : vector<8x1xf32>
    %473 = vector.broadcast %465 : vector<8x1xf32> to vector<8x32xf32>
    %474 = arith.subf %451, %473 : vector<8x32xf32>
    %475 = arith.mulf %474, %474 : vector<8x32xf32>
    %cst_89 = arith.constant dense<0.000000e+00> : vector<8xf32>
    %476 = vector.multi_reduction <add>, %475, %cst_89 [1] : vector<8x32xf32> to vector<8xf32>
    %477 = vector.shape_cast %476 : vector<8xf32> to vector<8x1xf32>
    %478 = arith.addf %472, %477 : vector<8x1xf32>
    %cst_90 = arith.constant 6.400000e+01 : f32
    %479 = vector.broadcast %cst_90 : f32 to vector<8x1xf32>
    %480 = arith.divf %478, %479 : vector<8x1xf32>
    %cst_91 = arith.constant 9.99999974E-6 : f32
    %481 = vector.broadcast %cst_91 : f32 to vector<8x1xf32>
    %482 = arith.addf %480, %481 : vector<8x1xf32>
    %483 = math.rsqrt %482 : vector<8x1xf32>
    %c0_92 = arith.constant 0 : index
    %c0_93 = arith.constant 0 : index
    %484 = vector.load %arg21[%c0_92, %c0_93] : memref<1x64xf32, #tpu.memory_space<vmem>>, vector<1x64xf32>
    %c0_94 = arith.constant 0 : index
    %c0_95 = arith.constant 0 : index
    %485 = vector.load %arg22[%c0_94, %c0_95] : memref<1x64xf32, #tpu.memory_space<vmem>>, vector<1x64xf32>
    %c0_96 = arith.constant 0 : index
    %c0_97 = arith.constant 0 : index
    %486 = vector.load %arg23[%c0_96, %c0_97] : memref<64x32xf32, #tpu.memory_space<vmem>>, vector<64x32xf32>
    %c0_98 = arith.constant 0 : index
    %c0_99 = arith.constant 0 : index
    %487 = vector.load %arg24[%c0_98, %c0_99] : memref<1x32xf32, #tpu.memory_space<vmem>>, vector<1x32xf32>
    %488 = vector.broadcast %465 : vector<8x1xf32> to vector<8x32xf32>
    %489 = arith.subf %406, %488 : vector<8x32xf32>
    %490 = vector.broadcast %483 : vector<8x1xf32> to vector<8x32xf32>
    %491 = arith.mulf %489, %490 : vector<8x32xf32>
    %492 = vector.extract_strided_slice %484 {offsets = [0, 0], sizes = [1, 32], strides = [1, 1]} : vector<1x64xf32> to vector<1x32xf32>
    %493 = vector.broadcast %492 : vector<1x32xf32> to vector<8x32xf32>
    %494 = arith.mulf %491, %493 : vector<8x32xf32>
    %495 = vector.extract_strided_slice %485 {offsets = [0, 0], sizes = [1, 32], strides = [1, 1]} : vector<1x64xf32> to vector<1x32xf32>
    %496 = vector.broadcast %495 : vector<1x32xf32> to vector<8x32xf32>
    %497 = arith.addf %494, %496 : vector<8x32xf32>
    %cst_100 = arith.constant 0.000000e+00 : f32
    %498 = vector.broadcast %cst_100 : f32 to vector<8x32xf32>
    %499 = arith.maximumf %497, %498 : vector<8x32xf32>
    %500 = vector.extract_strided_slice %486 {offsets = [0, 0], sizes = [32, 32], strides = [1, 1]} : vector<64x32xf32> to vector<32x32xf32>
    %cst_101 = arith.constant dense<0.000000e+00> : vector<8x32xf32>
    %501 = tpu.matmul %499, %500, %cst_101 {dimension_numbers = #tpu.dot_dimension_numbers<[1], [0], [0], [1], [0, 0, 1, 1], [], []>} : vector<8x32xf32>, vector<32x32xf32>, vector<8x32xf32> -> vector<8x32xf32>
    %502 = vector.broadcast %487 : vector<1x32xf32> to vector<8x32xf32>
    %503 = arith.addf %502, %501 : vector<8x32xf32>
    %504 = vector.broadcast %465 : vector<8x1xf32> to vector<8x32xf32>
    %505 = arith.subf %451, %504 : vector<8x32xf32>
    %506 = vector.broadcast %483 : vector<8x1xf32> to vector<8x32xf32>
    %507 = arith.mulf %505, %506 : vector<8x32xf32>
    %508 = vector.extract_strided_slice %484 {offsets = [0, 32], sizes = [1, 32], strides = [1, 1]} : vector<1x64xf32> to vector<1x32xf32>
    %509 = vector.broadcast %508 : vector<1x32xf32> to vector<8x32xf32>
    %510 = arith.mulf %507, %509 : vector<8x32xf32>
    %511 = vector.extract_strided_slice %485 {offsets = [0, 32], sizes = [1, 32], strides = [1, 1]} : vector<1x64xf32> to vector<1x32xf32>
    %512 = vector.broadcast %511 : vector<1x32xf32> to vector<8x32xf32>
    %513 = arith.addf %510, %512 : vector<8x32xf32>
    %cst_102 = arith.constant 0.000000e+00 : f32
    %514 = vector.broadcast %cst_102 : f32 to vector<8x32xf32>
    %515 = arith.maximumf %513, %514 : vector<8x32xf32>
    %516 = vector.extract_strided_slice %486 {offsets = [32, 0], sizes = [32, 32], strides = [1, 1]} : vector<64x32xf32> to vector<32x32xf32>
    %cst_103 = arith.constant dense<0.000000e+00> : vector<8x32xf32>
    %517 = tpu.matmul %515, %516, %cst_103 {dimension_numbers = #tpu.dot_dimension_numbers<[1], [0], [0], [1], [0, 0, 1, 1], [], []>} : vector<8x32xf32>, vector<32x32xf32>, vector<8x32xf32> -> vector<8x32xf32>
    %518 = arith.addf %503, %517 : vector<8x32xf32>
    %c0_104 = arith.constant 0 : index
    %c0_105 = arith.constant 0 : index
    %519 = vector.load %arg25[%c0_104, %c0_105] : memref<32x128xf32, #tpu.memory_space<vmem>>, vector<32x128xf32>
    %cst_106 = arith.constant dense<0.000000e+00> : vector<8x128xf32>
    %520 = tpu.matmul %518, %519, %cst_106 {dimension_numbers = #tpu.dot_dimension_numbers<[1], [0], [0], [1], [0, 0, 1, 1], [], []>} : vector<8x32xf32>, vector<32x128xf32>, vector<8x128xf32> -> vector<8x128xf32>
    %c0_107 = arith.constant 0 : index
    %c0_108 = arith.constant 0 : index
    %521 = vector.load %arg26[%c0_107, %c0_108] : memref<1x128xf32, #tpu.memory_space<vmem>>, vector<1x128xf32>
    %522 = vector.broadcast %521 : vector<1x128xf32> to vector<8x128xf32>
    %523 = arith.addf %520, %522 : vector<8x128xf32>
    %c0_109 = arith.constant 0 : index
    %c0_110 = arith.constant 0 : index
    %524 = vector.load %arg27[%c0_109, %c0_110] : memref<32x32xf32, #tpu.memory_space<vmem>>, vector<32x32xf32>
    %cst_111 = arith.constant dense<0.000000e+00> : vector<64x32xf32>
    %525 = tpu.matmul %456, %524, %cst_111 {dimension_numbers = #tpu.dot_dimension_numbers<[1], [0], [0], [1], [0, 0, 1, 1], [], []>} : vector<64x32xf32>, vector<32x32xf32>, vector<64x32xf32> -> vector<64x32xf32>
    %c0_112 = arith.constant 0 : index
    %c0_113 = arith.constant 0 : index
    %526 = vector.load %arg28[%c0_112, %c0_113] : memref<1x32xf32, #tpu.memory_space<vmem>>, vector<1x32xf32>
    %527 = vector.broadcast %526 : vector<1x32xf32> to vector<64x32xf32>
    %528 = arith.addf %525, %527 : vector<64x32xf32>
    %529 = vector.extract_strided_slice %523 {offsets = [0, 0], sizes = [8, 64], strides = [1, 1]} : vector<8x128xf32> to vector<8x64xf32>
    %cst_114 = arith.constant dense<0.000000e+00> : vector<64x64xf32>
    %530 = tpu.matmul %411, %529, %cst_114 {dimension_numbers = #tpu.dot_dimension_numbers<[1], [0], [0], [1], [0, 0, 1, 1], [], []>} : vector<64x8xf32>, vector<8x64xf32>, vector<64x64xf32> -> vector<64x64xf32>
    %531 = vector.extract_strided_slice %530 {offsets = [0, 0], sizes = [64, 32], strides = [1, 1]} : vector<64x64xf32> to vector<64x32xf32>
    %532 = vector.extract_strided_slice %530 {offsets = [0, 32], sizes = [64, 32], strides = [1, 1]} : vector<64x64xf32> to vector<64x32xf32>
    %533 = vector.extract_strided_slice %523 {offsets = [0, 64], sizes = [8, 32], strides = [1, 1]} : vector<8x128xf32> to vector<8x32xf32>
    %cst_115 = arith.constant dense<0.000000e+00> : vector<64x32xf32>
    %534 = tpu.matmul %415, %533, %cst_115 {dimension_numbers = #tpu.dot_dimension_numbers<[1], [0], [0], [1], [0, 0, 1, 1], [], []>} : vector<64x8xf32>, vector<8x32xf32>, vector<64x32xf32> -> vector<64x32xf32>
    %535 = vector.extract_strided_slice %523 {offsets = [0, 96], sizes = [8, 32], strides = [1, 1]} : vector<8x128xf32> to vector<8x32xf32>
    %536 = arith.addf %528, %532 : vector<64x32xf32>
    %537 = arith.addf %536, %534 : vector<64x32xf32>
    %538 = arith.negf %537 : vector<64x32xf32>
    %539 = math.exp %538 : vector<64x32xf32>
    %cst_116 = arith.constant 1.000000e+00 : f32
    %540 = vector.broadcast %cst_116 : f32 to vector<64x32xf32>
    %541 = arith.addf %540, %539 : vector<64x32xf32>
    %542 = arith.divf %540, %541 : vector<64x32xf32>
    %543 = arith.mulf %542, %531 : vector<64x32xf32>
    %cst_117 = arith.constant dense<0.000000e+00> : vector<8x32xf32>
    %544 = tpu.matmul %415, %543, %cst_117 {dimension_numbers = #tpu.dot_dimension_numbers<[0], [0], [1], [1], [0, 1, 1, 1], [], []>} : vector<64x8xf32>, vector<64x32xf32>, vector<8x32xf32> -> vector<8x32xf32>
    %cst_118 = arith.constant dense<0.000000e+00> : vector<8x32xf32>
    %545 = tpu.matmul %415, %542, %cst_118 {dimension_numbers = #tpu.dot_dimension_numbers<[0], [0], [1], [1], [0, 1, 1, 1], [], []>} : vector<64x8xf32>, vector<64x32xf32>, vector<8x32xf32> -> vector<8x32xf32>
    %cst_119 = arith.constant 9.99999997E-7 : f32
    %546 = vector.broadcast %cst_119 : f32 to vector<8x32xf32>
    %547 = arith.addf %545, %546 : vector<8x32xf32>
    %548 = arith.divf %544, %547 : vector<8x32xf32>
    %549 = arith.addf %535, %548 : vector<8x32xf32>
    %550 = vector.broadcast %14 : vector<8x1xf32> to vector<8x32xf32>
    %551 = arith.mulf %549, %550 : vector<8x32xf32>
    %cst_120 = arith.constant 0.000000e+00 : f32
    %552 = vector.broadcast %cst_120 : f32 to vector<8x32xf32>
    %553 = arith.maximumf %551, %552 : vector<8x32xf32>
    %554 = arith.addf %518, %553 : vector<8x32xf32>
    %cst_121 = arith.constant dense<0.000000e+00> : vector<8xf32>
    %555 = vector.multi_reduction <add>, %406, %cst_121 [1] : vector<8x32xf32> to vector<8xf32>
    %556 = vector.shape_cast %555 : vector<8xf32> to vector<8x1xf32>
    %cst_122 = arith.constant 0.000000e+00 : f32
    %557 = vector.broadcast %cst_122 : f32 to vector<8x1xf32>
    %558 = arith.addf %557, %556 : vector<8x1xf32>
    %cst_123 = arith.constant dense<0.000000e+00> : vector<8xf32>
    %559 = vector.multi_reduction <add>, %451, %cst_123 [1] : vector<8x32xf32> to vector<8xf32>
    %560 = vector.shape_cast %559 : vector<8xf32> to vector<8x1xf32>
    %561 = arith.addf %558, %560 : vector<8x1xf32>
    %cst_124 = arith.constant dense<0.000000e+00> : vector<8xf32>
    %562 = vector.multi_reduction <add>, %554, %cst_124 [1] : vector<8x32xf32> to vector<8xf32>
    %563 = vector.shape_cast %562 : vector<8xf32> to vector<8x1xf32>
    %564 = arith.addf %561, %563 : vector<8x1xf32>
    %cst_125 = arith.constant 9.600000e+01 : f32
    %565 = vector.broadcast %cst_125 : f32 to vector<8x1xf32>
    %566 = arith.divf %564, %565 : vector<8x1xf32>
    %567 = vector.broadcast %566 : vector<8x1xf32> to vector<8x32xf32>
    %568 = arith.subf %406, %567 : vector<8x32xf32>
    %569 = arith.mulf %568, %568 : vector<8x32xf32>
    %cst_126 = arith.constant dense<0.000000e+00> : vector<8xf32>
    %570 = vector.multi_reduction <add>, %569, %cst_126 [1] : vector<8x32xf32> to vector<8xf32>
    %571 = vector.shape_cast %570 : vector<8xf32> to vector<8x1xf32>
    %cst_127 = arith.constant 0.000000e+00 : f32
    %572 = vector.broadcast %cst_127 : f32 to vector<8x1xf32>
    %573 = arith.addf %572, %571 : vector<8x1xf32>
    %574 = vector.broadcast %566 : vector<8x1xf32> to vector<8x32xf32>
    %575 = arith.subf %451, %574 : vector<8x32xf32>
    %576 = arith.mulf %575, %575 : vector<8x32xf32>
    %cst_128 = arith.constant dense<0.000000e+00> : vector<8xf32>
    %577 = vector.multi_reduction <add>, %576, %cst_128 [1] : vector<8x32xf32> to vector<8xf32>
    %578 = vector.shape_cast %577 : vector<8xf32> to vector<8x1xf32>
    %579 = arith.addf %573, %578 : vector<8x1xf32>
    %580 = vector.broadcast %566 : vector<8x1xf32> to vector<8x32xf32>
    %581 = arith.subf %554, %580 : vector<8x32xf32>
    %582 = arith.mulf %581, %581 : vector<8x32xf32>
    %cst_129 = arith.constant dense<0.000000e+00> : vector<8xf32>
    %583 = vector.multi_reduction <add>, %582, %cst_129 [1] : vector<8x32xf32> to vector<8xf32>
    %584 = vector.shape_cast %583 : vector<8xf32> to vector<8x1xf32>
    %585 = arith.addf %579, %584 : vector<8x1xf32>
    %cst_130 = arith.constant 9.600000e+01 : f32
    %586 = vector.broadcast %cst_130 : f32 to vector<8x1xf32>
    %587 = arith.divf %585, %586 : vector<8x1xf32>
    %cst_131 = arith.constant 9.99999974E-6 : f32
    %588 = vector.broadcast %cst_131 : f32 to vector<8x1xf32>
    %589 = arith.addf %587, %588 : vector<8x1xf32>
    %590 = math.rsqrt %589 : vector<8x1xf32>
    %c0_132 = arith.constant 0 : index
    %c0_133 = arith.constant 0 : index
    %591 = vector.load %arg29[%c0_132, %c0_133] : memref<1x96xf32, #tpu.memory_space<vmem>>, vector<1x96xf32>
    %c0_134 = arith.constant 0 : index
    %c0_135 = arith.constant 0 : index
    %592 = vector.load %arg30[%c0_134, %c0_135] : memref<1x96xf32, #tpu.memory_space<vmem>>, vector<1x96xf32>
    %c0_136 = arith.constant 0 : index
    %c0_137 = arith.constant 0 : index
    %593 = vector.load %arg31[%c0_136, %c0_137] : memref<96x32xf32, #tpu.memory_space<vmem>>, vector<96x32xf32>
    %c0_138 = arith.constant 0 : index
    %c0_139 = arith.constant 0 : index
    %594 = vector.load %arg32[%c0_138, %c0_139] : memref<1x32xf32, #tpu.memory_space<vmem>>, vector<1x32xf32>
    %595 = vector.broadcast %566 : vector<8x1xf32> to vector<8x32xf32>
    %596 = arith.subf %406, %595 : vector<8x32xf32>
    %597 = vector.broadcast %590 : vector<8x1xf32> to vector<8x32xf32>
    %598 = arith.mulf %596, %597 : vector<8x32xf32>
    %599 = vector.extract_strided_slice %591 {offsets = [0, 0], sizes = [1, 32], strides = [1, 1]} : vector<1x96xf32> to vector<1x32xf32>
    %600 = vector.broadcast %599 : vector<1x32xf32> to vector<8x32xf32>
    %601 = arith.mulf %598, %600 : vector<8x32xf32>
    %602 = vector.extract_strided_slice %592 {offsets = [0, 0], sizes = [1, 32], strides = [1, 1]} : vector<1x96xf32> to vector<1x32xf32>
    %603 = vector.broadcast %602 : vector<1x32xf32> to vector<8x32xf32>
    %604 = arith.addf %601, %603 : vector<8x32xf32>
    %cst_140 = arith.constant 0.000000e+00 : f32
    %605 = vector.broadcast %cst_140 : f32 to vector<8x32xf32>
    %606 = arith.maximumf %604, %605 : vector<8x32xf32>
    %607 = vector.extract_strided_slice %593 {offsets = [0, 0], sizes = [32, 32], strides = [1, 1]} : vector<96x32xf32> to vector<32x32xf32>
    %cst_141 = arith.constant dense<0.000000e+00> : vector<8x32xf32>
    %608 = tpu.matmul %606, %607, %cst_141 {dimension_numbers = #tpu.dot_dimension_numbers<[1], [0], [0], [1], [0, 0, 1, 1], [], []>} : vector<8x32xf32>, vector<32x32xf32>, vector<8x32xf32> -> vector<8x32xf32>
    %609 = vector.broadcast %594 : vector<1x32xf32> to vector<8x32xf32>
    %610 = arith.addf %609, %608 : vector<8x32xf32>
    %611 = vector.broadcast %566 : vector<8x1xf32> to vector<8x32xf32>
    %612 = arith.subf %451, %611 : vector<8x32xf32>
    %613 = vector.broadcast %590 : vector<8x1xf32> to vector<8x32xf32>
    %614 = arith.mulf %612, %613 : vector<8x32xf32>
    %615 = vector.extract_strided_slice %591 {offsets = [0, 32], sizes = [1, 32], strides = [1, 1]} : vector<1x96xf32> to vector<1x32xf32>
    %616 = vector.broadcast %615 : vector<1x32xf32> to vector<8x32xf32>
    %617 = arith.mulf %614, %616 : vector<8x32xf32>
    %618 = vector.extract_strided_slice %592 {offsets = [0, 32], sizes = [1, 32], strides = [1, 1]} : vector<1x96xf32> to vector<1x32xf32>
    %619 = vector.broadcast %618 : vector<1x32xf32> to vector<8x32xf32>
    %620 = arith.addf %617, %619 : vector<8x32xf32>
    %cst_142 = arith.constant 0.000000e+00 : f32
    %621 = vector.broadcast %cst_142 : f32 to vector<8x32xf32>
    %622 = arith.maximumf %620, %621 : vector<8x32xf32>
    %623 = vector.extract_strided_slice %593 {offsets = [32, 0], sizes = [32, 32], strides = [1, 1]} : vector<96x32xf32> to vector<32x32xf32>
    %cst_143 = arith.constant dense<0.000000e+00> : vector<8x32xf32>
    %624 = tpu.matmul %622, %623, %cst_143 {dimension_numbers = #tpu.dot_dimension_numbers<[1], [0], [0], [1], [0, 0, 1, 1], [], []>} : vector<8x32xf32>, vector<32x32xf32>, vector<8x32xf32> -> vector<8x32xf32>
    %625 = arith.addf %610, %624 : vector<8x32xf32>
    %626 = vector.broadcast %566 : vector<8x1xf32> to vector<8x32xf32>
    %627 = arith.subf %554, %626 : vector<8x32xf32>
    %628 = vector.broadcast %590 : vector<8x1xf32> to vector<8x32xf32>
    %629 = arith.mulf %627, %628 : vector<8x32xf32>
    %630 = vector.extract_strided_slice %591 {offsets = [0, 64], sizes = [1, 32], strides = [1, 1]} : vector<1x96xf32> to vector<1x32xf32>
    %631 = vector.broadcast %630 : vector<1x32xf32> to vector<8x32xf32>
    %632 = arith.mulf %629, %631 : vector<8x32xf32>
    %633 = vector.extract_strided_slice %592 {offsets = [0, 64], sizes = [1, 32], strides = [1, 1]} : vector<1x96xf32> to vector<1x32xf32>
    %634 = vector.broadcast %633 : vector<1x32xf32> to vector<8x32xf32>
    %635 = arith.addf %632, %634 : vector<8x32xf32>
    %cst_144 = arith.constant 0.000000e+00 : f32
    %636 = vector.broadcast %cst_144 : f32 to vector<8x32xf32>
    %637 = arith.maximumf %635, %636 : vector<8x32xf32>
    %638 = vector.extract_strided_slice %593 {offsets = [64, 0], sizes = [32, 32], strides = [1, 1]} : vector<96x32xf32> to vector<32x32xf32>
    %cst_145 = arith.constant dense<0.000000e+00> : vector<8x32xf32>
    %639 = tpu.matmul %637, %638, %cst_145 {dimension_numbers = #tpu.dot_dimension_numbers<[1], [0], [0], [1], [0, 0, 1, 1], [], []>} : vector<8x32xf32>, vector<32x32xf32>, vector<8x32xf32> -> vector<8x32xf32>
    %640 = arith.addf %625, %639 : vector<8x32xf32>
    %c0_146 = arith.constant 0 : index
    %c0_147 = arith.constant 0 : index
    %641 = vector.load %arg33[%c0_146, %c0_147] : memref<32x16xf32, #tpu.memory_space<vmem>>, vector<32x16xf32>
    %c0_148 = arith.constant 0 : index
    %c0_149 = arith.constant 0 : index
    %642 = vector.load %arg34[%c0_148, %c0_149] : memref<1x16xf32, #tpu.memory_space<vmem>>, vector<1x16xf32>
    %c0_150 = arith.constant 0 : index
    %c0_151 = arith.constant 0 : index
    %643 = vector.load %arg35[%c0_150, %c0_151] : memref<16x8xf32, #tpu.memory_space<vmem>>, vector<16x8xf32>
    %c0_152 = arith.constant 0 : index
    %c0_153 = arith.constant 0 : index
    %644 = vector.load %arg36[%c0_152, %c0_153] : memref<1x8xf32, #tpu.memory_space<vmem>>, vector<1x8xf32>
    %c0_154 = arith.constant 0 : index
    %c0_155 = arith.constant 0 : index
    %645 = vector.load %arg37[%c0_154, %c0_155] : memref<8x5xf32, #tpu.memory_space<vmem>>, vector<8x5xf32>
    %c0_156 = arith.constant 0 : index
    %c0_157 = arith.constant 0 : index
    %646 = vector.load %arg38[%c0_156, %c0_157] : memref<1x5xf32, #tpu.memory_space<vmem>>, vector<1x5xf32>
    %cst_158 = arith.constant dense<0.000000e+00> : vector<8x16xf32>
    %647 = tpu.matmul %640, %641, %cst_158 {dimension_numbers = #tpu.dot_dimension_numbers<[1], [0], [0], [1], [0, 0, 1, 1], [], []>} : vector<8x32xf32>, vector<32x16xf32>, vector<8x16xf32> -> vector<8x16xf32>
    %648 = vector.broadcast %642 : vector<1x16xf32> to vector<8x16xf32>
    %649 = arith.addf %647, %648 : vector<8x16xf32>
    %cst_159 = arith.constant 0.000000e+00 : f32
    %650 = vector.broadcast %cst_159 : f32 to vector<8x16xf32>
    %651 = arith.maximumf %649, %650 : vector<8x16xf32>
    %cst_160 = arith.constant dense<0.000000e+00> : vector<8x8xf32>
    %652 = tpu.matmul %651, %643, %cst_160 {dimension_numbers = #tpu.dot_dimension_numbers<[1], [0], [0], [1], [0, 0, 1, 1], [], []>} : vector<8x16xf32>, vector<16x8xf32>, vector<8x8xf32> -> vector<8x8xf32>
    %653 = vector.broadcast %644 : vector<1x8xf32> to vector<8x8xf32>
    %654 = arith.addf %652, %653 : vector<8x8xf32>
    %cst_161 = arith.constant 0.000000e+00 : f32
    %655 = vector.broadcast %cst_161 : f32 to vector<8x8xf32>
    %656 = arith.maximumf %654, %655 : vector<8x8xf32>
    %cst_162 = arith.constant dense<0.000000e+00> : vector<8x5xf32>
    %657 = tpu.matmul %656, %645, %cst_162 {dimension_numbers = #tpu.dot_dimension_numbers<[1], [0], [0], [1], [0, 0, 1, 1], [], []>} : vector<8x8xf32>, vector<8x5xf32>, vector<8x5xf32> -> vector<8x5xf32>
    %658 = vector.broadcast %646 : vector<1x5xf32> to vector<8x5xf32>
    %659 = arith.addf %657, %658 : vector<8x5xf32>
    %c0_163 = arith.constant 0 : index
    %c0_164 = arith.constant 0 : index
    %660 = vector.load %arg39[%c0_163, %c0_164] : memref<8x5xf32, #tpu.memory_space<vmem>>, vector<8x5xf32>
    tpu.vector_store %arg39[%c0_163, %c0_164], %659 {strides = array<i32>} : memref<8x5xf32, #tpu.memory_space<vmem>>, vector<8x5xf32>,
    return
  }
  func.func @transform_0(%arg0: i32) -> (i32, i32) {
    %c0_i32 = arith.constant 0 : i32
    %c0_i32_0 = arith.constant 0 : i32
    %c0_i32_1 = arith.constant 0 : i32
    return %c0_i32, %c0_i32_0 : i32, i32
  }
  func.func @transform_1(%arg0: i32) -> (i32, i32) {
    %c0_i32 = arith.constant 0 : i32
    %c0_i32_0 = arith.constant 0 : i32
    %c0_i32_1 = arith.constant 0 : i32
    return %c0_i32, %c0_i32_0 : i32, i32
  }
  func.func @transform_2(%arg0: i32) -> (i32, i32) {
    %c0_i32 = arith.constant 0 : i32
    %c0_i32_0 = arith.constant 0 : i32
    %c0_i32_1 = arith.constant 0 : i32
    return %c0_i32, %c0_i32_0 : i32, i32
  }
  func.func @transform_3(%arg0: i32) -> (i32, i32) {
    %c0_i32 = arith.constant 0 : i32
    %c0_i32_0 = arith.constant 0 : i32
    %c0_i32_1 = arith.constant 0 : i32
    return %c0_i32, %c0_i32_0 : i32, i32
  }
  func.func @transform_4(%arg0: i32) -> (i32, i32) {
    %c0_i32 = arith.constant 0 : i32
    %c0_i32_0 = arith.constant 0 : i32
    %c0_i32_1 = arith.constant 0 : i32
    return %c0_i32, %c0_i32_0 : i32, i32
  }
  func.func @transform_5(%arg0: i32) -> (i32, i32) {
    %c0_i32 = arith.constant 0 : i32
    %c0_i32_0 = arith.constant 0 : i32
    %c0_i32_1 = arith.constant 0 : i32
    return %c0_i32, %c0_i32_0 : i32, i32
  }
  func.func @transform_6(%arg0: i32) -> (i32, i32) {
    %c0_i32 = arith.constant 0 : i32
    %c0_i32_0 = arith.constant 0 : i32
    %c0_i32_1 = arith.constant 0 : i32
    return %c0_i32, %c0_i32_0 : i32, i32
  }
  func.func @transform_7(%arg0: i32) -> (i32, i32) {
    %c0_i32 = arith.constant 0 : i32
    %c0_i32_0 = arith.constant 0 : i32
    %c0_i32_1 = arith.constant 0 : i32
    return %c0_i32, %c0_i32_0 : i32, i32
  }
  func.func @transform_8(%arg0: i32) -> (i32, i32) {
    %c0_i32 = arith.constant 0 : i32
    %c0_i32_0 = arith.constant 0 : i32
    %c0_i32_1 = arith.constant 0 : i32
    return %c0_i32, %c0_i32_0 : i32, i32
  }
  func.func @transform_9(%arg0: i32) -> (i32, i32) {
    %c0_i32 = arith.constant 0 : i32
    %c0_i32_0 = arith.constant 0 : i32
    %c0_i32_1 = arith.constant 0 : i32
    return %c0_i32, %c0_i32_0 : i32, i32
  }
  func.func @transform_10(%arg0: i32) -> (i32, i32) {
    %c0_i32 = arith.constant 0 : i32
    %c0_i32_0 = arith.constant 0 : i32
    %c0_i32_1 = arith.constant 0 : i32
    return %c0_i32, %c0_i32_0 : i32, i32
  }
  func.func @transform_11(%arg0: i32) -> (i32, i32) {
    %c0_i32 = arith.constant 0 : i32
    %c0_i32_0 = arith.constant 0 : i32
    %c0_i32_1 = arith.constant 0 : i32
    return %c0_i32, %c0_i32_0 : i32, i32
  }
  func.func @transform_12(%arg0: i32) -> (i32, i32) {
    %c0_i32 = arith.constant 0 : i32
    %c0_i32_0 = arith.constant 0 : i32
    %c0_i32_1 = arith.constant 0 : i32
    return %c0_i32, %c0_i32_0 : i32, i32
  }
  func.func @transform_13(%arg0: i32) -> (i32, i32) {
    %c0_i32 = arith.constant 0 : i32
    %c0_i32_0 = arith.constant 0 : i32
    %c0_i32_1 = arith.constant 0 : i32
    return %c0_i32, %c0_i32_0 : i32, i32
  }
  func.func @transform_14(%arg0: i32) -> (i32, i32) {
    %c0_i32 = arith.constant 0 : i32
    %c0_i32_0 = arith.constant 0 : i32
    %c0_i32_1 = arith.constant 0 : i32
    return %c0_i32, %c0_i32_0 : i32, i32
  }
  func.func @transform_15(%arg0: i32) -> (i32, i32) {
    %c0_i32 = arith.constant 0 : i32
    %c0_i32_0 = arith.constant 0 : i32
    %c0_i32_1 = arith.constant 0 : i32
    return %c0_i32, %c0_i32_0 : i32, i32
  }
  func.func @transform_16(%arg0: i32) -> (i32, i32) {
    %c0_i32 = arith.constant 0 : i32
    %c0_i32_0 = arith.constant 0 : i32
    %c0_i32_1 = arith.constant 0 : i32
    return %c0_i32, %c0_i32_0 : i32, i32
  }
  func.func @transform_17(%arg0: i32) -> (i32, i32) {
    %c0_i32 = arith.constant 0 : i32
    %c0_i32_0 = arith.constant 0 : i32
    %c0_i32_1 = arith.constant 0 : i32
    return %c0_i32, %c0_i32_0 : i32, i32
  }
  func.func @transform_18(%arg0: i32) -> (i32, i32) {
    %c0_i32 = arith.constant 0 : i32
    %c0_i32_0 = arith.constant 0 : i32
    %c0_i32_1 = arith.constant 0 : i32
    return %c0_i32, %c0_i32_0 : i32, i32
  }
  func.func @transform_19(%arg0: i32) -> (i32, i32) {
    %c0_i32 = arith.constant 0 : i32
    %c0_i32_0 = arith.constant 0 : i32
    %c0_i32_1 = arith.constant 0 : i32
    return %c0_i32, %c0_i32_0 : i32, i32
  }
  func.func @transform_20(%arg0: i32) -> (i32, i32) {
    %c0_i32 = arith.constant 0 : i32
    %c0_i32_0 = arith.constant 0 : i32
    %c0_i32_1 = arith.constant 0 : i32
    return %c0_i32, %c0_i32_0 : i32, i32
  }
  func.func @transform_21(%arg0: i32) -> (i32, i32) {
    %c0_i32 = arith.constant 0 : i32
    %c0_i32_0 = arith.constant 0 : i32
    %c0_i32_1 = arith.constant 0 : i32
    return %c0_i32, %c0_i32_0 : i32, i32
  }
  func.func @transform_22(%arg0: i32) -> (i32, i32) {
    %c0_i32 = arith.constant 0 : i32
    %c0_i32_0 = arith.constant 0 : i32
    %c0_i32_1 = arith.constant 0 : i32
    return %c0_i32, %c0_i32_0 : i32, i32
  }
  func.func @transform_23(%arg0: i32) -> (i32, i32) {
    %c0_i32 = arith.constant 0 : i32
    %c0_i32_0 = arith.constant 0 : i32
    %c0_i32_1 = arith.constant 0 : i32
    return %c0_i32, %c0_i32_0 : i32, i32
  }
  func.func @transform_24(%arg0: i32) -> (i32, i32) {
    %c0_i32 = arith.constant 0 : i32
    %c0_i32_0 = arith.constant 0 : i32
    %c0_i32_1 = arith.constant 0 : i32
    return %c0_i32, %c0_i32_0 : i32, i32
  }
  func.func @transform_25(%arg0: i32) -> (i32, i32) {
    %c0_i32 = arith.constant 0 : i32
    %c0_i32_0 = arith.constant 0 : i32
    %c0_i32_1 = arith.constant 0 : i32
    return %c0_i32, %c0_i32_0 : i32, i32
  }
  func.func @transform_26(%arg0: i32) -> (i32, i32) {
    %c0_i32 = arith.constant 0 : i32
    %c0_i32_0 = arith.constant 0 : i32
    %c0_i32_1 = arith.constant 0 : i32
    return %c0_i32, %c0_i32_0 : i32, i32
  }
  func.func @transform_27(%arg0: i32) -> (i32, i32) {
    %c0_i32 = arith.constant 0 : i32
    %c0_i32_0 = arith.constant 0 : i32
    %c0_i32_1 = arith.constant 0 : i32
    return %c0_i32, %c0_i32_0 : i32, i32
  }
  func.func @transform_28(%arg0: i32) -> (i32, i32) {
    %c0_i32 = arith.constant 0 : i32
    %c0_i32_0 = arith.constant 0 : i32
    %c0_i32_1 = arith.constant 0 : i32
    return %c0_i32, %c0_i32_0 : i32, i32
  }
  func.func @transform_29(%arg0: i32) -> (i32, i32) {
    %c0_i32 = arith.constant 0 : i32
    %c0_i32_0 = arith.constant 0 : i32
    %c0_i32_1 = arith.constant 0 : i32
    return %c0_i32, %c0_i32_0 : i32, i32
  }
  func.func @transform_30(%arg0: i32) -> (i32, i32) {
    %c0_i32 = arith.constant 0 : i32
    %c0_i32_0 = arith.constant 0 : i32
    %c0_i32_1 = arith.constant 0 : i32
    return %c0_i32, %c0_i32_0 : i32, i32
  }
  func.func @transform_31(%arg0: i32) -> (i32, i32) {
    %c0_i32 = arith.constant 0 : i32
    %c0_i32_0 = arith.constant 0 : i32
    %c0_i32_1 = arith.constant 0 : i32
    return %c0_i32, %c0_i32_0 : i32, i32
  }
  func.func @transform_32(%arg0: i32) -> (i32, i32) {
    %c0_i32 = arith.constant 0 : i32
    %c0_i32_0 = arith.constant 0 : i32
    %c0_i32_1 = arith.constant 0 : i32
    return %c0_i32, %c0_i32_0 : i32, i32
  }
  func.func @transform_33(%arg0: i32) -> (i32, i32) {
    %c0_i32 = arith.constant 0 : i32
    %c0_i32_0 = arith.constant 0 : i32
    %c0_i32_1 = arith.constant 0 : i32
    return %c0_i32, %c0_i32_0 : i32, i32
  }
  func.func @transform_34(%arg0: i32) -> (i32, i32) {
    %c0_i32 = arith.constant 0 : i32
    %c0_i32_0 = arith.constant 0 : i32
    %c0_i32_1 = arith.constant 0 : i32
    return %c0_i32, %c0_i32_0 : i32, i32
  }
  func.func @transform_35(%arg0: i32) -> (i32, i32) {
    %c0_i32 = arith.constant 0 : i32
    %c0_i32_0 = arith.constant 0 : i32
    %c0_i32_1 = arith.constant 0 : i32
    return %c0_i32, %c0_i32_0 : i32, i32
  }
  func.func @transform_36(%arg0: i32) -> (i32, i32) {
    %c0_i32 = arith.constant 0 : i32
    %c0_i32_0 = arith.constant 0 : i32
    %c0_i32_1 = arith.constant 0 : i32
    return %c0_i32, %c0_i32_0 : i32, i32
  }
  func.func @transform_37(%arg0: i32) -> (i32, i32) {
    %c0_i32 = arith.constant 0 : i32
    %c0_i32_0 = arith.constant 0 : i32
    %c0_i32_1 = arith.constant 0 : i32
    return %c0_i32, %c0_i32_0 : i32, i32
  }
  func.func @transform_38(%arg0: i32) -> (i32, i32) {
    %c0_i32 = arith.constant 0 : i32
    %c0_i32_0 = arith.constant 0 : i32
    %c0_i32_1 = arith.constant 0 : i32
    return %c0_i32, %c0_i32_0 : i32, i32
  }
}

</mosaic_0001>

<bundles_post_ra>
// kernel: gated_gcn_forward.1
= control target key start
LH: loop header
LB: loop body
LE: loop exit
PB: predicated region body
PF: predicated region fallthrough
CT: control target
= control target key end

     0   :  { %s5411_s6 = smov 1   ;;  %s5412_s10 = smov 2   ;;  %s6665_s0 = inlined_call_operand.smem [shape: u32[39], index: -1, kind: input, shape index: {}] }
   0x1   :  { %s5464_s5 = sld [smem:[%s6665_s0]]   ;;  %s5413_s14 = smov 3  }
   0x2   :  { %s5469_s9 = sld [smem:[%s6665_s0 + %s5411_s6]]   ;;  %s5414_s18 = smov 4  }
   0x3   :  { %s5474_s13 = sld [smem:[%s6665_s0 + %s5412_s10]]   ;;  %s5415_s22 = smov 5  }
   0x4   :  { %s5479_s17 = sld [smem:[%s6665_s0 + %s5413_s14]]   ;;  %s5416_s26 = smov 6  }
   0x5   :  { %s5484_s21 = sld [smem:[%s6665_s0 + %s5414_s18]]   ;;  %s5417_s30 = smov 7  }
   0x6   :  { %s5489_s25 = sld [smem:[%s6665_s0 + %s5415_s22]]   ;;  %s5418_s4 = smov 8  }
   0x7   :  { %s5494_s29 = sld [smem:[%s6665_s0 + %s5416_s26]]   ;;  %s5419_s10 = smov 9  }
   0x8   :  { %s5499_s3 = sld [smem:[%s6665_s0 + %s5417_s30]]   ;;  %s5420_s15 = smov 10  }
   0x9   :  { %6679 = sst [smem:[#allocation5_spill]] %s5474_s13  ;;  %s5421_s20 = smov 11  }
   0xa   :  { %s5504_s8 = sld [smem:[%s6665_s0 + %s5418_s4]]   ;;  %s5422_s26 = smov 12  }
   0xb   :  { %s5509_s14 = sld [smem:[%s6665_s0 + %s5419_s10]]   ;;  %s5423_s1 = smov 13  }
   0xc   :  { %s5514_s19 = sld [smem:[%s6665_s0 + %s5420_s15]]   ;;  %s5424_s7 = smov 14  }
   0xd   :  { %s5519_s24 = sld [smem:[%s6665_s0 + %s5421_s20]]   ;;  %s5425_s15 = smov 15  }
   0xe   :  { %s5524_s30 = sld [smem:[%s6665_s0 + %s5422_s26]]   ;;  %s5426_s22 = smov 16  }
   0xf   :  { %s5529_s6 = sld [smem:[%s6665_s0 + %s5423_s1]]   ;;  %s5427_s28 = smov 17  }
  0x10   :  { %s5534_s12 = sld [smem:[%s6665_s0 + %s5424_s7]]   ;;  %s5428_s7 = smov 18  }
  0x11   :  { %s5539_s20 = sld [smem:[%s6665_s0 + %s5425_s15]]   ;;  %s5429_s15 = smov 19  }
  0x12   :  { %s5544_s27 = sld [smem:[%s6665_s0 + %s5426_s22]]   ;;  %s5430_s22 = smov 20  }
  0x13   :  { %s5549_s4 = sld [smem:[%s6665_s0 + %s5427_s28]]   ;;  %s5431_s28 = smov 21  }
  0x14   :  { %s5564_s13 = sld [smem:[%s6665_s0 + %s5430_s22]]   ;;  %s5434_s22 = smov 24  }
  0x16   :  { %6680 = sst [smem:[#allocation6_spill]] %s5534_s12 }
  0x17   :  { %6681 = sst [smem:[#allocation7_spill]] %s5539_s20 }
  0x18   :  { %6682 = sst [smem:[#allocation8_spill]] %s5544_s27 }
  0x19   :  { %6683 = sst [smem:[#allocation9_spill]] %s5549_s4 }
  0x1a   :  { %s5554_s12 = sld [smem:[%s6665_s0 + %s5428_s7]]   ;;  %s5432_s7 = smov 22  }
  0x1b   :  { %s5559_s20 = sld [smem:[%s6665_s0 + %s5429_s15]]   ;;  %s5433_s15 = smov 23  }
  0x1c   :  { %6685 = sst [smem:[#allocation11_spill]] %s5564_s13 }
  0x1d   :  { %s5569_s4 = sld [smem:[%s6665_s0 + %s5431_s28]]   ;;  %s5435_s28 = smov 25  }
  0x1e   :  { %s5574_s27 = sld [smem:[%s6665_s0 + %s5432_s7]]   ;;  %s5436_s7 = smov 26  }
  0x1f   :  { %s5584_s13 = sld [smem:[%s6665_s0 + %s5434_s22]]   ;;  %s5438_s22 = smov 28  }
  0x21   :  { %6684 = sst [smem:[#allocation10_spill]] %s5559_s20 }
  0x22   :  { %s5579_s20 = sld [smem:[%s6665_s0 + %s5433_s15]]   ;;  %s5437_s15 = smov 27  }
  0x23   :  { %6686 = sst [smem:[#allocation12_spill]] %s5569_s4 }
  0x24   :  { %6687 = sst [smem:[#allocation13_spill]] %s5574_s27 }
  0x25   :  { %6689 = sst [smem:[#allocation15_spill]] %s5584_s13 }
  0x26   :  { %s5589_s4 = sld [smem:[%s6665_s0 + %s5435_s28]]   ;;  %s5439_s28 = smov 29  }
  0x27   :  { %s5594_s27 = sld [smem:[%s6665_s0 + %s5436_s7]]   ;;  %s5440_s7 = smov 30  }
  0x28   :  { %6688 = sst [smem:[#allocation14_spill]] %s5579_s20 }
  0x29   :  { %s5599_s20 = sld [smem:[%s6665_s0 + %s5437_s15]]   ;;  %s5441_s15 = smov 31  }
  0x2a   :  { %s5604_s13 = sld [smem:[%s6665_s0 + %s5438_s22]]   ;;  %s5442_s22 = smov 32  }
  0x2c   :  { %6690 = sst [smem:[#allocation16_spill]] %s5589_s4 }
  0x2d   :  { %6691 = sst [smem:[#allocation17_spill]] %s5594_s27 }
  0x2e   :  { %s5609_s4 = sld [smem:[%s6665_s0 + %s5439_s28]]   ;;  %s5443_s28 = smov 33  }
  0x2f   :  { %6692 = sst [smem:[#allocation18_spill]] %s5599_s20 }
  0x30   :  { %6693 = sst [smem:[#allocation19_spill]] %s5604_s13 }
  0x31   :  { %s5614_s27 = sld [smem:[%s6665_s0 + %s5440_s7]]   ;;  %s5444_s7 = smov 34  }
  0x32   :  { %s5619_s20 = sld [smem:[%s6665_s0 + %s5441_s15]]   ;;  %s5445_s15 = smov 35  }
  0x33   :  { %s5624_s13 = sld [smem:[%s6665_s0 + %s5442_s22]]   ;;  %s5446_s22 = smov 36  }
  0x34   :  { %6694 = sst [smem:[#allocation20_spill]] %s5609_s4 }
  0x35   :  { %s5629_s4 = sld [smem:[%s6665_s0 + %s5443_s28]]   ;;  %s5447_s28 = smov 37  }
  0x37   :  { %6695 = sst [smem:[#allocation21_spill]] %s5614_s27 }
  0x38   :  { %6696 = sst [smem:[#allocation22_spill]] %s5619_s20 }
  0x39   :  { %6697 = sst [smem:[#allocation23_spill]] %s5624_s13 }
  0x3a   :  { %s5634_s27 = sld [smem:[%s6665_s0 + %s5444_s7]]   ;;  %s5448_s7 = smov 38  }
  0x3b   :  { %6698 = sst [smem:[#allocation24_spill]] %s5629_s4 }
  0x3c   :  { %s5639_s20 = sld [smem:[%s6665_s0 + %s5445_s15]]  }
  0x3d   :  { %s5644_s13 = sld [smem:[%s6665_s0 + %s5446_s22]]  }
  0x3e   :  { %s5649_s4 = sld [smem:[%s6665_s0 + %s5447_s28]]  }
  0x40   :  { %6699 = sst [smem:[#allocation25_spill]] %s5634_s27 }
  0x41   :  { %s5654_s27 = sld [smem:[%s6665_s0 + %s5448_s7]]  }
  0x42   :  { %v170_v0 = vld [vmem:[%s5484_s21] sm:$0xff]  ;;  %vm232_vm0 = vcmask 64512   ;;  %v163_v2 = vld [vmem:[%s5479_s17 + $0x8] sm:$0xff]  ;;  %v164_v4 = vld [vmem:[%s5479_s17 + $0x10] sm:$0xff]  ;;  %v6674_v5 = vmov 0.0   ;;  %vm5450_vm1 = vmmov 0  }
  0x43   :  { %v162_v1 = vld [vmem:[%s5479_s17] sm:$0xff]  ;;  %4752 = vmatprep.subr.mxu1 %v170_v0  ;;  %4747 = vmatprep.subr.mxu0 %v6674_v5  ;;  %v191_v6 = vld [vmem:[%s5504_s8 + $0x38] sm:$0xff]  ;;  %v190_v8 = vld [vmem:[%s5504_s8 + $0x30] sm:$0xff] }
  0x44   :  { %4754 = vmatprep.mubr.msk.f32.mxu1 %vm232_vm0, %v162_v1  ;;  %v160_v3 = vld [vmem:[%s5469_s9] sm:$0xff]  ;;  %4753 = vmatpush3.msra.mxu1 %v170_v0  ;;  %v165_v9 = vld [vmem:[%s5479_s17 + $0x18] sm:$0xff]  ;;  %v189_v10 = vld [vmem:[%s5504_s8 + $0x28] sm:$0xff] }
  0x45   :  { %v159_v7 = vld [vmem:[%s5464_s5] sm:$0xff]  ;;  %4755 = vmatmul.mubr.msk.f32.vlgmr.msra.gmra.mxu1 %vm232_vm0, %v163_v2  ;;  %4748 = vmatpush3.msra.mxu0 %v160_v3  ;;  %v187_v13 = vld [vmem:[%s5504_s8 + $0x18] sm:$0xff]  ;;  %v186_v15 = vld [vmem:[%s5504_s8 + $0x10] sm:$0xff] }
  0x46   :  { %4757 = vmatprep.mubr.msk.f32.mxu1 %vm232_vm0, %v164_v4  ;;  %4749 = vmatprep.mubr.msk.f32.mxu0 %vm5450_vm1, %v6674_v5  ;;  %v166_v11 = vld [vmem:[%s5479_s17 + $0x20] sm:$0xff]  ;;  %v5678_v14 = vld [vmem:[%s5514_s19 + $0x18] sm:$0xff]  ;;  %v167_v16 = vld [vmem:[%s5479_s17 + $0x28] sm:$0xff] }
  0x47   :  { %495 = vmatprep.subr.mxu0 %v191_v6  ;;  %4750 = vmatmul.mubr.msk.f32.vlgmr.msra.gmra.mxu0 %vm232_vm0, %v159_v7  ;;  %v188_v12 = vld [vmem:[%s5504_s8 + $0x20] sm:$0xff]  ;;  %v185_v17 = vld [vmem:[%s5504_s8 + $0x8] sm:$0xff] }
  0x48   :  { %496 = vmatpush1.msra.mxu0 %v190_v8  ;;  %4766 = vmatprep.subr.mxu1 %v6674_v5 }
  0x49   :  { %4758 = vmatmul.mubr.msk.f32.gmra.mxu1 %vm232_vm0, %v165_v9  ;;  %497 = vmatprep.subr.mxu0 %v189_v10 }
  0x4a   :  { %4760 = vmatprep.mubr.msk.f32.mxu1 %vm232_vm0, %v166_v11  ;;  %498 = vmatpush1.msra.mxu0 %v188_v12 }
  0x4b   :  { %82 = vsyncpa [#allocation3], 0  ;;  %499 = vmatprep.subr.mxu0 %v187_v13  ;;  %4767 = vmatpush3.msra.mxu1 %v5678_v14  ;;  %v168_v18 = vld [vmem:[%s5479_s17 + $0x30] sm:$0xff]  ;;  %v184_v19 = vld [vmem:[%s5504_s8] sm:$0xff]  ;;  %vm452_vm2 = vcmask 261120   ;;  %v442_v25 = vlaneseq  ;;  %v5451_v31 = vmov 0  }
  0x4c   :  { %500 = vmatpush1.msra.mxu0 %v186_v15  ;;  %4768 = vmatprep.subr.mxu1 %v6674_v5  ;;  %v5690_v20 = vld [vmem:[%s5514_s19 + $0x10] sm:$0xff]  ;;  %v172_v21 = vld [vmem:[%s5494_s29] sm:$0xff]  ;;  %v169_v22 = vld [vmem:[%s5479_s17 + $0x38] sm:$0xff]  ;;  %s5452_s0 = smov 32   ;;  %s5453_s5 = smov 64  }
  0x4d   :  { %4761 = vmatmul.mubr.msk.f32.gmra.mxu1 %vm232_vm0, %v167_v16  ;;  %501 = vmatprep.subr.mxu0 %v185_v17  ;;  %v5699_v23 = vld [vmem:[%s5514_s19 + $0x8] sm:$0xff]  ;;  %v5705_v24 = vld [vmem:[%s5514_s19] sm:$0xff]  ;;  %v443_v26 = vshrl.u32 %v442_v25, 7  ;;  %s6700_s9 = sld [smem:[#allocation8_spill]]  ;;  %s5455_s7 = smov [#allocation2]  }
  0x4e   :  { %4763 = vmatprep.mubr.msk.f32.mxu1 %vm232_vm0, %v168_v18  ;;  %502 = vmatpush1.msra.mxu0 %v184_v19  ;;  %v192_v28 = vld [vmem:[%s5509_s14] sm:$0x3]  ;;  %v173_v60 = vld [vmem:[%s5494_s29 + $0x8] sm:$0xff]  ;;  %s6701_s17 = sld [smem:[#allocation5_spill]]  ;;  %s4343_s10 = sshll.u32 %s5455_s7, 4  ;;  %s4344_s10 = int_to_ptr.vmem [resolvable:$true] %s4343_s10 }
  0x4f   :  { %535 = vmatprep.mubr.f32.mxu0 %v6674_v5  ;;  %4769 = vmatpush3.msra.mxu1 %v5690_v20  ;;  %v448_v27 = vsub.s32 1, %v443_v26  ;;  %v178_v30 = vld [vmem:[%s5499_s3] sm:$0xff]  ;;  %v444_v38 = vsub.s32 0, %v443_v26  ;;  %v179_v15 = vld [vmem:[%s5499_s3 + $0x8] sm:$0xff]  ;;  %s6702_s21 = sld [smem:[#allocation9_spill]]  ;;  %s5389_s11 = scalar_lea.vmem %s4344_s10, 128 }
  0x50   :  { %4400 = vmatmul.mubr.msk.f32.vlgmr.msra.gmra.mxu0 %vm452_vm2, %v172_v21  ;;  %4770 = vmatprep.subr.mxu1 %v6674_v5  ;;  %v572_v32 = vsub.f32 1.0, %v178_v30  ;;  %v573_v26 = vsub.f32 1.0, %v179_v15  ;;  %s6708_s8 = sld [smem:[#allocation7_spill]]  ;;  %p5390_p0 = scmp.ne.s32.totalorder %s4344_s10, %s5389_s11 }
  0x51   :  { %4764 = vmatmul.mubr.msk.f32.gmra.mxu1 %vm232_vm0, %v169_v22  ;;  %541 = vmatprep.mubr.f32.mxu0 %v6674_v5  ;;  %v5736_v29 = vrot.slane %v192_v28, %v448_v27  ;;  %v5751_v41 = vrot.slane %v192_v28, %v444_v38  ;;  %v175_v38 = vld [vmem:[%s5494_s29 + $0x18] sm:$0xff]  ;;  %s6709_s14 = sld [smem:[#allocation10_spill]]  ;;  %p5394_p1 = scmp.lt.s32.totalorder %s4344_s10, %s4344_s10 }
  0x52   :  { %4771 = vmatpush3.msra.mxu1 %v5699_v23  ;;  %4774 = vmatprep.mubr.msk.f32.mxu1 %vm5450_vm1, %v6674_v5  ;;  %s6711_s19 = sld [smem:[#allocation11_spill]]  ;;  %p5395_p2 = scmp.lt.s32.totalorder %s5389_s11, %s5389_s11 }
  0x53   :  { %4772 = vmatprep.subr.mxu1 %v6674_v5  ;;  %4788 = vmatprep.subr.mxu0 %v6674_v5  ;;  %s6716_s15 = sld [smem:[#allocation16_spill]] }
  0x54   :  { %4773 = vmatpush3.msra.mxu1 %v5705_v24  ;;  %4789 = vmatpush3.msra.mxu0 %v5678_v14  ;;  %s6720_s16 = sld [smem:[#allocation18_spill]]  ;;  %p5396_p3 = por %p5395_p2, %p5394_p1 }
  0x55   :  { %4775 = vmatmul.mubr.f32.vlgmr.msra.gmra.mxu1 %v6674_v5  ;;  %4777 = vmatprep.subr.mxu1 %v6674_v5  ;;  %s6721_s18 = sld [smem:[#allocation19_spill]] }
  0x56   :  { %4778 = vmatpush3.msra.mxu1 %v5678_v14  ;;  %4785 = vmatprep.mubr.msk.f32.mxu1 %vm5450_vm1, %v6674_v5  ;;  %s6722_s22 = sld [smem:[#allocation20_spill]]  ;;  %p5397_p4 = pnand %p5396_p3, %p5390_p0 }
  0x57   :  { %4779 = vmatprep.subr.mxu1 %v6674_v5  ;;  %4790 = vmatprep.subr.mxu0 %v6674_v5  ;;  %s6723_s23 = sld [smem:[#allocation21_spill]] }
  0x58   :  { %4780 = vmatpush3.msra.mxu1 %v5690_v20  ;;  %4791 = vmatpush3.msra.mxu0 %v5690_v20  ;;  %s6724_s26 = sld [smem:[#allocation23_spill]] }
  0x59   :  { %4781 = vmatprep.subr.mxu1 %v6674_v5  ;;  %4792 = vmatprep.subr.mxu0 %v6674_v5  ;;  %s6725_s28 = sld [smem:[#allocation22_spill]] }
  0x5a   :  { %4782 = vmatpush3.msra.mxu1 %v5699_v23  ;;  %4793 = vmatpush3.msra.mxu0 %v5699_v23  ;;  %s6726_s1 = sld [smem:[#allocation25_spill]] }
  0x5b   :  { %4783 = vmatprep.subr.mxu1 %v6674_v5  ;;  %4794 = vmatprep.subr.mxu0 %v6674_v5  ;;  %s6727_s2 = sld [smem:[#allocation24_spill]] }
  0x5c   :  { %4784 = vmatpush3.msra.mxu1 %v5705_v24  ;;  %4795 = vmatpush3.msra.mxu0 %v5705_v24 }
  0x5d   :  { %4799 = vmatprep.subr.mxu1 %v6674_v5  ;;  %4810 = vmatprep.subr.mxu0 %v6674_v5 }
  0x5e   :  { %5215 = vset.pattern.permute.xlu1 %v5451_v31  ;;  %5216 = vset.pattern.permute.xlu0 %v5451_v31 }
  0x5f   :  { %678 = vperm.xlu1 %5215, %v178_v30   ;;  %4401 = vmatmul.mubr.msk.f32.gmra.mxu0 %vm452_vm2, %v173_v60 }
  0x60   :  { %547 = vmatprep.mubr.f32.mxu0 %v6674_v5 }
  0x63   :  { %684 = vperm.xlu1 %5215, %v572_v32  }
  0xda   :  { %v5766_v62 = vpop.permute.xlu1 %678 }
  0xde   :  { %v5768_v63 = vpop.permute.xlu1 %684 }
  0xdf   :  { %v687_v2 = vmul.f32 0.0, %v5768_v63 }
 0x105   :  { %v5739_v33 = vpop.f32.mrf.mxu1 }
 0x107   :  { %v5741_v34 = vpop.f32.mrf.mxu1  ;;  %v5743_v35 = vpop.f32.mrf.mxu0 }
 0x109   :  { %v5745_v36 = vpop.f32.mrf.mxu1  ;;  %v4751_v37 = vpop.f32.mrf.mxu0 }
 0x10a   :  { %v174_v37 = vld [vmem:[%s5494_s29 + $0x10] sm:$0xff] }
 0x10b   :  { %v5747_v39 = vpop.f32.mrf.mxu1  ;;  %4402 = vmatmul.mubr.msk.f32.gmra.mxu0 %vm452_vm2, %v174_v37 }
 0x10c   :  { %553 = vmatprep.mubr.f32.mxu0 %v6674_v5 }
 0x10d   :  { %v5749_v40 = vpop.f32.mrf.mxu1 }
 0x10f   :  { %v5753_v42 = vpop.f32.mrf.mxu1  ;;  %4403 = vmatmul.mubr.msk.f32.gmra.mxu0 %vm452_vm2, %v175_v38 }
 0x110   :  { %v537_v44 = vpop.f32.mrf.mxu0  ;;  %559 = vmatprep.mubr.f32.mxu0 %v6674_v5 }
 0x111   :  { %v5755_v43 = vpop.f32.mrf.mxu1  ;;  %v538_v45 = vadd.f32 %v537_v44, %v5751_v41 }
 0x112   :  { %v5784_v7 = vpop.f32.mrf.mxu0 }
 0x113   :  { %v5758_v46 = vpop.f32.mrf.mxu1 }
 0x115   :  { %v647_v47 = vpop.f32.mrf.mxu1 }
 0x116   :  { %v651_v48 = vadd.f32 %v647_v47, %v538_v45  ;;  %v176_v45 = vld [vmem:[%s5494_s29 + $0x20] sm:$0xff]  ;;  %v177_v47 = vld [vmem:[%s5494_s29 + $0x28] sm:$0xff]  ;;  %s5454_s29 = smov 96  }
 0x117   :  { %v4776_v49 = vpop.f32.mrf.mxu1  ;;  %4404 = vmatmul.mubr.msk.f32.gmra.mxu0 %vm452_vm2, %v176_v45 }
 0x118   :  { %5217 = vtanh.f32 %v651_v48  ;;  %v4406_v51 = vmul.f32 -1.442695, %v651_v48  ;;  %565 = vmatprep.mubr.f32.mxu0 %v6674_v5 }
 0x11a   :  { %5219 = vpow2.f32 %v4406_v51 }
 0x11b   :  { %4405 = vmatmul.mubr.msk.f32.gmra.mxu0 %vm452_vm2, %v177_v47 }
 0x11c   :  { %4796 = vmatprep.mubr.msk.f32.mxu0 %vm5450_vm1, %v6674_v5 }
 0x11f   :  { %v543_v8 = vpop.f32.mrf.mxu0 }
 0x120   :  { %v544_v9 = vadd.f32 %v543_v8, %v5751_v41 }
 0x125   :  { %v5218_v50 = vpop.eup %5217 }
 0x126   :  { %661 = vrot.lane.b32.xlu0 %v5218_v50, %s5452_s0 }
 0x127   :  { %v5220_v52 = vpop.eup %5219 }
 0x128   :  { %v655_v53 = vadd.f32 1.0, %v5220_v52 }
 0x12a   :  { %5221 = vrcp.f32 %v655_v53 }
 0x137   :  { %v5222_v54 = vpop.eup %5221 }
 0x138   :  { %v659_v57 = vmul.f32 0.0, %v5222_v54 }
 0x198   :  { %v662_v55 = vpop.permute.xlu0 %661 }
 0x199   :  { %v664_v56 = vmul.f32 %v5222_v54, %v662_v55 }
 0x19b   :  { %666 = vrot.lane.b32.xlu0 %v664_v56, %s5452_s0  ;;  %v5829_v56 = vpop.f32.mrf.mxu0 }
 0x20d   :  { %v667_v58 = vpop.permute.xlu0 %666 }
 0x20e   :  { %v669_v59 = vadd.f32 %v667_v58, %v659_v57  ;;  %v549_v57 = vpop.f32.mrf.mxu0 }
 0x210   :  { %5223 = vtanh.f32 %v669_v59  ;;  %v689_v27 = vmul.f32 %v5766_v62, %v669_v59  ;;  %v5831_v58 = vpop.f32.mrf.mxu0 }
 0x212   :  { %v5791_v28 = vadd.f32 %v689_v27, %v687_v2  ;;  %v555_v59 = vpop.f32.mrf.mxu0 }
 0x214   :  { %v5833_v60 = vpop.f32.mrf.mxu0 }
 0x21d   :  { %v5224_v61 = vpop.eup %5223 }
 0x21e   :  { %672 = vrot.lane.b32.xlu0 %v5224_v61, %s5452_s0  ;;  %v5835_v61 = vpop.f32.mrf.mxu0 }
 0x290   :  { %v673_v0 = vpop.permute.xlu0 %672 }
 0x291   :  { %v675_v1 = vmul.f32 %v5222_v54, %v673_v0  ;;  %v5837_v0 = vpop.f32.mrf.mxu0 }
 0x293   :  { %v681_v3 = vmul.f32 %v5766_v62, %v675_v1  ;;  %v5839_v1 = vpop.f32.mrf.mxu0 }
 0x295   :  { %v688_v4 = vadd.f32 %v687_v2, %v681_v3  ;;  %v5841_v2 = vpop.f32.mrf.mxu0  ;;  %v550_v3 = vadd.f32 %v549_v57, %v5751_v41 }
 0x297   :  { %692 = vrot.lane.b32.xlu1 %v688_v4, %s5453_s5 }
 0x309   :  { %v693_v6 = vpop.permute.xlu1 %692 }
 0x30a   :  { %4786 = vmatmul.mubr.msk.f32.vlgmr.msra.gmra.mxu1 %vm452_vm2, %v693_v6 }
 0x30b   :  { %4800 = vmatpush3.msra.mxu1 %v5678_v14  ;;  %4807 = vmatprep.mubr.msk.f32.mxu1 %vm5450_vm1, %v6674_v5 }
 0x30c   :  { %4801 = vmatprep.subr.mxu1 %v6674_v5 }
 0x30d   :  { %4802 = vmatpush3.msra.mxu1 %v5690_v20 }
 0x30e   :  { %4803 = vmatprep.subr.mxu1 %v6674_v5 }
 0x30f   :  { %4804 = vmatpush3.msra.mxu1 %v5699_v23 }
 0x310   :  { %4805 = vmatprep.subr.mxu1 %v6674_v5 }
 0x311   :  { %4806 = vmatpush3.msra.mxu1 %v5705_v24 }
 0x312   :  { %4821 = vmatprep.subr.mxu1 %v6674_v5 }
 0x3ca   :  { %v762_v10 = vpop.f32.mrf.mxu1 }
 0x3cb   :  { %v766_v11 = vadd.f32 %v762_v10, %v544_v9  ;;  %v180_v10 = vld [vmem:[%s5499_s3 + $0x10] sm:$0xff] }
 0x3cc   :  { %v4787_v12 = vpop.f32.mrf.mxu1 }
 0x3cd   :  { %5225 = vtanh.f32 %v766_v11  ;;  %v4408_v16 = vmul.f32 -1.442695, %v766_v11 }
 0x3cf   :  { %5227 = vpow2.f32 %v4408_v16 }
 0x3da   :  { %v5226_v13 = vpop.eup %5225 }
 0x3db   :  { %776 = vrot.lane.b32.xlu0 %v5226_v13, %s5452_s0 }
 0x3dc   :  { %v5228_v17 = vpop.eup %5227 }
 0x3dd   :  { %v770_v18 = vadd.f32 1.0, %v5228_v17 }
 0x3df   :  { %793 = vperm.xlu0 %5216, %v179_v15   ;;  %5229 = vrcp.f32 %v770_v18  ;;  %v574_v18 = vsub.f32 1.0, %v180_v10 }
 0x3ec   :  { %v5230_v19 = vpop.eup %5229 }
 0x3ed   :  { %v774_v30 = vmul.f32 %v5230_v19, %v5791_v28 }
 0x44d   :  { %v777_v21 = vpop.permute.xlu0 %776 }
 0x44e   :  { %v779_v22 = vmul.f32 %v5230_v19, %v777_v21 }
 0x450   :  { %781 = vrot.lane.b32.xlu1 %v779_v22, %s5452_s0 }
 0x454   :  { %799 = vperm.xlu1 %5215, %v573_v26  }
 0x45a   :  { %v5813_v51 = vpop.permute.xlu0 %793 }
 0x4c2   :  { %v782_v31 = vpop.permute.xlu1 %781 }
 0x4c3   :  { %v5794_v32 = vadd.f32 %v782_v31, %v774_v30 }
 0x4c5   :  { %5231 = vtanh.f32 %v5794_v32  ;;  %v804_v21 = vmul.f32 %v5813_v51, %v5794_v32 }
 0x4cf   :  { %v5811_v48 = vpop.permute.xlu1 %799 }
 0x4d0   :  { %v802_v53 = vmul.f32 %v5811_v48, %v688_v4 }
 0x4d2   :  { %v5232_v44 = vpop.eup %5231 }
 0x4d3   :  { %787 = vrot.lane.b32.xlu1 %v5232_v44, %s5452_s0 }
 0x545   :  { %v788_v49 = vpop.permute.xlu1 %787 }
 0x546   :  { %v790_v50 = vmul.f32 %v5230_v19, %v788_v49  ;;  %v805_v19 = vmul.f32 %v5811_v48, %v5791_v28 }
 0x548   :  { %v796_v52 = vmul.f32 %v5813_v51, %v790_v50  ;;  %v806_v22 = vadd.f32 %v805_v19, %v804_v21 }
 0x54a   :  { %v803_v54 = vadd.f32 %v802_v53, %v796_v52 }
 0x54c   :  { %808 = vrot.lane.b32.xlu0 %v803_v54, %s5453_s5 }
 0x5be   :  { %v809_v55 = vpop.permute.xlu0 %808 }
 0x5bf   :  { %4797 = vmatmul.mubr.msk.f32.vlgmr.msra.gmra.mxu0 %vm452_vm2, %v809_v55 }
 0x5c0   :  { %4811 = vmatpush3.msra.mxu0 %v5678_v14  ;;  %4818 = vmatprep.mubr.msk.f32.mxu0 %vm5450_vm1, %v6674_v5 }
 0x5c1   :  { %4812 = vmatprep.subr.mxu0 %v6674_v5 }
 0x5c2   :  { %4813 = vmatpush3.msra.mxu0 %v5690_v20 }
 0x5c3   :  { %4814 = vmatprep.subr.mxu0 %v6674_v5 }
 0x5c4   :  { %4815 = vmatpush3.msra.mxu0 %v5699_v23 }
 0x5c5   :  { %4816 = vmatprep.subr.mxu0 %v6674_v5 }
 0x5c6   :  { %4817 = vmatpush3.msra.mxu0 %v5705_v24 }
 0x5c7   :  { %4832 = vmatprep.subr.mxu0 %v6674_v5 }
 0x67f   :  { %v878_v4 = vpop.f32.mrf.mxu0 }
 0x680   :  { %v882_v6 = vadd.f32 %v878_v4, %v550_v3 }
 0x681   :  { %v4798_v8 = vpop.f32.mrf.mxu0 }
 0x682   :  { %5233 = vtanh.f32 %v882_v6  ;;  %v4410_v11 = vmul.f32 -1.442695, %v882_v6 }
 0x684   :  { %5235 = vpow2.f32 %v4410_v11 }
 0x68f   :  { %v5234_v9 = vpop.eup %5233 }
 0x690   :  { %892 = vrot.lane.b32.xlu1 %v5234_v9, %s5452_s0 }
 0x691   :  { %v5236_v12 = vpop.eup %5235 }
 0x692   :  { %v886_v13 = vadd.f32 1.0, %v5236_v12 }
 0x694   :  { %909 = vperm.xlu1 %5215, %v180_v10   ;;  %5237 = vrcp.f32 %v886_v13 }
 0x6a1   :  { %v5238_v15 = vpop.eup %5237 }
 0x6a2   :  { %v890_v26 = vmul.f32 %v5238_v15, %v806_v22 }
 0x702   :  { %v893_v16 = vpop.permute.xlu1 %892 }
 0x703   :  { %v895_v17 = vmul.f32 %v5238_v15, %v893_v16 }
 0x705   :  { %897 = vrot.lane.b32.xlu0 %v895_v17, %s5452_s0 }
 0x709   :  { %915 = vperm.xlu0 %5216, %v574_v18  }
 0x70f   :  { %v5852_v37 = vpop.permute.xlu1 %909 }
 0x777   :  { %v898_v27 = vpop.permute.xlu0 %897 }
 0x778   :  { %v900_v30 = vadd.f32 %v898_v27, %v890_v26  ;;  %v5894_v26 = vld [vmem:[%s5519_s24 + $0x18] sm:$0xff] }
 0x77a   :  { %5239 = vtanh.f32 %v900_v30  ;;  %v920_v8 = vmul.f32 %v5852_v37, %v900_v30  ;;  %v5898_v30 = vld [vmem:[%s5519_s24 + $0x10] sm:$0xff] }
 0x784   :  { %v5854_v38 = vpop.permute.xlu0 %915 }
 0x785   :  { %v918_v28 = vmul.f32 %v5854_v38, %v803_v54 }
 0x787   :  { %v5240_v31 = vpop.eup %5239 }
 0x788   :  { %903 = vrot.lane.b32.xlu1 %v5240_v31, %s5452_s0  ;;  %v5905_v31 = vld [vmem:[%s5519_s24 + $0x8] sm:$0xff] }
 0x7fa   :  { %v904_v44 = vpop.permute.xlu1 %903 }
 0x7fb   :  { %v906_v45 = vmul.f32 %v5238_v15, %v904_v44  ;;  %v5910_v44 = vld [vmem:[%s5519_s24] sm:$0xff]  ;;  %s6712_s24 = sld [smem:[#allocation13_spill]] }
 0x7fd   :  { %v912_v47 = vmul.f32 %v5852_v37, %v906_v45  ;;  %v562_v45 = vadd.f32 %v5835_v61, %v5751_v41 }
 0x7ff   :  { %v919_v49 = vadd.f32 %v918_v28, %v912_v47 }
 0x801   :  { %924 = vrot.lane.b32.xlu0 %v919_v49, %s5453_s5 }
 0x873   :  { %v925_v32 = vpop.permute.xlu0 %924 }
 0x874   :  { %4808 = vmatmul.mubr.msk.f32.vlgmr.msra.gmra.mxu1 %vm452_vm2, %v925_v32  ;;  %v570_v32 = vadd.f32 %v5841_v2, %v5736_v29 }
 0x875   :  { %4822 = vmatpush3.msra.mxu1 %v5678_v14  ;;  %4829 = vmatprep.mubr.msk.f32.mxu1 %vm5450_vm1, %v6674_v5  ;;  %v556_v14 = vadd.f32 %v555_v59, %v5751_v41  ;;  %v921_v59 = vmul.f32 %v5854_v38, %v806_v22 }
 0x876   :  { %4823 = vmatprep.subr.mxu1 %v6674_v5 }
 0x877   :  { %4824 = vmatpush3.msra.mxu1 %v5690_v20  ;;  %v181_v20 = vld [vmem:[%s5499_s3 + $0x18] sm:$0xff]  ;;  %v5876_v9 = vadd.f32 %v921_v59, %v920_v8 }
 0x878   :  { %4825 = vmatprep.subr.mxu1 %v6674_v5  ;;  %v575_v6 = vsub.f32 1.0, %v181_v20 }
 0x879   :  { %4826 = vmatpush3.msra.mxu1 %v5699_v23 }
 0x87a   :  { %4827 = vmatprep.subr.mxu1 %v6674_v5 }
 0x87b   :  { %4828 = vmatpush3.msra.mxu1 %v5705_v24 }
 0x87c   :  { %4843 = vmatprep.subr.mxu1 %v6674_v5 }
 0x934   :  { %v994_v50 = vpop.f32.mrf.mxu1 }
 0x935   :  { %v998_v52 = vadd.f32 %v994_v50, %v556_v14 }
 0x936   :  { %v4809_v53 = vpop.f32.mrf.mxu1 }
 0x937   :  { %5241 = vtanh.f32 %v998_v52  ;;  %v4412_v55 = vmul.f32 -1.442695, %v998_v52 }
 0x939   :  { %5243 = vpow2.f32 %v4412_v55 }
 0x944   :  { %v5242_v54 = vpop.eup %5241 }
 0x945   :  { %1008 = vrot.lane.b32.xlu1 %v5242_v54, %s5452_s0 }
 0x946   :  { %v5244_v23 = vpop.eup %5243 }
 0x947   :  { %v1002_v57 = vadd.f32 1.0, %v5244_v23 }
 0x949   :  { %1025 = vperm.xlu1 %5215, %v181_v20   ;;  %5245 = vrcp.f32 %v1002_v57 }
 0x956   :  { %v5246_v3 = vpop.eup %5245 }
 0x957   :  { %v1006_v10 = vmul.f32 %v5246_v3, %v5876_v9 }
 0x9b7   :  { %v1009_v24 = vpop.permute.xlu1 %1008 }
 0x9b8   :  { %v1011_v4 = vmul.f32 %v5246_v3, %v1009_v24 }
 0x9ba   :  { %1013 = vrot.lane.b32.xlu0 %v1011_v4, %s5452_s0 }
 0x9be   :  { %1031 = vperm.xlu0 %5216, %v575_v6   ;;  %v182_v6 = vld [vmem:[%s5499_s3 + $0x20] sm:$0xff] }
 0x9c4   :  { %v5883_v15 = vpop.permute.xlu1 %1025 }
 0xa2c   :  { %v1014_v11 = vpop.permute.xlu0 %1013 }
 0xa2d   :  { %v5879_v12 = vadd.f32 %v1014_v11, %v1006_v10  ;;  %v576_v11 = vsub.f32 1.0, %v182_v6 }
 0xa2f   :  { %5247 = vtanh.f32 %v5879_v12 }
 0xa39   :  { %v5885_v16 = vpop.permute.xlu0 %1031 }
 0xa3a   :  { %v1034_v21 = vmul.f32 %v5885_v16, %v919_v49 }
 0xa3c   :  { %v5248_v13 = vpop.eup %5247 }
 0xa3d   :  { %1019 = vrot.lane.b32.xlu1 %v5248_v13, %s5452_s0  ;;  %v183_v13 = vld [vmem:[%s5499_s3 + $0x28] sm:$0xff]  ;;  %s6707_s3 = sld [smem:[#allocation12_spill]] }
 0xaaf   :  { %v1020_v17 = vpop.permute.xlu1 %1019 }
 0xab0   :  { %v1022_v18 = vmul.f32 %v5246_v3, %v1020_v17  ;;  %v1037_v17 = vmul.f32 %v5885_v16, %v5876_v9 }
 0xab2   :  { %v1028_v19 = vmul.f32 %v5883_v15, %v1022_v18  ;;  %v1036_v18 = vmul.f32 %v5883_v15, %v5879_v12 }
 0xab4   :  { %v5889_v22 = vadd.f32 %v1034_v21, %v1028_v19  ;;  %v5941_v19 = vadd.f32 %v1037_v17, %v1036_v18  ;;  %v564_v18 = vadd.f32 %v5837_v0, %v5736_v29 }
 0xab6   :  { %1040 = vrot.lane.b32.xlu0 %v5889_v22, %s5453_s5 }
 0xb28   :  { %v1041_v27 = vpop.permute.xlu0 %1040 }
 0xb29   :  { %4819 = vmatmul.mubr.msk.f32.vlgmr.msra.gmra.mxu0 %vm452_vm2, %v1041_v27 }
 0xb2a   :  { %4833 = vmatpush3.msra.mxu0 %v5894_v26  ;;  %4840 = vmatprep.mubr.msk.f32.mxu0 %vm5450_vm1, %v6674_v5 }
 0xb2b   :  { %4834 = vmatprep.subr.mxu0 %v6674_v5 }
 0xb2c   :  { %4835 = vmatpush3.msra.mxu0 %v5898_v30 }
 0xb2d   :  { %4836 = vmatprep.subr.mxu0 %v6674_v5 }
 0xb2e   :  { %4837 = vmatpush3.msra.mxu0 %v5905_v31 }
 0xb2f   :  { %4838 = vmatprep.subr.mxu0 %v6674_v5 }
 0xb30   :  { %4839 = vmatpush3.msra.mxu0 %v5910_v44 }
 0xb31   :  { %4841 = vmatmul.mubr.f32.vlgmr.msra.gmra.mxu0 %v6674_v5  ;;  %4854 = vmatprep.subr.mxu0 %v6674_v5 }
 0xb32   :  { %4855 = vmatpush3.msra.mxu0 %v5894_v26  ;;  %4862 = vmatprep.mubr.msk.f32.mxu0 %vm5450_vm1, %v6674_v5 }
 0xb33   :  { %4856 = vmatprep.subr.mxu0 %v6674_v5 }
 0xb34   :  { %4857 = vmatpush3.msra.mxu0 %v5898_v30 }
 0xb35   :  { %4858 = vmatprep.subr.mxu0 %v6674_v5 }
 0xb36   :  { %4859 = vmatpush3.msra.mxu0 %v5905_v31 }
 0xb37   :  { %4860 = vmatprep.subr.mxu0 %v6674_v5 }
 0xb38   :  { %4861 = vmatpush3.msra.mxu0 %v5910_v44 }
 0xb39   :  { %4876 = vmatprep.subr.mxu0 %v6674_v5 }
 0xbe9   :  { %v1110_v47 = vpop.f32.mrf.mxu0 }
 0xbea   :  { %v1114_v28 = vadd.f32 %v1110_v47, %v562_v45 }
 0xbeb   :  { %v4820_v49 = vpop.f32.mrf.mxu0 }
 0xbec   :  { %5249 = vtanh.f32 %v1114_v28  ;;  %v4414_v20 = vmul.f32 -1.442695, %v1114_v28 }
 0xbf1   :  { %v1334_v14 = vpop.f32.mrf.mxu0 }
 0xbf2   :  { %v1338_v50 = vadd.f32 %v1334_v14, %v570_v32  ;;  %v577_v14 = vsub.f32 1.0, %v183_v13 }
 0xbf3   :  { %v4842_v52 = vpop.f32.mrf.mxu0 }
 0xbf4   :  { %5251 = vtanh.f32 %v1338_v50  ;;  %v4417_v61 = vmul.f32 -1.442695, %v1338_v50 }
 0xbf5   :  { %5253 = vpow2.f32 %v4414_v20 }
 0xbf6   :  { %5255 = vpow2.f32 %v4417_v61 }
 0xbf9   :  { %v5250_v53 = vpop.eup %5249 }
 0xbfa   :  { %1124 = vrot.lane.b32.xlu1 %v5250_v53, %s5452_s0 }
 0xc01   :  { %v5252_v54 = vpop.eup %5251 }
 0xc02   :  { %1348 = vrot.lane.b32.xlu0 %v5252_v54, %s5452_s0  ;;  %v5254_v55 = vpop.eup %5253 }
 0xc03   :  { %v1118_v23 = vadd.f32 1.0, %v5254_v55  ;;  %v5256_v2 = vpop.eup %5255 }
 0xc04   :  { %v1342_v57 = vadd.f32 1.0, %v5256_v2 }
 0xc05   :  { %5257 = vrcp.f32 %v1118_v23 }
 0xc06   :  { %5259 = vrcp.f32 %v1342_v57 }
 0xc12   :  { %v5258_v3 = vpop.eup %5257 }
 0xc13   :  { %v5260_v59 = vpop.eup %5259  ;;  %v1122_v21 = vmul.f32 %v5258_v3, %v5941_v19 }
 0xc14   :  { %v1346_v47 = vmul.f32 0.0, %v5260_v59 }
 0xc6c   :  { %v1125_v24 = vpop.permute.xlu1 %1124 }
 0xc6d   :  { %v1127_v4 = vmul.f32 %v5258_v3, %v1125_v24 }
 0xc6f   :  { %1129 = vrot.lane.b32.xlu1 %v1127_v4, %s5452_s0 }
 0xc73   :  { %1141 = vperm.xlu1 %5215, %v182_v6  }
 0xc74   :  { %v1349_v8 = vpop.permute.xlu0 %1348 }
 0xc75   :  { %v1351_v10 = vmul.f32 %v5260_v59, %v1349_v8 }
 0xc77   :  { %1353 = vrot.lane.b32.xlu0 %v1351_v10, %s5452_s0  ;;  %v568_v10 = vadd.f32 %v5839_v1, %v5751_v41 }
 0xc7b   :  { %1147 = vperm.xlu0 %5216, %v576_v11  }
 0xc7f   :  { %1257 = vperm.xlu0 %5216, %v183_v13  }
 0xce1   :  { %v1130_v27 = vpop.permute.xlu1 %1129 }
 0xce2   :  { %v5944_v45 = vadd.f32 %v1130_v27, %v1122_v21 }
 0xce4   :  { %5261 = vtanh.f32 %v5944_v45 }
 0xce9   :  { %v1354_v28 = vpop.permute.xlu0 %1353 }
 0xcea   :  { %v1356_v49 = vadd.f32 %v1354_v28, %v1346_v47 }
 0xcec   :  { %5263 = vtanh.f32 %v1356_v49 }
 0xcee   :  { %v5949_v12 = vpop.permute.xlu1 %1141 }
 0xcf1   :  { %v5262_v32 = vpop.eup %5261 }
 0xcf2   :  { %1135 = vrot.lane.b32.xlu1 %v5262_v32, %s5452_s0 }
 0xcf6   :  { %1263 = vperm.xlu1 %5215, %v577_v14   ;;  %v5951_v50 = vpop.permute.xlu0 %1147 }
 0xcf7   :  { %v1150_v54 = vmul.f32 %v5951_v50, %v5889_v22 }
 0xcf9   :  { %v5264_v9 = vpop.eup %5263 }
 0xcfa   :  { %1359 = vrot.lane.b32.xlu0 %v5264_v9, %s5452_s0  ;;  %v5956_v61 = vpop.permute.xlu0 %1257 }
 0xcfb   :  { %v1366_v24 = vmul.f32 %v1356_v49, %v5956_v61 }
 0xd64   :  { %v1136_v52 = vpop.permute.xlu1 %1135 }
 0xd65   :  { %v1138_v53 = vmul.f32 %v5258_v3, %v1136_v52 }
 0xd67   :  { %v1144_v20 = vmul.f32 %v5949_v12, %v1138_v53 }
 0xd69   :  { %v5958_v55 = vadd.f32 %v1150_v54, %v1144_v20 }
 0xd6b   :  { %1156 = vrot.lane.b32.xlu1 %v5958_v55, %s5453_s5 }
 0xd6c   :  { %v1360_v23 = vpop.permute.xlu0 %1359 }
 0xd6d   :  { %v1362_v2 = vmul.f32 %v5260_v59, %v1360_v23 }
 0xd6f   :  { %v1363_v3 = vmul.f32 %v1362_v2, %v5956_v61 }
 0xd71   :  { %v5962_v57 = vpop.permute.xlu1 %1263 }
 0xd72   :  { %v1364_v4 = vmul.f32 0.0, %v5962_v57 }
 0xd74   :  { %v1365_v22 = vadd.f32 %v1364_v4, %v1363_v3  ;;  %v5967_v6 = vadd.f32 %v1366_v24, %v1364_v4 }
 0xd76   :  { %1369 = vrot.lane.b32.xlu0 %v1365_v22, %s5453_s5  ;;  %v1469_v2 = vmul.f32 %v1365_v22, %v5951_v50  ;;  %v558_v22 = vadd.f32 %v5833_v60, %v5736_v29  ;;  %v1472_v60 = vmul.f32 %v5967_v6, %v5951_v50 }
 0xddd   :  { %v1157_v8 = vpop.permute.xlu1 %1156 }
 0xdde   :  { %4830 = vmatmul.mubr.msk.f32.vlgmr.msra.gmra.mxu1 %vm452_vm2, %v1157_v8 }
 0xddf   :  { %4844 = vmatpush3.msra.mxu1 %v5894_v26  ;;  %4851 = vmatprep.mubr.msk.f32.mxu1 %vm5450_vm1, %v6674_v5 }
 0xde0   :  { %4845 = vmatprep.subr.mxu1 %v6674_v5 }
 0xde1   :  { %4846 = vmatpush3.msra.mxu1 %v5898_v30 }
 0xde2   :  { %4847 = vmatprep.subr.mxu1 %v6674_v5 }
 0xde3   :  { %4848 = vmatpush3.msra.mxu1 %v5905_v31 }
 0xde4   :  { %4849 = vmatprep.subr.mxu1 %v6674_v5 }
 0xde5   :  { %4850 = vmatpush3.msra.mxu1 %v5910_v44 }
 0xde6   :  { %4865 = vmatprep.subr.mxu1 %v6674_v5 }
 0xde8   :  { %v1370_v59 = vpop.permute.xlu0 %1369 }
 0xde9   :  { %4852 = vmatmul.mubr.msk.f32.vlgmr.msra.gmra.mxu1 %vm452_vm2, %v1370_v59 }
 0xdea   :  { %4866 = vmatpush3.msra.mxu1 %v5894_v26  ;;  %4873 = vmatprep.mubr.msk.f32.mxu1 %vm5450_vm1, %v6674_v5 }
 0xdeb   :  { %4867 = vmatprep.subr.mxu1 %v6674_v5 }
 0xdec   :  { %4868 = vmatpush3.msra.mxu1 %v5898_v30 }
 0xded   :  { %4869 = vmatprep.subr.mxu1 %v6674_v5 }
 0xdee   :  { %4870 = vmatpush3.msra.mxu1 %v5905_v31 }
 0xdef   :  { %4871 = vmatprep.subr.mxu1 %v6674_v5 }
 0xdf0   :  { %4872 = vmatpush3.msra.mxu1 %v5910_v44 }
 0xdf1   :  { %4887 = vmatprep.subr.mxu1 %v6674_v5 }
 0xe9e   :  { %v1226_v11 = vpop.f32.mrf.mxu1 }
 0xe9f   :  { %v5994_v13 = vadd.f32 %v1226_v11, %v568_v10 }
 0xea0   :  { %v4831_v17 = vpop.f32.mrf.mxu1 }
 0xea9   :  { %v1439_v21 = vpop.f32.mrf.mxu1 }
 0xeaa   :  { %v1443_v27 = vadd.f32 %v1439_v21, %v564_v18 }
 0xeab   :  { %v4853_v47 = vpop.f32.mrf.mxu1 }
 0xeac   :  { %5265 = vtanh.f32 %v1443_v27  ;;  %v4419_v49 = vmul.f32 -1.442695, %v1443_v27 }
 0xeae   :  { %5267 = vpow2.f32 %v4419_v49 }
 0xeb9   :  { %v5266_v28 = vpop.eup %5265 }
 0xeba   :  { %1453 = vrot.lane.b32.xlu1 %v5266_v28, %s5452_s0 }
 0xebb   :  { %v5268_v32 = vpop.eup %5267 }
 0xebc   :  { %v1447_v14 = vadd.f32 1.0, %v5268_v32 }
 0xebe   :  { %5269 = vrcp.f32 %v1447_v14 }
 0xecb   :  { %v5270_v41 = vpop.eup %5269 }
 0xecc   :  { %v1451_v52 = vmul.f32 %v5270_v41, %v5967_v6  ;;  %v552_v6 = vadd.f32 %v5831_v58, %v5736_v29 }
 0xf2c   :  { %v1454_v1 = vpop.permute.xlu1 %1453 }
 0xf2d   :  { %v1456_v9 = vmul.f32 %v5270_v41, %v1454_v1 }
 0xf2f   :  { %1458 = vrot.lane.b32.xlu0 %v1456_v9, %s5452_s0 }
 0xfa1   :  { %v1459_v0 = vpop.permute.xlu0 %1458 }
 0xfa2   :  { %v1461_v53 = vadd.f32 %v1459_v0, %v1451_v52 }
 0xfa4   :  { %5271 = vtanh.f32 %v1461_v53  ;;  %v1471_v49 = vmul.f32 %v1461_v53, %v5949_v12 }
 0xfa6   :  { %v1473_v32 = vadd.f32 %v1472_v60, %v1471_v49 }
 0xfa8   :  { %v1578_v58 = vmul.f32 %v1473_v32, %v5885_v16 }
 0xfb1   :  { %v5272_v54 = vpop.eup %5271 }
 0xfb2   :  { %1464 = vrot.lane.b32.xlu1 %v5272_v54, %s5452_s0 }
0x1024   :  { %v1465_v20 = vpop.permute.xlu1 %1464 }
0x1025   :  { %v1467_v23 = vmul.f32 %v5270_v41, %v1465_v20 }
0x1027   :  { %v1468_v24 = vmul.f32 %v1467_v23, %v5949_v12 }
0x1029   :  { %v1470_v3 = vadd.f32 %v1469_v2, %v1468_v24 }
0x102b   :  { %1475 = vrot.lane.b32.xlu0 %v1470_v3, %s5453_s5  ;;  %v1575_v20 = vmul.f32 %v1470_v3, %v5885_v16  ;;  %v546_v16 = vadd.f32 %v5829_v56, %v5736_v29 }
0x109d   :  { %v1476_v4 = vpop.permute.xlu0 %1475 }
0x109e   :  { %4863 = vmatmul.mubr.msk.f32.vlgmr.msra.gmra.mxu0 %vm452_vm2, %v1476_v4 }
0x109f   :  { %4877 = vmatpush3.msra.mxu0 %v5894_v26  ;;  %4884 = vmatprep.mubr.msk.f32.mxu0 %vm5450_vm1, %v6674_v5 }
0x10a0   :  { %4878 = vmatprep.subr.mxu0 %v6674_v5 }
0x10a1   :  { %4879 = vmatpush3.msra.mxu0 %v5898_v30 }
0x10a2   :  { %4880 = vmatprep.subr.mxu0 %v6674_v5 }
0x10a3   :  { %4881 = vmatpush3.msra.mxu0 %v5905_v31 }
0x10a4   :  { %4882 = vmatprep.subr.mxu0 %v6674_v5 }
0x10a5   :  { %4883 = vmatpush3.msra.mxu0 %v5910_v44 }
0x10a6   :  { %4898 = vmatprep.subr.mxu0 %v6674_v5 }
0x115e   :  { %v1545_v8 = vpop.f32.mrf.mxu0 }
0x115f   :  { %v1549_v59 = vadd.f32 %v1545_v8, %v558_v22 }
0x1160   :  { %v4864_v10 = vpop.f32.mrf.mxu0 }
0x1161   :  { %5273 = vtanh.f32 %v1549_v59  ;;  %v4421_v17 = vmul.f32 -1.442695, %v1549_v59 }
0x1163   :  { %5275 = vpow2.f32 %v4421_v17 }
0x116e   :  { %v5274_v11 = vpop.eup %5273 }
0x116f   :  { %1559 = vrot.lane.b32.xlu1 %v5274_v11, %s5452_s0 }
0x1170   :  { %v5276_v18 = vpop.eup %5275 }
0x1171   :  { %v1553_v21 = vadd.f32 1.0, %v5276_v18 }
0x1173   :  { %5277 = vrcp.f32 %v1553_v21 }
0x1180   :  { %v5278_v27 = vpop.eup %5277 }
0x1181   :  { %v1557_v14 = vmul.f32 %v5278_v27, %v1473_v32 }
0x11e1   :  { %v1560_v47 = vpop.permute.xlu1 %1559 }
0x11e2   :  { %v1562_v28 = vmul.f32 %v5278_v27, %v1560_v47 }
0x11e4   :  { %1564 = vrot.lane.b32.xlu0 %v1562_v28, %s5452_s0 }
0x1256   :  { %v1565_v41 = vpop.permute.xlu0 %1564 }
0x1257   :  { %v1567_v1 = vadd.f32 %v1565_v41, %v1557_v14 }
0x1259   :  { %5279 = vtanh.f32 %v1567_v1 }
0x1266   :  { %v5280_v9 = vpop.eup %5279 }
0x1267   :  { %1570 = vrot.lane.b32.xlu1 %v5280_v9, %s5452_s0 }
0x12d9   :  { %v1571_v52 = vpop.permute.xlu1 %1570 }
0x12da   :  { %v1573_v0 = vmul.f32 %v5278_v27, %v1571_v52 }
0x12dc   :  { %v1574_v54 = vmul.f32 %v1573_v0, %v5883_v15 }
0x12de   :  { %v1576_v23 = vadd.f32 %v1575_v20, %v1574_v54 }
0x12e0   :  { %1581 = vrot.lane.b32.xlu0 %v1576_v23, %s5453_s5  ;;  %v1681_v49 = vmul.f32 %v1576_v23, %v5854_v38 }
0x1352   :  { %v1582_v53 = vpop.permute.xlu0 %1581 }
0x1353   :  { %4874 = vmatmul.mubr.msk.f32.vlgmr.msra.gmra.mxu1 %vm452_vm2, %v1582_v53 }
0x1354   :  { %4888 = vmatpush3.msra.mxu1 %v5894_v26  ;;  %4895 = vmatprep.mubr.msk.f32.mxu1 %vm5450_vm1, %v6674_v5 }
0x1355   :  { %4889 = vmatprep.subr.mxu1 %v6674_v5 }
0x1356   :  { %4890 = vmatpush3.msra.mxu1 %v5898_v30 }
0x1357   :  { %4891 = vmatprep.subr.mxu1 %v6674_v5 }
0x1358   :  { %4892 = vmatpush3.msra.mxu1 %v5905_v31 }
0x1359   :  { %4893 = vmatprep.subr.mxu1 %v6674_v5 }
0x135a   :  { %4894 = vmatpush3.msra.mxu1 %v5910_v44  ;;  %v1577_v44 = vmul.f32 %v1567_v1, %v5883_v15 }
0x135c   :  { %v1579_v10 = vadd.f32 %v1578_v58, %v1577_v44 }
0x135e   :  { %v1684_v53 = vmul.f32 %v1579_v10, %v5854_v38 }
0x1413   :  { %v1651_v2 = vpop.f32.mrf.mxu1 }
0x1414   :  { %v1655_v26 = vadd.f32 %v1651_v2, %v552_v6 }
0x1415   :  { %v4875_v24 = vpop.f32.mrf.mxu1 }
0x1416   :  { %5281 = vtanh.f32 %v1655_v26  ;;  %v4423_v4 = vmul.f32 -1.442695, %v1655_v26 }
0x1418   :  { %5283 = vpow2.f32 %v4423_v4 }
0x1423   :  { %v5282_v3 = vpop.eup %5281 }
0x1424   :  { %1665 = vrot.lane.b32.xlu1 %v5282_v3, %s5452_s0  ;;  %v2105_v3 = vld [vmem:[%s5554_s12 + $0x18] sm:$0xff] }
0x1425   :  { %v5284_v30 = vpop.eup %5283  ;;  %4909 = vmatprep.subr.mxu1 %v2105_v3 }
0x1426   :  { %v1659_v22 = vadd.f32 1.0, %v5284_v30 }
0x1428   :  { %5285 = vrcp.f32 %v1659_v22 }
0x1435   :  { %v5286_v31 = vpop.eup %5285 }
0x1436   :  { %v1663_v11 = vmul.f32 %v5286_v31, %v1579_v10 }
0x1496   :  { %v1666_v8 = vpop.permute.xlu1 %1665 }
0x1497   :  { %v1668_v59 = vmul.f32 %v5286_v31, %v1666_v8 }
0x1499   :  { %1670 = vrot.lane.b32.xlu0 %v1668_v59, %s5452_s0 }
0x150b   :  { %v1671_v17 = vpop.permute.xlu0 %1670 }
0x150c   :  { %v1673_v18 = vadd.f32 %v1671_v17, %v1663_v11 }
0x150e   :  { %5287 = vtanh.f32 %v1673_v18  ;;  %v1683_v56 = vmul.f32 %v1673_v18, %v5852_v37  ;;  %v1152_v18 = vmul.f32 %v5949_v12, %v5944_v45  ;;  %v2102_v45 = vld [vmem:[%s5554_s12] sm:$0xff] }
0x1510   :  { %v6056_v6 = vadd.f32 %v1684_v53, %v1683_v56 }
0x151b   :  { %v5288_v21 = vpop.eup %5287 }
0x151c   :  { %1676 = vrot.lane.b32.xlu1 %v5288_v21, %s5452_s0 }
0x158e   :  { %v1677_v27 = vpop.permute.xlu1 %1676 }
0x158f   :  { %v1679_v47 = vmul.f32 %v5286_v31, %v1677_v27  ;;  %v4391_v27 = vld [vmem:[%s5489_s25] ss:$0 sm:$0xff]  ;;  %s6706_s25 = sld [smem:[#allocation6_spill]] }
0x1590   :  { %v6096_v12 = vadd.f32 %v4391_v27, %v5747_v39 }
0x1591   :  { %v1680_v28 = vmul.f32 %v1679_v47, %v5852_v37  ;;  %v4416_v37 = vmul.f32 -1.442695, %v5994_v13 }
0x1593   :  { %v1682_v60 = vadd.f32 %v1681_v49, %v1680_v28  ;;  %v6084_v28 = vadd.f32 %v4391_v27, %v5741_v34  ;;  %v6093_v34 = vadd.f32 %v5739_v33, %v4391_v27  ;;  %v6113_v33 = vadd.f32 %v5749_v40, %v4391_v27 }
0x1594   :  { %v540_v40 = vadd.f32 %v5784_v7, %v5736_v29  ;;  %v1790_v7 = vmul.f32 %v6056_v6, %v5811_v48 }
0x1595   :  { %1687 = vrot.lane.b32.xlu0 %v1682_v60, %s5453_s5  ;;  %v1787_v44 = vmul.f32 %v1682_v60, %v5811_v48  ;;  %v1266_v48 = vmul.f32 %v5962_v57, %v5958_v55  ;;  %v208_v55 = vld [vmem:[%s5524_s30 + $0x38] sm:$0xff]  ;;  %v214_v57 = vld [vmem:[%s5529_s6 + $0x28] sm:$0xff] }
0x1607   :  { %v1688_v15 = vpop.permute.xlu0 %1687 }
0x1608   :  { %4885 = vmatmul.mubr.msk.f32.vlgmr.msra.gmra.mxu0 %vm452_vm2, %v1688_v15  ;;  %v2104_v15 = vld [vmem:[%s5554_s12 + $0x10] sm:$0xff] }
0x1609   :  { %4906 = vmatprep.mubr.msk.f32.mxu0 %vm5450_vm1, %v6674_v5 }
0x16c8   :  { %v1757_v32 = vpop.f32.mrf.mxu0 }
0x16c9   :  { %v1761_v14 = vadd.f32 %v1757_v32, %v546_v16  ;;  %v6106_v32 = vadd.f32 %v4391_v27, %v5753_v42 }
0x16ca   :  { %v4886_v41 = vpop.f32.mrf.mxu0 }
0x16cb   :  { %5289 = vtanh.f32 %v1761_v14  ;;  %v4425_v9 = vmul.f32 -1.442695, %v1761_v14  ;;  %v6116_v14 = vadd.f32 %v4391_v27, %v5758_v46 }
0x16cd   :  { %5291 = vpow2.f32 %v4425_v9 }
0x16d8   :  { %v5290_v1 = vpop.eup %5289 }
0x16d9   :  { %1771 = vrot.lane.b32.xlu1 %v5290_v1, %s5452_s0 }
0x16da   :  { %v5292_v52 = vpop.eup %5291 }
0x16db   :  { %v1765_v0 = vadd.f32 1.0, %v5292_v52 }
0x16dd   :  { %5293 = vrcp.f32 %v1765_v0 }
0x16ea   :  { %v5294_v54 = vpop.eup %5293 }
0x16eb   :  { %v1769_v2 = vmul.f32 %v5294_v54, %v6056_v6 }
0x174b   :  { %v1772_v20 = vpop.permute.xlu1 %1771 }
0x174c   :  { %v1774_v23 = vmul.f32 %v5294_v54, %v1772_v20 }
0x174e   :  { %1776 = vrot.lane.b32.xlu0 %v1774_v23, %s5452_s0 }
0x17c0   :  { %v1777_v26 = vpop.permute.xlu0 %1776 }
0x17c1   :  { %v6059_v24 = vadd.f32 %v1777_v26, %v1769_v2 }
0x17c3   :  { %5295 = vtanh.f32 %v6059_v24  ;;  %v1789_v29 = vmul.f32 %v6059_v24, %v5813_v51 }
0x17c4   :  { %5297 = vtanh.f32 %v5994_v13  ;;  %v1153_v13 = vmul.f32 %v5951_v50, %v5941_v19  ;;  %v2103_v19 = vld [vmem:[%s5554_s12 + $0x8] sm:$0xff]  ;;  %v6103_v50 = vadd.f32 %v5745_v36, %v4391_v27  ;;  %v6124_v36 = vadd.f32 %v5755_v43, %v4391_v27  ;;  %s6715_s12 = sld [smem:[#allocation14_spill]] }
0x17c5   :  { %5299 = vpow2.f32 %v4416_v37  ;;  %v1791_v23 = vadd.f32 %v1790_v7, %v1789_v29  ;;  %v6175_v29 = vand.u32 127, %v442_v25 }
0x17c6   :  { %v1154_v21 = vadd.f32 %v1153_v13, %v1152_v18 }
0x17d0   :  { %v5296_v4 = vpop.eup %5295 }
0x17d1   :  { %1782 = vrot.lane.b32.xlu1 %v5296_v4, %s5452_s0  ;;  %v5298_v30 = vpop.eup %5297 }
0x17d2   :  { %v5300_v38 = vpop.eup %5299 }
0x17d3   :  { %v1234_v22 = vadd.f32 1.0, %v5300_v38 }
0x17d5   :  { %1240 = vrot.lane.b32.xlu1 %v5298_v30, %s5452_s0  ;;  %5301 = vrcp.f32 %v1234_v22 }
0x17e2   :  { %v6069_v58 = vpop.eup %5301 }
0x17e3   :  { %v1238_v47 = vmul.f32 %v6069_v58, %v1154_v21 }
0x1843   :  { %v1783_v31 = vpop.permute.xlu1 %1782 }
0x1844   :  { %v1785_v8 = vmul.f32 %v5294_v54, %v1783_v31 }
0x1846   :  { %v1786_v59 = vmul.f32 %v1785_v8, %v5813_v51 }
0x1847   :  { %v1241_v10 = vpop.permute.xlu1 %1240 }
0x1848   :  { %v1243_v11 = vmul.f32 %v6069_v58, %v1241_v10  ;;  %v6072_v17 = vadd.f32 %v1787_v44, %v1786_v59  ;;  %v2019_v10 = vld [vmem:[%s6700_s9 + $0x8] sm:$0xff] }
0x184a   :  { %1245 = vrot.lane.b32.xlu1 %v1243_v11, %s5452_s0  ;;  %1793 = vrot.lane.b32.xlu0 %v6072_v17, %s5453_s5  ;;  %v1893_v6 = vmul.f32 %v6072_v17, %v5768_v63  ;;  %v216_v63 = vld [vmem:[%s5529_s6 + $0x38] sm:$0xff] }
0x18bc   :  { %v1246_v49 = vpop.permute.xlu1 %1245  ;;  %v1794_v60 = vpop.permute.xlu0 %1793 }
0x18bd   :  { %v1248_v16 = vadd.f32 %v1246_v49, %v1238_v47  ;;  %4896 = vmatmul.mubr.msk.f32.vlgmr.msra.gmra.mxu1 %vm452_vm2, %v1794_v60  ;;  %v2018_v49 = vld [vmem:[%s6700_s9] sm:$0xff] }
0x18be   :  { %4910 = vmatpush3.msra.mxu1 %v2105_v3  ;;  %4917 = vmatprep.mubr.msk.f32.mxu1 %vm452_vm2, %v6084_v28 }
0x18bf   :  { %5303 = vtanh.f32 %v1248_v16  ;;  %4911 = vmatprep.subr.mxu1 %v2104_v15  ;;  %v201_v16 = vld [vmem:[%s5524_s30] sm:$0xff] }
0x18c0   :  { %4912 = vmatpush3.msra.mxu1 %v2104_v15 }
0x18c1   :  { %4913 = vmatprep.subr.mxu1 %v2103_v19 }
0x18c2   :  { %4914 = vmatpush3.msra.mxu1 %v2103_v19  ;;  %v202_v19 = vld [vmem:[%s5524_s30 + $0x8] sm:$0xff] }
0x18c3   :  { %4915 = vmatprep.subr.mxu1 %v2102_v45 }
0x18c4   :  { %4916 = vmatpush3.msra.mxu1 %v2102_v45  ;;  %v203_v45 = vld [vmem:[%s5524_s30 + $0x10] sm:$0xff] }
0x18c5   :  { %4918 = vmatmul.mubr.msk.f32.vlgmr.msra.gmra.mxu1 %vm452_vm2, %v6093_v34 }
0x18c6   :  { %4920 = vmatprep.mubr.msk.f32.mxu1 %vm452_vm2, %v6096_v12 }
0x18c9   :  { %4921 = vmatmul.mubr.msk.f32.gmra.mxu1 %vm452_vm2, %v6103_v50 }
0x18ca   :  { %4923 = vmatprep.mubr.msk.f32.mxu1 %vm452_vm2, %v6106_v32 }
0x18cc   :  { %v5304_v39 = vpop.eup %5303 }
0x18cd   :  { %4924 = vmatmul.mubr.msk.f32.gmra.mxu1 %vm452_vm2, %v6113_v33  ;;  %1251 = vrot.lane.b32.xlu1 %v5304_v39, %s5452_s0  ;;  %v204_v39 = vld [vmem:[%s5524_s30 + $0x18] sm:$0xff] }
0x18ce   :  { %4926 = vmatprep.mubr.msk.f32.mxu1 %vm452_vm2, %v6116_v14 }
0x18d1   :  { %4927 = vmatmul.mubr.msk.f32.gmra.mxu1 %vm452_vm2, %v6124_v36 }
0x193f   :  { %v1252_v3 = vpop.permute.xlu1 %1251 }
0x1940   :  { %v1254_v4 = vmul.f32 %v6069_v58, %v1252_v3  ;;  %v2020_v58 = vld [vmem:[%s6700_s9 + $0x10] sm:$0xff] }
0x1942   :  { %v1260_v37 = vmul.f32 %v5956_v61, %v1254_v4 }
0x1944   :  { %v1267_v38 = vadd.f32 %v1266_v48, %v1260_v37 }
0x197d   :  { %v1863_v42 = vpop.f32.mrf.mxu1 }
0x197e   :  { %v1867_v46 = vadd.f32 %v1863_v42, %v540_v40  ;;  %v205_v40 = vld [vmem:[%s5524_s30 + $0x20] sm:$0xff]  ;;  %v206_v42 = vld [vmem:[%s5524_s30 + $0x28] sm:$0xff] }
0x197f   :  { %v4897_v41 = vpop.f32.mrf.mxu1 }
0x1980   :  { %5305 = vtanh.f32 %v1867_v46  ;;  %v4427_v9 = vmul.f32 -1.442695, %v1867_v46  ;;  %v207_v46 = vld [vmem:[%s5524_s30 + $0x30] sm:$0xff]  ;;  %v209_v41 = vld [vmem:[%s5529_s6] sm:$0xff]  ;;  %s6713_s30 = sld [smem:[#allocation17_spill]] }
0x1982   :  { %5307 = vpow2.f32 %v4427_v9  ;;  %v211_v9 = vld [vmem:[%s5529_s6 + $0x10] sm:$0xff] }
0x198d   :  { %v5306_v1 = vpop.eup %5305 }
0x198e   :  { %1877 = vrot.lane.b32.xlu0 %v5306_v1, %s5452_s0  ;;  %v210_v1 = vld [vmem:[%s5529_s6 + $0x8] sm:$0xff] }
0x198f   :  { %v5308_v52 = vpop.eup %5307 }
0x1990   :  { %v1871_v0 = vadd.f32 1.0, %v5308_v52  ;;  %v212_v52 = vld [vmem:[%s5529_s6 + $0x18] sm:$0xff] }
0x1992   :  { %5309 = vrcp.f32 %v1871_v0  ;;  %v4389_v0 = vld [vmem:[%s6701_s17] ss:$0 sm:$0xff] }
0x199f   :  { %v5310_v43 = vpop.eup %5309 }
0x19a0   :  { %v1875_v56 = vmul.f32 %v5310_v43, %v1791_v23 }
0x1a00   :  { %v1878_v54 = vpop.permute.xlu0 %1877 }
0x1a01   :  { %v1880_v20 = vmul.f32 %v5310_v43, %v1878_v54 }
0x1a03   :  { %1882 = vrot.lane.b32.xlu0 %v1880_v20, %s5452_s0 }
0x1a75   :  { %v1883_v53 = vpop.permute.xlu0 %1882 }
0x1a76   :  { %v1885_v2 = vadd.f32 %v1883_v53, %v1875_v56 }
0x1a78   :  { %5311 = vtanh.f32 %v1885_v2 }
0x1a85   :  { %v5312_v26 = vpop.eup %5311 }
0x1a86   :  { %1888 = vrot.lane.b32.xlu0 %v5312_v26, %s5452_s0 }
0x1af8   :  { %v1889_v30 = vpop.permute.xlu0 %1888 }
0x1af9   :  { %v1891_v51 = vmul.f32 %v5310_v43, %v1889_v30  ;;  %v303_v43 = vadd.f32 %v4389_v0, %v5743_v35  ;;  %v4444_v30 = vld [vmem:[%s6702_s21] ss:$0 sm:$0xff] }
0x1afb   :  { %v1892_v24 = vmul.f32 %v1891_v51, %v5766_v62  ;;  %v2021_v62 = vld [vmem:[%s6700_s9 + $0x18] sm:$0xff] }
0x1afc   :  { %4899 = vmatpush3.msra.mxu0 %v2021_v62 }
0x1afd   :  { %v1894_v22 = vadd.f32 %v1893_v6, %v1892_v24  ;;  %4900 = vmatprep.subr.mxu0 %v6674_v5  ;;  %v213_v24 = vld [vmem:[%s5529_s6 + $0x20] sm:$0xff] }
0x1afe   :  { %4901 = vmatpush3.msra.mxu0 %v2020_v58 }
0x1aff   :  { %v1895_v31 = vadd.f32 %v1894_v22, %v1267_v38  ;;  %4902 = vmatprep.subr.mxu0 %v6674_v5 }
0x1b00   :  { %4903 = vmatpush3.msra.mxu0 %v2019_v10 }
0x1b01   :  { %v1896_v8 = vmul.f32 0.5, %v1895_v31  ;;  %4904 = vmatprep.subr.mxu0 %v6674_v5  ;;  %v215_v31 = vld [vmem:[%s5529_s6 + $0x30] sm:$0xff]  ;;  %s6714_s6 = sld [smem:[#allocation15_spill]] }
0x1b02   :  { %4905 = vmatpush3.msra.mxu0 %v2018_v49 }
0x1b03   :  { %v1897_v59 = vmul.f32 %v1896_v8, %v1896_v8 }
0x1b05   :  { %1899 = vrot.lane.b32.xlu1 %v1897_v59, %s5453_s5 }
0x1b77   :  { %v1900_v61 = vpop.permute.xlu1 %1899 }
0x1b78   :  { %v1902_v44 = vsel %vm452_vm2, %v1900_v61, 0.0 }
0x1b79   :  { %1903 = vadd.xlane.f32.xlu0 %v1902_v44 }
0x1b8f   :  { %1944 = vperm.xlu0 %5216, %v208_v55  }
0x1b93   :  { %1986 = vperm.xlu0 %5216, %v214_v57  }
0x1b97   :  { %1992 = vperm.xlu0 %5216, %v216_v63  }
0x1c02   :  { %v1904_v11 = vpop.xlane.xlu0 %1903 }
0x1c03   :  { %5313 = vrsqrt.f32 %v1904_v11  ;;  %vm1907_vm3 = vcmp.eq.f32.partialorder %v1904_v11, inf  ;;  %v1910_v18 = vand.u32 2147483648, %v1904_v11  ;;  %vm1909_vm4 = vcmp.eq.f32.partialorder %v1904_v11, 0.0 }
0x1c0a   :  { %v1945_v59 = vpop.permute.xlu0 %1944 }
0x1c0b   :  { %vm1953_vm13 = vcmp.eq.s32.totalorder %v1945_v59, %v6175_v29 }
0x1c0c   :  { %v6237_v55 = vsel %vm1953_vm13, 1.0, %v6674_v5 }
0x1c10   :  { %v5314_v17 = vpop.eup %5313 }
0x1c11   :  { %v1906_v13 = vmul.f32 %v5314_v17, %v1904_v11 }
0x1c13   :  { %v1908_v21 = vsel %vm1907_vm3, %v1904_v11, %v1906_v13  ;;  %v1987_v13 = vpop.permute.xlu0 %1986 }
0x1c14   :  { %v1911_v27 = vsel %vm1909_vm4, %v1910_v18, %v1908_v21  ;;  %vm1999_vm4 = vcmp.eq.s32.totalorder %v1987_v13, %v6175_v29 }
0x1c15   :  { %v1912_v47 = vmax.f32 %v1911_v27, 1e-12 }
0x1c17   :  { %5315 = vrcp.f32 %v1912_v47  ;;  %v1993_v21 = vpop.permute.xlu0 %1992  ;;  %v6268_v47 = vsel %vm1999_vm4, 1.0, %v6674_v5 }
0x1c18   :  { %6703 = vst [vmem:[#allocation26_spill] sm:$0xff] %v6268_v47 }
0x1c24   :  { %v5316_v60 = vpop.eup %5315 }
0x1c25   :  { %v1914_v15 = vmul.f32 %v5316_v60, %v1896_v8 }
0x1c27   :  { %1916 = vrot.lane.b32.xlu1 %v1914_v15, %s5453_s5 }
0x1c2b   :  { %1923 = vperm.xlu1 %5215, %v201_v16  }
0x1c2f   :  { %1926 = vperm.xlu1 %5215, %v202_v19  }
0x1c33   :  { %1929 = vperm.xlu1 %5215, %v203_v45  }
0x1c37   :  { %1932 = vperm.xlu1 %5215, %v204_v39  }
0x1c3b   :  { %1935 = vperm.xlu1 %5215, %v205_v40  }
0x1c3f   :  { %1938 = vperm.xlu1 %5215, %v206_v42  }
0x1c43   :  { %1941 = vperm.xlu1 %5215, %v207_v46  }
0x1c47   :  { %1971 = vperm.xlu1 %5215, %v209_v41  }
0x1c4b   :  { %1974 = vperm.xlu1 %5215, %v210_v1   ;;  %v217_v1 = vld [vmem:[%s6706_s25] sm:$0xff] }
0x1c4f   :  { %1977 = vperm.xlu1 %5215, %v211_v9   ;;  %v4919_v9 = vpop.f32.mrf.mxu1 }
0x1c53   :  { %1980 = vperm.xlu1 %5215, %v212_v52   ;;  %v2203_v52 = vpop.f32.mrf.mxu1 }
0x1c55   :  { %v4922_v0 = vpop.f32.mrf.mxu1 }
0x1c99   :  { %v1917_v54 = vpop.permute.xlu1 %1916 }
0x1c9a   :  { %v6170_v20 = vadd.f32 %v1917_v54, %v303_v43  ;;  %v2213_v43 = vpop.f32.mrf.mxu1 }
0x1c9c   :  { %4907 = vmatmul.mubr.msk.f32.vlgmr.msra.gmra.mxu0 %vm452_vm2, %v6170_v20  ;;  %v4925_v54 = vpop.f32.mrf.mxu1 }
0x1ca6   :  { %v1924_v7 = vpop.permute.xlu1 %1923 }
0x1ca7   :  { %vm1946_vm5 = vcmp.eq.s32.totalorder %v1924_v7, %v6175_v29 }
0x1ca8   :  { %v6179_v23 = vsel %vm1946_vm5, 1.0, %v6674_v5 }
0x1ca9   :  { %4931 = vmatprep.mubr.msk.f32.mxu0 %vm232_vm0, %v6179_v23 }
0x1caa   :  { %v1927_v35 = vpop.permute.xlu1 %1926 }
0x1cab   :  { %vm1947_vm7 = vcmp.eq.s32.totalorder %v1927_v35, %v6175_v29 }
0x1cac   :  { %v6198_v6 = vsel %vm1947_vm7, 1.0, %v6674_v5 }
0x1cae   :  { %v1930_v56 = vpop.permute.xlu1 %1929 }
0x1caf   :  { %vm1948_vm8 = vcmp.eq.s32.totalorder %v1930_v56, %v6175_v29 }
0x1cb0   :  { %v6203_v38 = vsel %vm1948_vm8, 1.0, %v6674_v5  ;;  %vm2640_vm8 = vcmask 523264  }
0x1cb2   :  { %v1933_v53 = vpop.permute.xlu1 %1932 }
0x1cb3   :  { %vm1949_vm9 = vcmp.eq.s32.totalorder %v1933_v53, %v6175_v29  ;;  %v6330_v53 = vld [vmem:[%s6707_s3] ss:$0 sm:$0xff] }
0x1cb4   :  { %v6213_v22 = vsel %vm1949_vm9, 1.0, %v6674_v5  ;;  %vm4181_vm9 = vcmask 130048  }
0x1cb6   :  { %v1936_v2 = vpop.permute.xlu1 %1935 }
0x1cb7   :  { %vm1950_vm10 = vcmp.eq.s32.totalorder %v1936_v2, %v6175_v29 }
0x1cb8   :  { %v6217_v8 = vsel %vm1950_vm10, 1.0, %v6674_v5 }
0x1cba   :  { %v1939_v26 = vpop.permute.xlu1 %1938 }
0x1cbb   :  { %vm1951_vm11 = vcmp.eq.s32.totalorder %v1939_v26, %v6175_v29  ;;  %v224_v26 = vld [vmem:[%s6708_s8 + $0x30] sm:$0xff] }
0x1cbc   :  { %v6226_v61 = vsel %vm1951_vm11, 1.0, %v6674_v5 }
0x1cbe   :  { %v1942_v3 = vpop.permute.xlu1 %1941 }
0x1cbf   :  { %vm1952_vm12 = vcmp.eq.s32.totalorder %v1942_v3, %v6175_v29 }
0x1cc0   :  { %v6230_v44 = vsel %vm1952_vm12, 1.0, %v6674_v5 }
0x1cc2   :  { %v1972_v4 = vpop.permute.xlu1 %1971 }
0x1cc3   :  { %vm1994_vm6 = vcmp.eq.s32.totalorder %v1972_v4, %v6175_v29 }
0x1cc4   :  { %v6185_v25 = vsel %vm1994_vm6, 1.0, %v6674_v5  ;;  %vm2001_vm6 = vcmp.eq.s32.totalorder %v1993_v21, %v6175_v29 }
0x1cc5   :  { %4945 = vmatprep.mubr.msk.f32.mxu1 %vm232_vm0, %v6185_v25  ;;  %v6280_v15 = vsel %vm2001_vm6, 1.0, %v6674_v5 }
0x1cc6   :  { %v1975_v57 = vpop.permute.xlu1 %1974  ;;  %6705 = vst [vmem:[#allocation28_spill] sm:$0xff] %v6280_v15 }
0x1cc7   :  { %vm1995_vm14 = vcmp.eq.s32.totalorder %v1975_v57, %v6175_v29 }
0x1cc8   :  { %v6246_v10 = vsel %vm1995_vm14, 1.0, %v6674_v5 }
0x1cca   :  { %v1978_v63 = vpop.permute.xlu1 %1977 }
0x1ccb   :  { %vm1996_vm15 = vcmp.eq.s32.totalorder %v1978_v63, %v6175_v29 }
0x1ccc   :  { %v6249_v11 = vsel %vm1996_vm15, 1.0, %v6674_v5 }
0x1cce   :  { %v1981_v62 = vpop.permute.xlu1 %1980 }
0x1ccf   :  { %vm1997_vm3 = vcmp.eq.s32.totalorder %v1981_v62, %v6175_v29 }
0x1cd0   :  { %v6258_v17 = vsel %vm1997_vm3, 1.0, %v6674_v5 }
0x1d5c   :  { %v2098_v37 = vpop.f32.mrf.mxu0 }
0x1d5d   :  { %v6191_v51 = vadd.f32 %v4444_v30, %v2098_v37  ;;  %v4446_v30 = vld [vmem:[%s6709_s14] ss:$0 sm:$0xff] }
0x1d5e   :  { %v4908_v48 = vpop.f32.mrf.mxu0  ;;  %v2229_v37 = vadd.f32 %v4925_v54, %v4446_v30  ;;  %v2219_v63 = vadd.f32 %v4922_v0, %v4446_v30  ;;  %v2209_v54 = vadd.f32 %v4919_v9, %v4446_v30  ;;  %v2214_v0 = vadd.f32 %v4446_v30, %v2213_v43 }
0x1d5f   :  { %2372 = vrot.lane.b32.xlu1 %v6191_v51, %s5453_s5  ;;  %4929 = vmatprep.subr.mxu0 %v6191_v51 }
0x1d60   :  { %4930 = vmatpush3.msra.mxu0 %v6191_v51 }
0x1d61   :  { %4932 = vmatmul.mubr.msk.f32.vlgmr.msra.gmra.mxu0 %vm232_vm0, %v6198_v6  ;;  %4957 = vmatprep.subr.mxu0 %v6674_v5 }
0x1d62   :  { %4934 = vmatprep.mubr.msk.f32.mxu0 %vm232_vm0, %v6203_v38 }
0x1d63   :  { %1983 = vperm.xlu1 %5215, %v213_v24  }
0x1d65   :  { %4935 = vmatmul.mubr.msk.f32.gmra.mxu0 %vm232_vm0, %v6213_v22 }
0x1d66   :  { %4937 = vmatprep.mubr.msk.f32.mxu0 %vm232_vm0, %v6217_v8 }
0x1d67   :  { %1989 = vperm.xlu1 %5215, %v215_v31  }
0x1d69   :  { %4938 = vmatmul.mubr.msk.f32.gmra.mxu0 %vm232_vm0, %v6226_v61 }
0x1d6a   :  { %4940 = vmatprep.mubr.msk.f32.mxu0 %vm232_vm0, %v6230_v44 }
0x1d6d   :  { %4941 = vmatmul.mubr.msk.f32.gmra.mxu0 %vm232_vm0, %v6237_v55 }
0x1d6e   :  { %4973 = vmatprep.mubr.msk.f32.mxu0 %vm5450_vm1, %v6674_v5 }
0x1dd1   :  { %v2373_v58 = vpop.permute.xlu1 %2372 }
0x1dd2   :  { %4943 = vmatprep.subr.mxu1 %v2373_v58 }
0x1dd3   :  { %4944 = vmatpush3.msra.mxu1 %v2373_v58 }
0x1dd4   :  { %4946 = vmatmul.mubr.msk.f32.vlgmr.msra.gmra.mxu1 %vm232_vm0, %v6246_v10  ;;  %4976 = vmatprep.subr.mxu1 %v6674_v5 }
0x1dd5   :  { %4948 = vmatprep.mubr.msk.f32.mxu1 %vm232_vm0, %v6249_v11 }
0x1dd8   :  { %4949 = vmatmul.mubr.msk.f32.gmra.mxu1 %vm232_vm0, %v6258_v17 }
0x1dde   :  { %v1984_v18 = vpop.permute.xlu1 %1983 }
0x1ddf   :  { %vm1998_vm5 = vcmp.eq.s32.totalorder %v1984_v18, %v6175_v29 }
0x1de0   :  { %v6265_v27 = vsel %vm1998_vm5, 1.0, %v6674_v5 }
0x1de1   :  { %4951 = vmatprep.mubr.msk.f32.mxu1 %vm232_vm0, %v6265_v27 }
0x1de2   :  { %v1990_v49 = vpop.permute.xlu1 %1989  ;;  %4952 = vmatmul.mubr.msk.f32.gmra.mxu1 %vm232_vm0, %v6268_v47 }
0x1de3   :  { %vm2000_vm7 = vcmp.eq.s32.totalorder %v1990_v49, %v6175_v29  ;;  %v2223_v29 = vpop.f32.mrf.mxu1 }
0x1de4   :  { %v6277_v60 = vsel %vm2000_vm7, 1.0, %v6674_v5  ;;  %v2224_v21 = vadd.f32 %v4446_v30, %v2223_v29 }
0x1de5   :  { %6704 = vst [vmem:[#allocation27_spill] sm:$0xff] %v6277_v60  ;;  %4954 = vmatprep.mubr.msk.f32.mxu1 %vm232_vm0, %v6277_v60  ;;  %v4928_v7 = vpop.f32.mrf.mxu1 }
0x1de6   :  { %4955 = vmatmul.mubr.msk.f32.gmra.mxu1 %vm232_vm0, %v6280_v15  ;;  %v2239_v62 = vadd.f32 %v4928_v7, %v4446_v30 }
0x1de7   :  { %4992 = vmatprep.mubr.msk.f32.mxu1 %vm5450_vm1, %v6674_v5  ;;  %v2233_v35 = vpop.f32.mrf.mxu1 }
0x1e21   :  { %v6288_v16 = vpop.f32.mrf.mxu0 }
0x1e23   :  { %v6290_v19 = vpop.f32.mrf.mxu0 }
0x1e25   :  { %v6292_v45 = vpop.f32.mrf.mxu0 }
0x1e27   :  { %v6294_v39 = vpop.f32.mrf.mxu0 }
0x1e29   :  { %v6296_v40 = vpop.f32.mrf.mxu0 }
0x1e2a   :  { %2522 = vrot.lane.b32.xlu1 %v6296_v40, %s5454_s29 }
0x1e2b   :  { %v6300_v42 = vpop.f32.mrf.mxu0 }
0x1e2d   :  { %v6302_v46 = vpop.f32.mrf.mxu0 }
0x1e2e   :  { %2526 = vrot.lane.b32.xlu1 %v6302_v46, %s5454_s29 }
0x1e2f   :  { %v6306_v41 = vpop.f32.mrf.mxu0 }
0x1e30   :  { %2524 = vrot.lane.b32.xlu0 %v6306_v41, %s5454_s29 }
0x1e32   :  { %2518 = vrot.lane.b32.xlu1 %v6292_v45, %s5454_s29 }
0x1e34   :  { %2520 = vrot.lane.b32.xlu0 %v6300_v42, %s5454_s29 }
0x1e36   :  { %2514 = vrot.lane.b32.xlu1 %v6288_v16, %s5454_s29 }
0x1e38   :  { %2516 = vrot.lane.b32.xlu0 %v6294_v39, %s5454_s29 }
0x1e3c   :  { %2512 = vrot.lane.b32.xlu0 %v6290_v19, %s5454_s29 }
0x1e40   :  { %2793 = vperm.xlu0 %5216, %v217_v1  }
0x1e5f   :  { %2608 = vxpose.xlu1.b32.start [1/8] (short) (narrow) %v6185_v25, 8 }
0x1e63   :  { %2609 = vxpose.xlu1.b32.cont [2/8] (short) (narrow) %v6246_v10, 8 }
0x1e67   :  { %2610 = vxpose.xlu1.b32.cont [3/8] (short) (narrow) %v6249_v11, 8 }
0x1e6b   :  { %2611 = vxpose.xlu1.b32.cont [4/8] (short) (narrow) %v6258_v17, 8 }
0x1e6f   :  { %2612 = vxpose.xlu1.b32.cont [5/8] (short) (narrow) %v6265_v27, 8 }
0x1e73   :  { %2613 = vxpose.xlu1.b32.cont [6/8] (short) (narrow) %v6268_v47, 8 }
0x1e77   :  { %2614 = vxpose.xlu1.b32.cont [7/8] (short) (narrow) %v6277_v60, 8 }
0x1e7b   :  { %2615 = vxpose.xlu1.b32.end [8/8] (short) (narrow) %v6280_v15, 8  ;;  %v2234_v15 = vadd.f32 %v4446_v30, %v2233_v35 }
0x1e94   :  { %v4947_v56 = vpop.f32.mrf.mxu1 }
0x1e96   :  { %v2465_v2 = vpop.f32.mrf.mxu1 }
0x1e98   :  { %v4950_v3 = vpop.f32.mrf.mxu1 }
0x1e99   :  { %3004 = vrot.lane.b32.xlu1 %v6330_v53, %s5454_s29 }
0x1e9a   :  { %v2475_v48 = vpop.f32.mrf.mxu1 }
0x1e9c   :  { %v2523_v4 = vpop.permute.xlu1 %2522 }
0x1e9d   :  { %2835 = vperm.xlu1 %5215, %v224_v26   ;;  %v2541_v31 = vadd.f32 %v2523_v4, %v2229_v37 }
0x1ea0   :  { %v2527_v24 = vpop.permute.xlu1 %2526 }
0x1ea1   :  { %v2543_v49 = vadd.f32 %v2527_v24, %v2239_v62 }
0x1ea2   :  { %v2525_v59 = vpop.permute.xlu0 %2524  ;;  %v4953_v57 = vpop.f32.mrf.mxu1 }
0x1ea3   :  { %v6336_v58 = vadd.f32 %v4953_v57, %v2541_v31  ;;  %v2542_v7 = vadd.f32 %v2525_v59, %v2234_v15 }
0x1ea4   :  { %v2519_v13 = vpop.permute.xlu1 %2518  ;;  %v2485_v18 = vpop.f32.mrf.mxu1 }
0x1ea5   :  { %v4476_v1 = vmul.f32 -1.442695, %v6336_v58  ;;  %v2539_v5 = vadd.f32 %v2519_v13, %v2219_v63 }
0x1ea6   :  { %v2521_v26 = vpop.permute.xlu0 %2520  ;;  %v4956_v60 = vpop.f32.mrf.mxu1 }
0x1ea7   :  { %v6339_v47 = vadd.f32 %v4950_v3, %v2539_v5  ;;  %v2540_v4 = vadd.f32 %v2521_v26, %v2224_v21  ;;  %v6341_v37 = vadd.f32 %v4956_v60, %v2543_v49  ;;  %5317 = vpow2.f32 %v4476_v1 }
0x1ea8   :  { %v2515_v31 = vpop.permute.xlu1 %2514  ;;  %v2495_v57 = vpop.f32.mrf.mxu1  ;;  %v2204_v3 = vadd.f32 %v4446_v30, %v2203_v52 }
0x1ea9   :  { %v4474_v29 = vmul.f32 -1.442695, %v6339_v47  ;;  %v6344_v24 = vadd.f32 %v2540_v4, %v2485_v18  ;;  %v4478_v63 = vmul.f32 -1.442695, %v6341_v37  ;;  %v2537_v35 = vadd.f32 %v2515_v31, %v2209_v54 }
0x1eaa   :  { %v6347_v62 = vadd.f32 %v2542_v7, %v2495_v57  ;;  %v2517_v9 = vpop.permute.xlu0 %2516 }
0x1eab   :  { %5319 = vpow2.f32 %v4474_v29  ;;  %v4475_v5 = vmul.f32 -1.442695, %v6344_v24  ;;  %v6350_v60 = vadd.f32 %v4947_v56, %v2537_v35  ;;  %v2538_v43 = vadd.f32 %v2517_v9, %v2214_v0 }
0x1eac   :  { %5321 = vpow2.f32 %v4478_v63  ;;  %v4477_v15 = vmul.f32 -1.442695, %v6347_v62 }
0x1ead   :  { %5323 = vpow2.f32 %v4475_v5  ;;  %v6353_v59 = vadd.f32 %v2538_v43, %v2475_v48  ;;  %v4472_v13 = vmul.f32 -1.442695, %v6350_v60 }
0x1eae   :  { %5325 = vpow2.f32 %v4477_v15  ;;  %v2513_v18 = vpop.permute.xlu0 %2512 }
0x1eaf   :  { %v4473_v21 = vmul.f32 -1.442695, %v6353_v59  ;;  %v2536_v49 = vadd.f32 %v2513_v18, %v2204_v3  ;;  %v6710_v18 = vmov 0.0  }
0x1eb1   :  { %5327 = vpow2.f32 %v4473_v21  ;;  %v6357_v1 = vadd.f32 %v2536_v49, %v2465_v2 }
0x1eb2   :  { %5329 = vpow2.f32 %v4472_v13 }
0x1eb3   :  { %v4471_v56 = vmul.f32 -1.442695, %v6357_v1 }
0x1eb4   :  { %v5318_v26 = vpop.eup %5317 }
0x1eb5   :  { %5331 = vpow2.f32 %v4471_v56  ;;  %v2581_v30 = vadd.f32 1.0, %v5318_v26 }
0x1eb8   :  { %v5320_v54 = vpop.eup %5319 }
0x1eb9   :  { %v5322_v52 = vpop.eup %5321  ;;  %v2579_v29 = vadd.f32 1.0, %v5320_v54 }
0x1eba   :  { %v5324_v48 = vpop.eup %5323  ;;  %v2583_v4 = vadd.f32 1.0, %v5322_v52 }
0x1ebb   :  { %v5326_v0 = vpop.eup %5325  ;;  %v2580_v7 = vadd.f32 1.0, %v5324_v48 }
0x1ebc   :  { %5333 = vrcp.f32 %v2583_v4  ;;  %v2582_v31 = vadd.f32 1.0, %v5326_v0 }
0x1ebd   :  { %5335 = vrcp.f32 %v2581_v30 }
0x1ebe   :  { %v5328_v57 = vpop.eup %5327  ;;  %5337 = vrcp.f32 %v2582_v31 }
0x1ebf   :  { %v5330_v2 = vpop.eup %5329  ;;  %5339 = vrcp.f32 %v2580_v7  ;;  %v2578_v63 = vadd.f32 1.0, %v5328_v57  ;;  %v6395_v57 = vpop.permute.xlu0 %2793 }
0x1ec0   :  { %5341 = vrcp.f32 %v2579_v29  ;;  %v2577_v9 = vadd.f32 1.0, %v5330_v2 }
0x1ec1   :  { %5343 = vrcp.f32 %v2578_v63 }
0x1ec2   :  { %v5332_v35 = vpop.eup %5331  ;;  %5345 = vrcp.f32 %v2577_v9  ;;  %v2867_v9 = vsel %vm452_vm2, %v6170_v20, 0.0 }
0x1ec3   :  { %v2576_v5 = vadd.f32 1.0, %v5332_v35 }
0x1ec5   :  { %5347 = vrcp.f32 %v2576_v5 }
0x1ec9   :  { %v5334_v43 = vpop.eup %5333 }
0x1eca   :  { %v5336_v15 = vpop.eup %5335  ;;  %4977 = vmatpush3.msra.mxu1 %v5334_v43  ;;  %v2607_v3 = vmul.f32 %v5334_v43, %v6302_v46 }
0x1ecb   :  { %v5338_v13 = vpop.eup %5337  ;;  %4978 = vmatprep.subr.mxu1 %v6710_v18  ;;  %v2605_v56 = vmul.f32 %v5336_v15, %v6296_v40 }
0x1ecc   :  { %4958 = vmatpush3.msra.mxu0 %v2607_v3  ;;  %4979 = vmatpush3.msra.mxu1 %v5338_v13  ;;  %v2606_v21 = vmul.f32 %v5338_v13, %v6306_v41  ;;  %v5340_v49 = vpop.eup %5339 }
0x1ecd   :  { %4959 = vmatprep.subr.mxu0 %v6710_v18  ;;  %4980 = vmatprep.subr.mxu1 %v6710_v18  ;;  %v5342_v26 = vpop.eup %5341  ;;  %v2604_v46 = vmul.f32 %v5340_v49, %v6300_v42 }
0x1ece   :  { %4960 = vmatpush3.msra.mxu0 %v2606_v21  ;;  %4981 = vmatpush3.msra.mxu1 %v5336_v15  ;;  %v5344_v54 = vpop.eup %5343  ;;  %v2603_v41 = vmul.f32 %v5342_v26, %v6292_v45 }
0x1ecf   :  { %4961 = vmatprep.subr.mxu0 %v6710_v18  ;;  %4982 = vmatprep.subr.mxu1 %v6710_v18  ;;  %v5346_v52 = vpop.eup %5345  ;;  %v2602_v40 = vmul.f32 %v5344_v54, %v6294_v39 }
0x1ed0   :  { %4962 = vmatpush3.msra.mxu0 %v2605_v56  ;;  %4983 = vmatpush3.msra.mxu1 %v5340_v49  ;;  %v2601_v42 = vmul.f32 %v5346_v52, %v6288_v16 }
0x1ed1   :  { %4963 = vmatprep.subr.mxu0 %v6710_v18  ;;  %4984 = vmatprep.subr.mxu1 %v6710_v18 }
0x1ed2   :  { %4964 = vmatpush3.msra.mxu0 %v2604_v46  ;;  %4985 = vmatpush3.msra.mxu1 %v5342_v26  ;;  %v5348_v30 = vpop.eup %5347 }
0x1ed3   :  { %4965 = vmatprep.subr.mxu0 %v6710_v18  ;;  %4986 = vmatprep.subr.mxu1 %v6710_v18  ;;  %v2600_v45 = vmul.f32 %v5348_v30, %v6290_v19 }
0x1ed4   :  { %4966 = vmatpush3.msra.mxu0 %v2603_v41  ;;  %4987 = vmatpush3.msra.mxu1 %v5344_v54 }
0x1ed5   :  { %4967 = vmatprep.subr.mxu0 %v6710_v18  ;;  %4988 = vmatprep.subr.mxu1 %v6710_v18 }
0x1ed6   :  { %4968 = vmatpush3.msra.mxu0 %v2602_v40  ;;  %4989 = vmatpush3.msra.mxu1 %v5346_v52  ;;  %v4481_v52 = vld [vmem:[%s6711_s19] ss:$0 sm:$0xff] }
0x1ed7   :  { %4969 = vmatprep.subr.mxu0 %v6710_v18  ;;  %4990 = vmatprep.subr.mxu1 %v6710_v18  ;;  %v218_v40 = vld [vmem:[%s6708_s8] sm:$0xff] }
0x1ed8   :  { %4970 = vmatpush3.msra.mxu0 %v2601_v42  ;;  %4991 = vmatpush3.msra.mxu1 %v5348_v30  ;;  %v219_v30 = vld [vmem:[%s6708_s8 + $0x8] sm:$0xff]  ;;  %v2897_v42 = vld [vmem:[%s6712_s24 + $0x18] sm:$0xff] }
0x1ed9   :  { %4971 = vmatprep.subr.mxu0 %v6710_v18  ;;  %5017 = vmatprep.subr.mxu1 %v6710_v18 }
0x1eda   :  { %4972 = vmatpush3.msra.mxu0 %v2600_v45  ;;  %v220_v45 = vld [vmem:[%s6708_s8 + $0x10] sm:$0xff] }
0x1edb   :  { %v6383_v39 = vpop.trf.xlu1  ;;  %4995 = vmatprep.subr.mxu0 %v6710_v18 }
0x1edc   :  { %4974 = vmatmul.mubr.msk.f32.vlgmr.msra.gmra.mxu0 %vm2640_vm8, %v6383_v39  ;;  %4993 = vmatmul.mubr.msk.f32.vlgmr.msra.gmra.mxu1 %vm2640_vm8, %v6383_v39 }
0x1edd   :  { %5003 = vmatprep.mubr.msk.f32.mxu0 %vm5450_vm1, %v6710_v18  ;;  %5025 = vmatprep.mubr.msk.f32.mxu1 %vm5450_vm1, %v6710_v18 }
0x1ede   :  { %4996 = vmatpush3.msra.mxu0 %v2897_v42 }
0x1edf   :  { %4997 = vmatprep.subr.mxu0 %v6710_v18 }
0x1f9c   :  { %v2710_v16 = vpop.f32.mrf.mxu0  ;;  %v2780_v19 = vpop.f32.mrf.mxu1 }
0x1f9d   :  { %v2781_v48 = vadd.f32 1e-06, %v2780_v19  ;;  %v2895_v19 = vld [vmem:[%s6712_s24 + $0x8] sm:$0xff] }
0x1f9e   :  { %v4975_v4 = vpop.f32.mrf.mxu0  ;;  %v4994_v0 = vpop.f32.mrf.mxu1 }
0x1f9f   :  { %5349 = vrcp.f32 %v2781_v48  ;;  %v221_v48 = vld [vmem:[%s6708_s8 + $0x18] sm:$0xff]  ;;  %v2894_v4 = vld [vmem:[%s6712_s24] sm:$0xff] }
0x1fa0   :  { %v222_v0 = vld [vmem:[%s6708_s8 + $0x20] sm:$0xff] }
0x1fac   :  { %v5350_v7 = vpop.eup %5349 }
0x1fad   :  { %v2785_v31 = vmul.f32 %v5350_v7, %v2710_v16  ;;  %v2896_v16 = vld [vmem:[%s6712_s24 + $0x10] sm:$0xff]  ;;  %v223_v7 = vld [vmem:[%s6708_s8 + $0x28] sm:$0xff] }
0x1fae   :  { %4998 = vmatpush3.msra.mxu0 %v2896_v16 }
0x1faf   :  { %2787 = vrot.lane.b32.xlu0 %v2785_v31, %s5454_s29  ;;  %4999 = vmatprep.subr.mxu0 %v6710_v18  ;;  %v225_v31 = vld [vmem:[%s6708_s8 + $0x38] sm:$0xff] }
0x1fb0   :  { %5000 = vmatpush3.msra.mxu0 %v2895_v19  ;;  %v2900_v19 = vld [vmem:[%s6712_s24 + $0x30] sm:$0xff] }
0x1fb1   :  { %5001 = vmatprep.subr.mxu0 %v6710_v18 }
0x1fb2   :  { %5002 = vmatpush3.msra.mxu0 %v2894_v4  ;;  %v3170_v4 = vld [vmem:[%s6713_s30 + $0x18] sm:$0xff] }
0x1fb3   :  { %5006 = vmatprep.subr.mxu0 %v6710_v18 }
0x2021   :  { %v2788_v29 = vpop.permute.xlu0 %2787 }
0x2022   :  { %v2790_v2 = vadd.f32 %v2788_v29, %v6191_v51 }
0x2024   :  { %v2796_v63 = vmul.f32 %v6395_v57, %v2790_v2 }
0x2026   :  { %v2797_v35 = vmax.f32 %v2796_v63, 0.0 }
0x2028   :  { %2799 = vrot.lane.b32.xlu0 %v2797_v35, %s5452_s0 }
0x2047   :  { %2868 = vadd.xlane.f32.xlu0 %v2867_v9 }
0x209a   :  { %v2800_v5 = vpop.permute.xlu0 %2799 }
0x209b   :  { %v6403_v43 = vadd.f32 %v2800_v5, %v6170_v20 }
0x209d   :  { %v2871_v15 = vsel %vm452_vm2, %v6403_v43, 0.0 }
0x209e   :  { %2872 = vadd.xlane.f32.xlu0 %v2871_v15 }
0x20d0   :  { %v2869_v51 = vpop.xlane.xlu0 %2868 }
0x2127   :  { %v2873_v3 = vpop.xlane.xlu0 %2872 }
0x2128   :  { %v6407_v13 = vadd.f32 %v2873_v3, %v2869_v51 }
0x212a   :  { %v2876_v21 = vmul.f32 0.015625, %v6407_v13 }
0x212c   :  { %v2877_v49 = vsub.f32 %v6170_v20, %v2876_v21  ;;  %v2883_v56 = vsub.f32 %v6403_v43, %v2876_v21 }
0x212e   :  { %v2878_v26 = vmul.f32 %v2877_v49, %v2877_v49  ;;  %v2884_v54 = vmul.f32 %v2883_v56, %v2883_v56 }
0x2130   :  { %v2879_v46 = vsel %vm452_vm2, %v2878_v26, 0.0  ;;  %v2885_v41 = vsel %vm452_vm2, %v2884_v54, 0.0 }
0x2131   :  { %2880 = vadd.xlane.f32.xlu0 %v2879_v46 }
0x2135   :  { %2886 = vadd.xlane.f32.xlu0 %v2885_v41 }
0x214b   :  { %3000 = vrot.lane.b32.xlu0 %v4481_v52, %s5454_s29 }
0x214f   :  { %2805 = vperm.xlu0 %5216, %v218_v40  }
0x2153   :  { %2810 = vperm.xlu0 %5216, %v219_v30  }
0x2157   :  { %2815 = vperm.xlu0 %5216, %v220_v45   ;;  %v2901_v45 = vld [vmem:[%s6712_s24 + $0x38] sm:$0xff] }
0x215b   :  { %2820 = vperm.xlu0 %5216, %v221_v48   ;;  %v3005_v48 = vpop.permute.xlu1 %3004 }
0x215f   :  { %2825 = vperm.xlu0 %5216, %v222_v0  }
0x2163   :  { %2830 = vperm.xlu0 %5216, %v223_v7  }
0x2167   :  { %2840 = vperm.xlu0 %5216, %v225_v31  }
0x21ba   :  { %v2881_v29 = vpop.xlane.xlu0 %2880 }
0x21be   :  { %v2887_v2 = vpop.xlane.xlu0 %2886 }
0x21bf   :  { %v2888_v63 = vadd.f32 %v2887_v2, %v2881_v29  ;;  %v3169_v2 = vld [vmem:[%s6713_s30 + $0x10] sm:$0xff] }
0x21c1   :  { %v2889_v35 = vmul.f32 0.015625, %v2888_v63 }
0x21c2   :  { %v3001_v5 = vpop.permute.xlu0 %3000 }
0x21c3   :  { %v2890_v9 = vadd.f32 1e-05, %v2889_v35  ;;  %v3168_v35 = vld [vmem:[%s6713_s30 + $0x8] sm:$0xff] }
0x21c5   :  { %5351 = vrsqrt.f32 %v2890_v9 }
0x21ca   :  { %v2806_v15 = vpop.permute.xlu0 %2805 }
0x21cb   :  { %v2843_v16 = vmul.f32 %v2806_v15, %v6357_v1  ;;  %v2898_v1 = vld [vmem:[%s6712_s24 + $0x20] sm:$0xff] }
0x21cc   :  { %v3167_v15 = vld [vmem:[%s6713_s30] sm:$0xff] }
0x21ce   :  { %v2811_v51 = vpop.permute.xlu0 %2810 }
0x21cf   :  { %v2844_v7 = vmul.f32 %v2811_v51, %v6350_v60 }
0x21d1   :  { %v2852_v9 = vmax.f32 %v2844_v7, 0.0 }
0x21d2   :  { %v5352_v3 = vpop.eup %5351  ;;  %v2816_v21 = vpop.permute.xlu0 %2815 }
0x21d3   :  { %v2903_v26 = vmul.f32 %v5352_v3, %v2877_v49  ;;  %v2999_v46 = vmul.f32 %v5352_v3, %v2883_v56  ;;  %v2851_v56 = vmax.f32 %v2843_v16, 0.0  ;;  %v2845_v29 = vmul.f32 %v2816_v21, %v6353_v59  ;;  %v2836_v59 = vpop.permute.xlu1 %2835 }
0x21d4   :  { %v2860_v51 = vadd.f32 %v2852_v9, %v6093_v34 }
0x21d5   :  { %v2910_v54 = vmul.f32 %v4481_v52, %v2903_v26  ;;  %v3003_v30 = vmul.f32 %v3001_v5, %v2999_v46  ;;  %v2859_v31 = vadd.f32 %v2851_v56, %v6084_v28  ;;  %v2853_v5 = vmax.f32 %v2845_v29, 0.0 }
0x21d6   :  { %v2821_v40 = vpop.permute.xlu0 %2820  ;;  %v2849_v26 = vmul.f32 %v2836_v59, %v6347_v62 }
0x21d7   :  { %v2917_v41 = vadd.f32 %v6330_v53, %v2910_v54  ;;  %v3007_v49 = vadd.f32 %v3005_v48, %v3003_v30  ;;  %v2899_v53 = vld [vmem:[%s6712_s24 + $0x28] sm:$0xff]  ;;  %v2846_v60 = vmul.f32 %v2821_v40, %v6339_v47  ;;  %v2861_v46 = vadd.f32 %v2853_v5, %v6096_v12 }
0x21d9   :  { %v2918_v42 = vmax.f32 %v2917_v41, 0.0  ;;  %v3008_v0 = vmax.f32 %v3007_v49, 0.0  ;;  %v2854_v3 = vmax.f32 %v2846_v60, 0.0  ;;  %v4486_v49 = vld [vmem:[%s6716_s15] ss:$0 sm:$0xff] }
0x21da   :  { %v2826_v52 = vpop.permute.xlu0 %2825 }
0x21db   :  { %5004 = vmatmul.mubr.msk.f32.vlgmr.msra.gmra.mxu0 %vm452_vm2, %v2918_v42  ;;  %v2847_v28 = vmul.f32 %v2826_v52, %v6344_v24  ;;  %v2862_v24 = vadd.f32 %v2854_v3, %v6103_v50 }
0x21dc   :  { %5007 = vmatpush3.msra.mxu0 %v2901_v45  ;;  %5014 = vmatprep.mubr.msk.f32.mxu0 %vm5450_vm1, %v6710_v18  ;;  %v4484_v45 = vld [vmem:[%s6715_s12] ss:$0 sm:$0xff] }
0x21dd   :  { %5008 = vmatprep.subr.mxu0 %v6710_v18  ;;  %v2855_v47 = vmax.f32 %v2847_v28, 0.0 }
0x21de   :  { %5009 = vmatpush3.msra.mxu0 %v2900_v19  ;;  %v2831_v63 = vpop.permute.xlu0 %2830 }
0x21df   :  { %5010 = vmatprep.subr.mxu0 %v6710_v18  ;;  %v2848_v21 = vmul.f32 %v2831_v63, %v6336_v58  ;;  %v2857_v58 = vmax.f32 %v2849_v26, 0.0  ;;  %v2863_v40 = vadd.f32 %v2855_v47, %v6106_v32  ;;  %v3086_v32 = vld [vmem:[%s6714_s6 + $0x18] sm:$0xff] }
0x21e0   :  { %5011 = vmatpush3.msra.mxu0 %v2899_v53  ;;  %5018 = vmatpush3.msra.mxu1 %v3086_v32 }
0x21e1   :  { %5012 = vmatprep.subr.mxu0 %v6710_v18  ;;  %v2856_v34 = vmax.f32 %v2848_v21, 0.0  ;;  %v2865_v30 = vadd.f32 %v2857_v58, %v6116_v14  ;;  %5019 = vmatprep.subr.mxu1 %v6710_v18  ;;  %v3083_v14 = vld [vmem:[%s6714_s6] sm:$0xff] }
0x21e2   :  { %5013 = vmatpush3.msra.mxu0 %v2898_v1  ;;  %v2841_v54 = vpop.permute.xlu0 %2840 }
0x21e3   :  { %5015 = vmatmul.mubr.msk.f32.vlgmr.msra.gmra.mxu0 %vm452_vm2, %v3008_v0  ;;  %5028 = vmatprep.subr.mxu0 %v3170_v4  ;;  %v2850_v41 = vmul.f32 %v2841_v54, %v6341_v37  ;;  %v2864_v12 = vadd.f32 %v2856_v34, %v6113_v33  ;;  %v3085_v37 = vld [vmem:[%s6714_s6 + $0x10] sm:$0xff]  ;;  %v3084_v33 = vld [vmem:[%s6714_s6 + $0x8] sm:$0xff] }
0x21e4   :  { %5029 = vmatpush3.msra.mxu0 %v3170_v4  ;;  %5036 = vmatprep.mubr.msk.f32.mxu0 %vm452_vm2, %v2859_v31 }
0x21e5   :  { %5030 = vmatprep.subr.mxu0 %v3169_v2  ;;  %v2858_v62 = vmax.f32 %v2850_v41, 0.0  ;;  %5020 = vmatpush3.msra.mxu1 %v3085_v37 }
0x21e6   :  { %5031 = vmatpush3.msra.mxu0 %v3169_v2  ;;  %5021 = vmatprep.subr.mxu1 %v6710_v18 }
0x21e7   :  { %5032 = vmatprep.subr.mxu0 %v3168_v35  ;;  %v2866_v50 = vadd.f32 %v2858_v62, %v6124_v36  ;;  %5022 = vmatpush3.msra.mxu1 %v3084_v33 }
0x21e8   :  { %5033 = vmatpush3.msra.mxu0 %v3168_v35  ;;  %5023 = vmatprep.subr.mxu1 %v6710_v18 }
0x21e9   :  { %5034 = vmatprep.subr.mxu0 %v3167_v15  ;;  %5024 = vmatpush3.msra.mxu1 %v3083_v14 }
0x21ea   :  { %5035 = vmatpush3.msra.mxu0 %v3167_v15  ;;  %v4488_v15 = vld [vmem:[%s6720_s16] ss:$0 sm:$0xff] }
0x21eb   :  { %5037 = vmatmul.mubr.msk.f32.vlgmr.msra.gmra.mxu0 %vm452_vm2, %v2860_v51 }
0x21ec   :  { %5039 = vmatprep.mubr.msk.f32.mxu0 %vm452_vm2, %v2861_v46 }
0x21ef   :  { %5040 = vmatmul.mubr.msk.f32.gmra.mxu0 %vm452_vm2, %v2862_v24 }
0x21f0   :  { %5042 = vmatprep.mubr.msk.f32.mxu0 %vm452_vm2, %v2863_v40 }
0x21f3   :  { %5043 = vmatmul.mubr.msk.f32.gmra.mxu0 %vm452_vm2, %v2864_v12 }
0x21f4   :  { %5045 = vmatprep.mubr.msk.f32.mxu0 %vm452_vm2, %v2865_v30 }
0x21f7   :  { %5046 = vmatmul.mubr.msk.f32.gmra.mxu0 %vm452_vm2, %v2866_v50 }
0x21f8   :  { %5064 = vmatprep.mubr.msk.f32.mxu0 %vm232_vm0, %v6185_v25 }
0x229b   :  { %v2988_v36 = vpop.f32.mrf.mxu0 }
0x229c   :  { %v2998_v16 = vadd.f32 %v4484_v45, %v2988_v36 }
0x229d   :  { %v5005_v42 = vpop.f32.mrf.mxu0 }
0x22a3   :  { %v3078_v25 = vpop.f32.mrf.mxu0 }
0x22a4   :  { %v6481_v19 = vadd.f32 %v3078_v25, %v2998_v16 }
0x22a5   :  { %v5016_v48 = vpop.f32.mrf.mxu0 }
0x22a6   :  { %5026 = vmatmul.mubr.msk.f32.vlgmr.msra.gmra.mxu1 %vm452_vm2, %v6481_v19 }
0x22a7   :  { %5050 = vmatprep.mubr.msk.f32.mxu1 %vm232_vm0, %v6179_v23 }
0x22ab   :  { %v5038_v1 = vpop.f32.mrf.mxu0 }
0x22ac   :  { %v3274_v48 = vadd.f32 %v5038_v1, %v4488_v15 }
0x22ad   :  { %v3268_v4 = vpop.f32.mrf.mxu0 }
0x22af   :  { %v5041_v0 = vpop.f32.mrf.mxu0 }
0x22b0   :  { %v3284_v50 = vadd.f32 %v5041_v0, %v4488_v15 }
0x22b1   :  { %v3278_v7 = vpop.f32.mrf.mxu0 }
0x22b2   :  { %v3279_v36 = vadd.f32 %v4488_v15, %v3278_v7 }
0x22b3   :  { %v5044_v31 = vpop.f32.mrf.mxu0 }
0x22b4   :  { %v3294_v54 = vadd.f32 %v5044_v31, %v4488_v15 }
0x22b5   :  { %v3288_v29 = vpop.f32.mrf.mxu0 }
0x22b6   :  { %v3289_v40 = vadd.f32 %v4488_v15, %v3288_v29 }
0x22b7   :  { %v5047_v2 = vpop.f32.mrf.mxu0 }
0x22b8   :  { %v3304_v51 = vadd.f32 %v5047_v2, %v4488_v15 }
0x22b9   :  { %v3298_v63 = vpop.f32.mrf.mxu0 }
0x22ba   :  { %v3299_v26 = vadd.f32 %v4488_v15, %v3298_v63 }
0x2366   :  { %v3163_v53 = vpop.f32.mrf.mxu1 }
0x2367   :  { %v6488_v56 = vadd.f32 %v4486_v49, %v3163_v53 }
0x2368   :  { %v5027_v52 = vpop.f32.mrf.mxu1 }
0x2369   :  { %3413 = vrot.lane.b32.xlu1 %v6488_v56, %s5453_s5  ;;  %5048 = vmatprep.subr.mxu1 %v6488_v56 }
0x236a   :  { %5049 = vmatpush3.msra.mxu1 %v6488_v56 }
0x236b   :  { %5051 = vmatmul.mubr.msk.f32.vlgmr.msra.gmra.mxu1 %vm232_vm0, %v6198_v6  ;;  %5076 = vmatprep.subr.mxu1 %v6710_v18  ;;  %v6717_v6 = vld [vmem:[#allocation26_spill] sm:$0xff] }
0x236c   :  { %5053 = vmatprep.mubr.msk.f32.mxu1 %vm232_vm0, %v6203_v38  ;;  %v6718_v38 = vld [vmem:[#allocation27_spill] sm:$0xff] }
0x236f   :  { %5054 = vmatmul.mubr.msk.f32.gmra.mxu1 %vm232_vm0, %v6213_v22  ;;  %v6719_v22 = vld [vmem:[#allocation28_spill] sm:$0xff] }
0x2370   :  { %5056 = vmatprep.mubr.msk.f32.mxu1 %vm232_vm0, %v6217_v8 }
0x2373   :  { %5057 = vmatmul.mubr.msk.f32.gmra.mxu1 %vm232_vm0, %v6226_v61 }
0x2374   :  { %5059 = vmatprep.mubr.msk.f32.mxu1 %vm232_vm0, %v6230_v44 }
0x2377   :  { %5060 = vmatmul.mubr.msk.f32.gmra.mxu1 %vm232_vm0, %v6237_v55 }
0x2378   :  { %5092 = vmatprep.mubr.msk.f32.mxu1 %vm5450_vm1, %v6710_v18 }
0x23db   :  { %v3414_v23 = vpop.permute.xlu1 %3413 }
0x23dc   :  { %5062 = vmatprep.subr.mxu0 %v3414_v23 }
0x23dd   :  { %5063 = vmatpush3.msra.mxu0 %v3414_v23 }
0x23de   :  { %5065 = vmatmul.mubr.msk.f32.vlgmr.msra.gmra.mxu0 %vm232_vm0, %v6246_v10  ;;  %5095 = vmatprep.subr.mxu0 %v6710_v18 }
0x23df   :  { %5067 = vmatprep.mubr.msk.f32.mxu0 %vm232_vm0, %v6249_v11 }
0x23e2   :  { %5068 = vmatmul.mubr.msk.f32.gmra.mxu0 %vm232_vm0, %v6258_v17 }
0x23e3   :  { %5070 = vmatprep.mubr.msk.f32.mxu0 %vm232_vm0, %v6265_v27 }
0x23e6   :  { %5071 = vmatmul.mubr.msk.f32.gmra.mxu0 %vm232_vm0, %v6717_v6  ;;  %v3269_v6 = vadd.f32 %v4488_v15, %v3268_v4 }
0x23e7   :  { %5073 = vmatprep.mubr.msk.f32.mxu0 %vm232_vm0, %v6718_v38 }
0x23ea   :  { %5074 = vmatmul.mubr.msk.f32.gmra.mxu0 %vm232_vm0, %v6719_v22 }
0x23eb   :  { %5111 = vmatprep.mubr.msk.f32.mxu0 %vm5450_vm1, %v6710_v18 }
0x242b   :  { %v6528_v8 = vpop.f32.mrf.mxu1 }
0x242d   :  { %v6530_v61 = vpop.f32.mrf.mxu1 }
0x242f   :  { %v6532_v44 = vpop.f32.mrf.mxu1 }
0x2431   :  { %v6534_v55 = vpop.f32.mrf.mxu1 }
0x2433   :  { %v6536_v10 = vpop.f32.mrf.mxu1 }
0x2435   :  { %v6538_v11 = vpop.f32.mrf.mxu1 }
0x2437   :  { %v6540_v17 = vpop.f32.mrf.mxu1 }
0x2438   :  { %3543 = vrot.lane.b32.xlu0 %v6540_v17, %s5454_s29 }
0x2439   :  { %v6544_v27 = vpop.f32.mrf.mxu1 }
0x243a   :  { %3541 = vrot.lane.b32.xlu1 %v6544_v27, %s5454_s29 }
0x243c   :  { %3539 = vrot.lane.b32.xlu0 %v6536_v10, %s5454_s29 }
0x243e   :  { %3537 = vrot.lane.b32.xlu1 %v6538_v11, %s5454_s29 }
0x2440   :  { %3535 = vrot.lane.b32.xlu0 %v6532_v44, %s5454_s29 }
0x2442   :  { %3533 = vrot.lane.b32.xlu1 %v6534_v55, %s5454_s29 }
0x2444   :  { %3531 = vrot.lane.b32.xlu0 %v6528_v8, %s5454_s29 }
0x2446   :  { %3529 = vrot.lane.b32.xlu1 %v6530_v61, %s5454_s29 }
0x249e   :  { %v5066_v35 = vpop.f32.mrf.mxu0 }
0x24a0   :  { %v3482_v9 = vpop.f32.mrf.mxu0 }
0x24a2   :  { %v5069_v60 = vpop.f32.mrf.mxu0 }
0x24a4   :  { %v3492_v5 = vpop.f32.mrf.mxu0 }
0x24a6   :  { %v5072_v28 = vpop.f32.mrf.mxu0 }
0x24a8   :  { %v3502_v59 = vpop.f32.mrf.mxu0 }
0x24aa   :  { %v3544_v3 = vpop.permute.xlu0 %3543  ;;  %v5075_v21 = vpop.f32.mrf.mxu0 }
0x24ab   :  { %v3560_v46 = vadd.f32 %v3544_v3, %v3304_v51 }
0x24ac   :  { %v3542_v47 = vpop.permute.xlu1 %3541  ;;  %v3512_v41 = vpop.f32.mrf.mxu0 }
0x24ad   :  { %v3568_v24 = vadd.f32 %v5075_v21, %v3560_v46  ;;  %v3559_v34 = vadd.f32 %v3542_v47, %v3299_v26 }
0x24ae   :  { %v3540_v58 = vpop.permute.xlu0 %3539 }
0x24af   :  { %v4520_v12 = vmul.f32 -1.442695, %v3568_v24  ;;  %v3567_v62 = vadd.f32 %v3559_v34, %v3512_v41  ;;  %v3558_v30 = vadd.f32 %v3540_v58, %v3294_v54 }
0x24b0   :  { %v3538_v32 = vpop.permute.xlu1 %3537 }
0x24b1   :  { %5353 = vpow2.f32 %v4520_v12  ;;  %v4519_v37 = vmul.f32 -1.442695, %v3567_v62  ;;  %v3566_v33 = vadd.f32 %v5072_v28, %v3558_v30  ;;  %v3557_v14 = vadd.f32 %v3538_v32, %v3289_v40 }
0x24b2   :  { %v3536_v42 = vpop.permute.xlu0 %3535 }
0x24b3   :  { %5355 = vpow2.f32 %v4519_v37  ;;  %v4518_v45 = vmul.f32 -1.442695, %v3566_v33  ;;  %v3565_v16 = vadd.f32 %v3557_v14, %v3502_v59  ;;  %v3556_v25 = vadd.f32 %v3536_v42, %v3284_v50 }
0x24b4   :  { %v3534_v49 = vpop.permute.xlu1 %3533 }
0x24b5   :  { %5357 = vpow2.f32 %v4518_v45  ;;  %v4517_v53 = vmul.f32 -1.442695, %v3565_v16  ;;  %v3564_v52 = vadd.f32 %v5069_v60, %v3556_v25  ;;  %v3555_v23 = vadd.f32 %v3534_v49, %v3279_v36 }
0x24b6   :  { %v3532_v38 = vpop.permute.xlu0 %3531 }
0x24b7   :  { %5359 = vpow2.f32 %v4517_v53  ;;  %v4516_v22 = vmul.f32 -1.442695, %v3564_v52  ;;  %v3563_v0 = vadd.f32 %v3555_v23, %v3492_v5  ;;  %v3554_v31 = vadd.f32 %v3532_v38, %v3274_v48 }
0x24b8   :  { %v3530_v29 = vpop.permute.xlu1 %3529 }
0x24b9   :  { %5361 = vpow2.f32 %v4516_v22  ;;  %v4515_v7 = vmul.f32 -1.442695, %v3563_v0  ;;  %v3562_v2 = vadd.f32 %v5066_v35, %v3554_v31  ;;  %v3553_v63 = vadd.f32 %v3530_v29, %v3269_v6 }
0x24bb   :  { %5363 = vpow2.f32 %v4515_v7  ;;  %v4514_v28 = vmul.f32 -1.442695, %v3562_v2  ;;  %v3561_v59 = vadd.f32 %v3553_v63, %v3482_v9 }
0x24bd   :  { %5365 = vpow2.f32 %v4514_v28  ;;  %v4513_v1 = vmul.f32 -1.442695, %v3561_v59  ;;  %v3811_v28 = vld [vmem:[%s6723_s23 + $0x18] sm:$0xff] }
0x24be   :  { %v5354_v51 = vpop.eup %5353  ;;  %v3819_v59 = vld [vmem:[%s6723_s23 + $0x58] sm:$0xff] }
0x24bf   :  { %v3600_v3 = vadd.f32 1.0, %v5354_v51  ;;  %5367 = vpow2.f32 %v4513_v1  ;;  %v3810_v1 = vld [vmem:[%s6723_s23 + $0x10] sm:$0xff] }
0x24c0   :  { %v5356_v60 = vpop.eup %5355  ;;  %v3818_v51 = vld [vmem:[%s6723_s23 + $0x50] sm:$0xff] }
0x24c1   :  { %5369 = vrcp.f32 %v3600_v3  ;;  %v3599_v4 = vadd.f32 1.0, %v5356_v60  ;;  %v3809_v3 = vld [vmem:[%s6723_s23 + $0x8] sm:$0xff] }
0x24c2   :  { %v5358_v15 = vpop.eup %5357  ;;  %v3817_v60 = vld [vmem:[%s6723_s23 + $0x48] sm:$0xff] }
0x24c3   :  { %5371 = vrcp.f32 %v3599_v4  ;;  %v3598_v5 = vadd.f32 1.0, %v5358_v15  ;;  %v3808_v4 = vld [vmem:[%s6723_s23] sm:$0xff] }
0x24c4   :  { %v5360_v21 = vpop.eup %5359  ;;  %v3816_v15 = vld [vmem:[%s6723_s23 + $0x40] sm:$0xff] }
0x24c5   :  { %5373 = vrcp.f32 %v3598_v5  ;;  %v3597_v26 = vadd.f32 1.0, %v5360_v21 }
0x24c6   :  { %v5362_v46 = vpop.eup %5361 }
0x24c7   :  { %5375 = vrcp.f32 %v3597_v26  ;;  %v3596_v35 = vadd.f32 1.0, %v5362_v46 }
0x24c8   :  { %v5364_v47 = vpop.eup %5363 }
0x24c9   :  { %5377 = vrcp.f32 %v3596_v35  ;;  %v3595_v9 = vadd.f32 1.0, %v5364_v47 }
0x24ca   :  { %v5366_v54 = vpop.eup %5365 }
0x24cb   :  { %5379 = vrcp.f32 %v3595_v9  ;;  %v3594_v24 = vadd.f32 1.0, %v5366_v54 }
0x24cc   :  { %v5368_v34 = vpop.eup %5367 }
0x24cd   :  { %5381 = vrcp.f32 %v3594_v24  ;;  %v3593_v41 = vadd.f32 1.0, %v5368_v34 }
0x24ce   :  { %v5370_v58 = vpop.eup %5369 }
0x24cf   :  { %5383 = vrcp.f32 %v3593_v41  ;;  %5096 = vmatpush3.msra.mxu0 %v5370_v58  ;;  %v3624_v40 = vmul.f32 %v5370_v58, %v6540_v17 }
0x24d0   :  { %v5372_v12 = vpop.eup %5371  ;;  %5097 = vmatprep.subr.mxu0 %v6710_v18 }
0x24d1   :  { %5077 = vmatpush3.msra.mxu1 %v3624_v40  ;;  %5098 = vmatpush3.msra.mxu0 %v5372_v12  ;;  %v3623_v62 = vmul.f32 %v5372_v12, %v6544_v27 }
0x24d2   :  { %v5374_v30 = vpop.eup %5373  ;;  %5078 = vmatprep.subr.mxu1 %v6710_v18  ;;  %5099 = vmatprep.subr.mxu0 %v6710_v18 }
0x24d3   :  { %5079 = vmatpush3.msra.mxu1 %v3623_v62  ;;  %5100 = vmatpush3.msra.mxu0 %v5374_v30  ;;  %v3622_v50 = vmul.f32 %v5374_v30, %v6536_v10 }
0x24d4   :  { %v5376_v32 = vpop.eup %5375  ;;  %5080 = vmatprep.subr.mxu1 %v6710_v18  ;;  %5101 = vmatprep.subr.mxu0 %v6710_v18 }
0x24d5   :  { %5081 = vmatpush3.msra.mxu1 %v3622_v50  ;;  %5102 = vmatpush3.msra.mxu0 %v5376_v32  ;;  %v3621_v17 = vmul.f32 %v5376_v32, %v6538_v11 }
0x24d6   :  { %v5378_v37 = vpop.eup %5377  ;;  %5082 = vmatprep.subr.mxu1 %v6710_v18  ;;  %5103 = vmatprep.subr.mxu0 %v6710_v18 }
0x24d7   :  { %5083 = vmatpush3.msra.mxu1 %v3621_v17  ;;  %5104 = vmatpush3.msra.mxu0 %v5378_v37  ;;  %v3620_v27 = vmul.f32 %v5378_v37, %v6532_v44 }
0x24d8   :  { %v5380_v33 = vpop.eup %5379  ;;  %5084 = vmatprep.subr.mxu1 %v6710_v18  ;;  %5105 = vmatprep.subr.mxu0 %v6710_v18 }
0x24d9   :  { %5085 = vmatpush3.msra.mxu1 %v3620_v27  ;;  %5106 = vmatpush3.msra.mxu0 %v5380_v33  ;;  %v3619_v10 = vmul.f32 %v5380_v33, %v6534_v55  ;;  %v3815_v33 = vld [vmem:[%s6723_s23 + $0x38] sm:$0xff] }
0x24da   :  { %v5382_v14 = vpop.eup %5381  ;;  %5086 = vmatprep.subr.mxu1 %v6710_v18  ;;  %5107 = vmatprep.subr.mxu0 %v6710_v18 }
0x24db   :  { %5087 = vmatpush3.msra.mxu1 %v3619_v10  ;;  %5108 = vmatpush3.msra.mxu0 %v5382_v14  ;;  %v3618_v11 = vmul.f32 %v5382_v14, %v6528_v8  ;;  %v3814_v14 = vld [vmem:[%s6723_s23 + $0x30] sm:$0xff] }
0x24dc   :  { %v5384_v36 = vpop.eup %5383  ;;  %5088 = vmatprep.subr.mxu1 %v6710_v18  ;;  %5109 = vmatprep.subr.mxu0 %v6710_v18 }
0x24dd   :  { %5089 = vmatpush3.msra.mxu1 %v3618_v11  ;;  %5110 = vmatpush3.msra.mxu0 %v5384_v36  ;;  %v3617_v44 = vmul.f32 %v5384_v36, %v6530_v61  ;;  %v3813_v36 = vld [vmem:[%s6723_s23 + $0x28] sm:$0xff] }
0x24de   :  { %5090 = vmatprep.subr.mxu1 %v6710_v18  ;;  %5112 = vmatmul.mubr.msk.f32.vlgmr.msra.gmra.mxu0 %vm2640_vm8, %v6383_v39 }
0x24df   :  { %5091 = vmatpush3.msra.mxu1 %v3617_v44  ;;  %5136 = vmatprep.subr.mxu0 %v6710_v18  ;;  %v3812_v44 = vld [vmem:[%s6723_s23 + $0x20] sm:$0xff] }
0x24e0   :  { %5093 = vmatmul.mubr.msk.f32.vlgmr.msra.gmra.mxu1 %vm2640_vm8, %v6383_v39  ;;  %5114 = vmatprep.subr.mxu1 %v6710_v18 }
0x24e1   :  { %5122 = vmatprep.mubr.msk.f32.mxu1 %vm5450_vm1, %v6710_v18  ;;  %5144 = vmatprep.mubr.msk.f32.mxu0 %vm5450_vm1, %v6710_v18 }
0x24e2   :  { %5115 = vmatpush3.msra.mxu1 %v3811_v28  ;;  %5137 = vmatpush3.msra.mxu0 %v3819_v59 }
0x24e3   :  { %5116 = vmatprep.subr.mxu1 %v6710_v18  ;;  %5138 = vmatprep.subr.mxu0 %v6710_v18 }
0x24e4   :  { %5117 = vmatpush3.msra.mxu1 %v3810_v1  ;;  %5139 = vmatpush3.msra.mxu0 %v3818_v51 }
0x24e5   :  { %5118 = vmatprep.subr.mxu1 %v6710_v18  ;;  %5140 = vmatprep.subr.mxu0 %v6710_v18 }
0x24e6   :  { %5119 = vmatpush3.msra.mxu1 %v3809_v3  ;;  %5141 = vmatpush3.msra.mxu0 %v3817_v60 }
0x24e7   :  { %5120 = vmatprep.subr.mxu1 %v6710_v18  ;;  %5142 = vmatprep.subr.mxu0 %v6710_v18 }
0x24e8   :  { %5121 = vmatpush3.msra.mxu1 %v3808_v4  ;;  %5143 = vmatpush3.msra.mxu0 %v3816_v15 }
0x24e9   :  { %5125 = vmatprep.subr.mxu1 %v6710_v18  ;;  %5158 = vmatprep.subr.mxu0 %v6710_v18 }
0x259e   :  { %v3761_v8 = vpop.f32.mrf.mxu0 }
0x259f   :  { %v3762_v61 = vadd.f32 1e-06, %v3761_v8 }
0x25a0   :  { %v3691_v55 = vpop.f32.mrf.mxu1  ;;  %v5113_v42 = vpop.f32.mrf.mxu0 }
0x25a1   :  { %5385 = vrcp.f32 %v3762_v61  ;;  %v4088_v61 = vld [vmem:[%s6724_s26 + $0x18] sm:$0xff]  ;;  %v4086_v42 = vld [vmem:[%s6724_s26 + $0x8] sm:$0xff] }
0x25a2   :  { %v5094_v45 = vpop.f32.mrf.mxu1 }
0x25a3   :  { %v4085_v45 = vld [vmem:[%s6724_s26] sm:$0xff] }
0x25ae   :  { %v5386_v16 = vpop.eup %5385 }
0x25af   :  { %v3766_v25 = vmul.f32 %v5386_v16, %v3691_v55  ;;  %v4087_v55 = vld [vmem:[%s6724_s26 + $0x10] sm:$0xff] }
0x25b1   :  { %3768 = vrot.lane.b32.xlu0 %v3766_v25, %s5454_s29 }
0x2623   :  { %v3769_v48 = vpop.permute.xlu0 %3768 }
0x2624   :  { %v3771_v39 = vadd.f32 %v3769_v48, %v6488_v56 }
0x2626   :  { %v3772_v49 = vmul.f32 %v3771_v39, %v6395_v57 }
0x2628   :  { %v3773_v53 = vmax.f32 %v3772_v49, 0.0  ;;  %v4526_v49 = vld [vmem:[%s6725_s28] ss:$0 sm:$0xff] }
0x262a   :  { %3775 = vrot.lane.b32.xlu1 %v3773_v53, %s5452_s0 }
0x269c   :  { %v3776_v52 = vpop.permute.xlu1 %3775 }
0x269d   :  { %v3778_v23 = vadd.f32 %v3776_v52, %v6481_v19 }
0x269f   :  { %v3779_v6 = vsel %vm452_vm2, %v3778_v23, 0.0 }
0x26a0   :  { %3780 = vadd.xlane.f32.xlu0 %v3779_v6 }
0x2729   :  { %v3781_v38 = vpop.xlane.xlu0 %3780 }
0x272a   :  { %v3782_v22 = vadd.f32 %v3781_v38, %v6407_v13 }
0x272c   :  { %v3784_v0 = vmul.f32 0.010416667, %v3782_v22  ;;  %v4091_v22 = vld [vmem:[%s6726_s1 + $0x8] sm:$0xff] }
0x272e   :  { %v3785_v31 = vsub.f32 %v6170_v20, %v3784_v0  ;;  %v3791_v56 = vsub.f32 %v6403_v43, %v3784_v0  ;;  %v3797_v57 = vsub.f32 %v3778_v23, %v3784_v0  ;;  %v4523_v20 = vld [vmem:[%s6721_s18] ss:$0 sm:$0xff] }
0x272f   :  { %v4524_v43 = vld [vmem:[%s6722_s22] ss:$0 sm:$0xff] }
0x2730   :  { %v3792_v29 = vmul.f32 %v3791_v56, %v3791_v56  ;;  %v3786_v7 = vmul.f32 %v3785_v31, %v3785_v31  ;;  %v3798_v63 = vmul.f32 %v3797_v57, %v3797_v57  ;;  %v4090_v0 = vld [vmem:[%s6726_s1] sm:$0xff] }
0x2732   :  { %v3793_v19 = vsel %vm452_vm2, %v3792_v29, 0.0  ;;  %v3787_v2 = vsel %vm452_vm2, %v3786_v7, 0.0  ;;  %v3799_v13 = vsel %vm452_vm2, %v3798_v63, 0.0 }
0x2733   :  { %3794 = vadd.xlane.f32.xlu0 %v3793_v19  ;;  %3788 = vadd.xlane.f32.xlu1 %v3787_v2  ;;  %v4093_v19 = vld [vmem:[%s5644_s13] sm:$0xff] }
0x2734   :  { %v4531_v2 = vld [vmem:[%s5639_s20] ss:$0 sm:$0xff] }
0x2737   :  { %3800 = vadd.xlane.f32.xlu0 %v3799_v13 }
0x2744   :  { %3918 = vrot.lane.b32.xlu1 %v4523_v20, %s5454_s29 }
0x2748   :  { %4002 = vrot.lane.b32.xlu1 %v4523_v20, %s5453_s5 }
0x274c   :  { %4006 = vrot.lane.b32.xlu1 %v4524_v43, %s5453_s5 }
0x274d   :  { %3922 = vrot.lane.b32.xlu0 %v4524_v43, %s5454_s29 }
0x27bc   :  { %v3795_v5 = vpop.xlane.xlu0 %3794  ;;  %v3789_v21 = vpop.xlane.xlu1 %3788 }
0x27bd   :  { %v3796_v26 = vadd.f32 %v3795_v5, %v3789_v21 }
0x27c0   :  { %v3801_v46 = vpop.xlane.xlu0 %3800  ;;  %v3919_v54 = vpop.permute.xlu1 %3918 }
0x27c1   :  { %v3802_v35 = vadd.f32 %v3801_v46, %v3796_v26 }
0x27c3   :  { %v3803_v47 = vmul.f32 0.010416667, %v3802_v35 }
0x27c4   :  { %v4003_v24 = vpop.permute.xlu1 %4002  ;;  %v3923_v10 = vpop.permute.xlu0 %3922 }
0x27c5   :  { %v3804_v9 = vadd.f32 1e-05, %v3803_v47 }
0x27c7   :  { %5387 = vrsqrt.f32 %v3804_v9 }
0x27c8   :  { %v4007_v40 = vpop.permute.xlu1 %4006 }
0x27d4   :  { %v5388_v34 = vpop.eup %5387 }
0x27d5   :  { %v4001_v41 = vmul.f32 %v5388_v34, %v3797_v57  ;;  %v3821_v58 = vmul.f32 %v5388_v34, %v3785_v31  ;;  %v3917_v12 = vmul.f32 %v5388_v34, %v3791_v56  ;;  %v4529_v31 = vld [vmem:[%s6727_s2] ss:$0 sm:$0xff] }
0x27d7   :  { %v4005_v62 = vmul.f32 %v4003_v24, %v4001_v41  ;;  %v3828_v30 = vmul.f32 %v4523_v20, %v3821_v58  ;;  %v3921_v17 = vmul.f32 %v3919_v54, %v3917_v12 }
0x27d9   :  { %v4009_v50 = vadd.f32 %v4007_v40, %v4005_v62  ;;  %v3835_v32 = vadd.f32 %v4524_v43, %v3828_v30  ;;  %v3925_v11 = vadd.f32 %v3923_v10, %v3921_v17 }
0x27db   :  { %v4010_v37 = vmax.f32 %v4009_v50, 0.0  ;;  %v3836_v27 = vmax.f32 %v3835_v32, 0.0  ;;  %v3926_v8 = vmax.f32 %v3925_v11, 0.0 }
0x27dd   :  { %5123 = vmatmul.mubr.msk.f32.vlgmr.msra.gmra.mxu1 %vm452_vm2, %v3836_v27  ;;  %5145 = vmatmul.mubr.msk.f32.vlgmr.msra.gmra.mxu0 %vm452_vm2, %v4010_v37 }
0x27de   :  { %5126 = vmatpush3.msra.mxu1 %v3815_v33  ;;  %5133 = vmatprep.mubr.msk.f32.mxu1 %vm5450_vm1, %v6710_v18 }
0x27df   :  { %5127 = vmatprep.subr.mxu1 %v6710_v18  ;;  %5162 = vmatprep.mubr.msk.f32.mxu0 %vm5450_vm1, %v6710_v18 }
0x27e0   :  { %5128 = vmatpush3.msra.mxu1 %v3814_v14  ;;  %5159 = vmatpush3.msra.mxu0 %v4091_v22 }
0x27e1   :  { %5129 = vmatprep.subr.mxu1 %v6710_v18  ;;  %5160 = vmatprep.subr.mxu0 %v6710_v18 }
0x27e2   :  { %5130 = vmatpush3.msra.mxu1 %v3813_v36  ;;  %5161 = vmatpush3.msra.mxu0 %v4090_v0 }
0x27e3   :  { %5131 = vmatprep.subr.mxu1 %v6710_v18 }
0x27e4   :  { %5132 = vmatpush3.msra.mxu1 %v3812_v44 }
0x27e5   :  { %5134 = vmatmul.mubr.msk.f32.vlgmr.msra.gmra.mxu1 %vm452_vm2, %v3926_v8  ;;  %5147 = vmatprep.subr.mxu1 %v6710_v18 }
0x27e6   :  { %5155 = vmatprep.mubr.msk.f32.mxu1 %vm5450_vm1, %v6710_v18  ;;  %5148 = vmatpush3.msra.mxu1 %v4088_v61 }
0x27e7   :  { %5149 = vmatprep.subr.mxu1 %v6710_v18 }
0x27e8   :  { %5150 = vmatpush3.msra.mxu1 %v4087_v55 }
0x27e9   :  { %5151 = vmatprep.subr.mxu1 %v6710_v18 }
0x27ea   :  { %5152 = vmatpush3.msra.mxu1 %v4086_v42 }
0x27eb   :  { %5153 = vmatprep.subr.mxu1 %v6710_v18 }
0x27ec   :  { %5154 = vmatpush3.msra.mxu1 %v4085_v45 }
0x27ed   :  { %5165 = vmatprep.subr.mxu1 %v6710_v18 }
0x289d   :  { %v3906_v16 = vpop.f32.mrf.mxu1  ;;  %v4080_v25 = vpop.f32.mrf.mxu0 }
0x289e   :  { %v3916_v53 = vadd.f32 %v4526_v49, %v3906_v16 }
0x289f   :  { %v5124_v48 = vpop.f32.mrf.mxu1  ;;  %v5146_v39 = vpop.f32.mrf.mxu0 }
0x28a5   :  { %v3996_v52 = vpop.f32.mrf.mxu1 }
0x28a6   :  { %v4000_v23 = vadd.f32 %v3996_v52, %v3916_v53 }
0x28a7   :  { %v5135_v6 = vpop.f32.mrf.mxu1 }
0x28a8   :  { %v4084_v38 = vadd.f32 %v4080_v25, %v4000_v23 }
0x28aa   :  { %5156 = vmatmul.mubr.msk.f32.vlgmr.msra.gmra.mxu1 %vm452_vm2, %v4084_v38 }
0x28ab   :  { %5167 = vmatprep.mubr.msk.f32.mxu1 %vm5450_vm1, %v6710_v18  ;;  %5166 = vmatpush3.msra.mxu1 %v4093_v19  ;;  %v4533_v18 = vld [vmem:[%s5649_s4] ss:$0 sm:$0xff]  ;;  %vm4335_vm1 = vcmask 39936  }
0x296a   :  { %v4170_v56 = vpop.f32.mrf.mxu1 }
0x296b   :  { %v4171_v57 = vadd.f32 %v4529_v31, %v4170_v56 }
0x296c   :  { %v5157_v29 = vpop.f32.mrf.mxu1 }
0x296d   :  { %v4174_v7 = vmax.f32 %v4171_v57, 0.0 }
0x296f   :  { %5163 = vmatmul.mubr.msk.f32.vlgmr.msra.gmra.mxu0 %vm4181_vm9, %v4174_v7 }
0x2a2f   :  { %v4251_v63 = vpop.f32.mrf.mxu0 }
0x2a30   :  { %v4252_v13 = vadd.f32 %v4531_v2, %v4251_v63 }
0x2a31   :  { %v5164_v20 = vpop.f32.mrf.mxu0 }
0x2a32   :  { %v4255_v43 = vmax.f32 %v4252_v13, 0.0 }
0x2a34   :  { %5168 = vmatmul.mubr.msk.f32.vlgmr.msra.gmra.mxu1 %vm232_vm0, %v4255_v43 }
0x2af4   :  { %v4331_v28 = vpop.f32.mrf.mxu1 }
0x2af5   :  { %v4332_v59 = vadd.f32 %v4533_v18, %v4331_v28 }
0x2af6   :  { %v5169_v1 = vpop.f32.mrf.mxu1 }
0x2af7   :  { %4336 = vst.msk [vmem:[#allocation2] sm:$0xff] %vm4335_vm1, %v4332_v59 }
0x2af8   :  { %5400 = shalt.err (!%p5397_p4)
}
0x2af9   :  { %4346 = dma.vmem_to_hbm [thread:$0]  %s4344_s10, 128, %s5654_s27, [#allocation3]  }
0x2afa   :  { %5409 = dma.done.wait [#allocation3], 128  }
0x2afb   :  { %5410 = vsyncadd [#allocation3], 4294967168 }
0x2afc   :  { %4350 = vsyncpa [#allocation3], 1 }

</bundles_post_ra>
